<compile_context>
chip_gen: v7x
topology: tpu7x:2x2x1
jax: 0.10.0
libtpu: 0.0.40
codegen_flags: <defaults>
</compile_context>

<pallas_src>
import jax
import jax.numpy as jnp
from jax.experimental import pallas as pl
from jax.experimental.pallas import tpu as pltpu

LEAKY_SLOPE = 0.2
BN_EPS = 1e-5
VMEM_LIMIT = 48 * 1024 * 1024  # <= physical VMEM on every generation (v7x: 64MiB)


def _convt_kernel(xpad_ref, w6_ref, conv_ref, sum_ref, ssq_ref):
    # xpad_ref: (1, H+2, W+2, Cin)   zero-padded input, NHWC, f32
    # w6_ref:   (2, 6*Cin, 2*Cout)   folded weight slab per output-row parity, bf16
    # conv_ref: (1, H, 2, W, 2*Cout) conv output; dims = (n, u, py, v, px*Cout+c)
    #                                -> free row-major reshape gives NHWC
    # sum_ref / ssq_ref: (1, 1, Cout) per-batch BN partial sums (reduced on host)
    h = conv_ref.shape[1]
    w = conv_ref.shape[3]
    two_cout = conv_ref.shape[4]
    cout = two_cout // 2
    hw = h * w

    s_acc = jnp.zeros((1, cout), jnp.float32)
    q_acc = jnp.zeros((1, cout), jnp.float32)
    for py in range(2):                       # output-row parity (static unroll)
        # Folded LHS: 6 shifted taps (dy in {0,1}, sx in {0,1,2}) concatenated
        # along channels -> one MXU matmul with K = 6*Cin per parity instead of
        # 8 tiny K=Cin matmuls.  Taps are sliced straight from the padded VMEM
        # block (no replicated tensor in HBM).
        taps = [xpad_ref[0, py + dy:py + dy + h, sx:sx + w, :]
                for dy in range(2) for sx in range(3)]
        lhs = jnp.concatenate(taps, axis=-1).reshape(hw, -1)          # (HW, 6Cin)
        r = jnp.dot(lhs.astype(jnp.bfloat16), w6_ref[py],
                    preferred_element_type=jnp.float32)               # (HW, 2Cout)
        # columns are (px, c); rows are (u, v) -> store at (u, py, v, px*Cout+c)
        conv_ref[0, :, py, :, :] = r.reshape(h, w, two_cout)

        colsum = jnp.sum(r, axis=0, keepdims=True)                    # (1, 2Cout)
        colssq = jnp.sum(r * r, axis=0, keepdims=True)
        s_acc = s_acc + colsum[:, :cout] + colsum[:, cout:]
        q_acc = q_acc + colssq[:, :cout] + colssq[:, cout:]
    sum_ref[0] = s_acc
    ssq_ref[0] = q_acc


def _bn_lrelu_cat_kernel(conv_ref, y_ref, scale_ref, shift_ref, out_ref):
    # conv_ref:  (1, TH, OW, Cout)    NHWC row-tile of the conv output
    # y_ref:     (1, Cy, TH*OW)       NCHW-flat row-tile of the skip input
    # scale/shift: (1, Cout)          folded BatchNorm parameters
    # out_ref:   (1, Cout+Cy, TH*OW)  NCHW-flat row-tile of the final output
    th, ow, cout = conv_ref.shape[1], conv_ref.shape[2], conv_ref.shape[3]
    x = conv_ref[0].reshape(th * ow, cout)                 # (S, Cout)
    xn = x * scale_ref[...] + shift_ref[...]               # BatchNorm (folded)
    act = jnp.where(xn >= 0, xn, LEAKY_SLOPE * xn)         # LeakyReLU(0.2)
    # channels-last -> channels-major in-kernel (XLU), so the output is already
    # NCHW-flat and lane-dense; concat realised as two contiguous slice stores.
    out_ref[0, :cout, :] = jnp.transpose(act)              # (Cout, S)
    out_ref[0, cout:, :] = y_ref[0]                        # skip pass-through


def _build_w6(w_pt):
    """Fold the ConvTranspose2d weight (Cin,Cout,4,4) into per-parity-row slabs.

    Returns (2, 6*Cin, 2*Cout):  slab[py][(dy*3+sx)*Cin + ci, px*Cout + co]
    (zero where the tap sx does not feed output column-parity px)."""
    cin, cout = w_pt.shape[0], w_pt.shape[1]
    w6 = jnp.zeros((2, 2, 3, cin, 2, cout), jnp.float32)
    for py in range(2):
        for dy in range(2):
            for sx in range(3):
                for px in range(2):
                    dx = sx - px
                    if dx in (0, 1):
                        ky = 3 - 2 * dy - py
                        kx = 3 - 2 * dx - px
                        w6 = w6.at[py, dy, sx, :, px, :].set(w_pt[:, :, ky, kx])
    return w6.reshape(2, 6 * cin, 2 * cout)


def up_block_forward(x_nchw, y_nchw, w_pt):
    """UpBlock forward. x: (N,Cin,H,W), y: (N,Cy,2H,2W), w_pt: (Cin,Cout,4,4)
    (PyTorch ConvTranspose2d layout). Returns NCHW (N, Cout+Cy, 2H, 2W)."""
    n, cin, h, w = x_nchw.shape
    cout = w_pt.shape[1]
    cy = y_nchw.shape[1]
    oh, ow = 2 * h, 2 * w

    # ---- cheap glue: NHWC+pad of the (small) input, folded bf16 weight slabs.
    x_nhwc = jnp.transpose(x_nchw, (0, 2, 3, 1)).astype(jnp.float32)
    xpad = jnp.pad(x_nhwc, ((0, 0), (1, 1), (1, 1), (0, 0)))
    w6 = _build_w6(w_pt).astype(jnp.bfloat16)        # bf16 MXU operands, f32 acc
    y_flat = y_nchw.reshape(n, cy, oh * ow).astype(jnp.float32)   # free reshape

    # ---- pass 1: transposed conv + per-batch BN partial sums -----------------
    # TODO(synk): for very large images tile H here as well (2-row halo) so the
    # per-step block fits v7x's 64 MiB VMEM.
    conv, sums, ssqs = pl.pallas_call(
        _convt_kernel,
        grid=(n,),
        in_specs=[
            pl.BlockSpec((1, h + 2, w + 2, cin), lambda i: (i, 0, 0, 0)),
            pl.BlockSpec((2, 6 * cin, 2 * cout), lambda i: (0, 0, 0)),
        ],
        out_specs=[
            pl.BlockSpec((1, h, 2, w, 2 * cout), lambda i: (i, 0, 0, 0, 0)),
            pl.BlockSpec((1, 1, cout), lambda i: (i, 0, 0)),
            pl.BlockSpec((1, 1, cout), lambda i: (i, 0, 0)),
        ],
        out_shape=[
            jax.ShapeDtypeStruct((n, h, 2, w, 2 * cout), jnp.float32),
            jax.ShapeDtypeStruct((n, 1, cout), jnp.float32),
            jax.ShapeDtypeStruct((n, 1, cout), jnp.float32),
        ],
        compiler_params=pltpu.CompilerParams(
            dimension_semantics=("parallel",),
            vmem_limit_bytes=VMEM_LIMIT),
    )(xpad, w6)

    # (N, H, 2, W, 2*Cout) -> (N, OH, OW, Cout): pure row-major reshape, no copy.
    conv_nhwc = conv.reshape(n, oh, ow, cout)

    # ---- BatchNorm2d batch statistics (training mode; gamma=1, beta=0) -------
    count = float(n * oh * ow)
    csum = jnp.sum(sums, axis=(0, 1))
    cssq = jnp.sum(ssqs, axis=(0, 1))
    mean = csum / count
    var = jnp.maximum(cssq / count - mean * mean, 0.0)     # clamp: E[x^2]-m^2 >= 0
    inv_std = 1.0 / jnp.sqrt(var + BN_EPS)
    scale = inv_std.reshape(1, cout)
    shift = (-mean * inv_std).reshape(1, cout)

    # ---- pass 2: BN + LeakyReLU + concat, written NCHW-flat (lane dense) -----
    th = 16 if (oh % 16 == 0) else oh        # row tile; tune upward for big images
    out_flat = pl.pallas_call(
        _bn_lrelu_cat_kernel,
        grid=(n, oh // th),
        in_specs=[
            pl.BlockSpec((1, th, ow, cout), lambda i, t: (i, t, 0, 0)),
            pl.BlockSpec((1, cy, th * ow), lambda i, t: (i, 0, t)),
            pl.BlockSpec((1, cout), lambda i, t: (0, 0)),
            pl.BlockSpec((1, cout), lambda i, t: (0, 0)),
        ],
        out_specs=pl.BlockSpec((1, cout + cy, th * ow), lambda i, t: (i, 0, t)),
        out_shape=jax.ShapeDtypeStruct((n, cout + cy, oh * ow), jnp.float32),
        compiler_params=pltpu.CompilerParams(
            dimension_semantics=("parallel", "parallel"),
            vmem_limit_bytes=VMEM_LIMIT),
    )(conv_nhwc, y_flat, scale, shift)

    # Already NCHW: only a free reshape of the flat spatial axis remains.
    return out_flat.reshape(n, cout + cy, oh, ow)


def _reference(x_nchw, y_nchw, w_pt):
    """Pure-JAX (f32) reference of the PyTorch forward (NCHW in/out)."""
    x = jnp.transpose(x_nchw, (0, 2, 3, 1))
    w_hwio = jnp.flip(w_pt, axis=(2, 3)).transpose(2, 3, 0, 1)
    conv = jax.lax.conv_general_dilated(
        x, w_hwio, window_strides=(1, 1), padding=((2, 2), (2, 2)),
        lhs_dilation=(2, 2), dimension_numbers=("NHWC", "HWIO", "NHWC"),
        precision=jax.lax.Precision.HIGHEST)
    mean = conv.mean(axis=(0, 1, 2))
    var = conv.var(axis=(0, 1, 2))
    xn = (conv - mean) / jnp.sqrt(var + BN_EPS)
    act = jnp.where(xn >= 0, xn, LEAKY_SLOPE * xn)
    y = jnp.transpose(y_nchw, (0, 2, 3, 1))
    out = jnp.concatenate([act, y], axis=-1)
    return jnp.transpose(out, (0, 3, 1, 2))


if __name__ == "__main__":
    N, Cin, Cout, H, W = 2, 4, 8, 16, 16
    key = jax.random.PRNGKey(0)
    k_x, k_y, k_w = jax.random.split(key, 3)
    x = jax.random.normal(k_x, (N, Cin, H, W), jnp.float32)
    y = jax.random.normal(k_y, (N, Cout, 2 * H, 2 * W), jnp.float32)  # skip input
    w_pt = 0.1 * jax.random.normal(k_w, (Cin, Cout, 4, 4), jnp.float32)

    out = up_block_forward(x, y, w_pt)
    out = jax.block_until_ready(out)

    ref = _reference(x, y, w_pt)
    assert out.shape == (N, 2 * Cout, 2 * H, 2 * W)
    assert bool(jnp.all(jnp.isfinite(out)))
    assert bool(jnp.allclose(out, ref, atol=5e-2, rtol=5e-2))
    print("KERNEL_OK")
</pallas_src>

<mosaic_0001>
module attributes {stable_mosaic.version = 11 : i64} {
  func.func @_convt_kernel(%arg0: i32, %arg1: memref<1x18x18x4xf32, #tpu.memory_space<vmem>>, %arg2: memref<2x24x16xbf16, #tpu.memory_space<vmem>>, %arg3: memref<1x16x2x16x16xf32, #tpu.memory_space<vmem>>, %arg4: memref<1x1x8xf32, #tpu.memory_space<vmem>>, %arg5: memref<1x1x8xf32, #tpu.memory_space<vmem>>) attributes {dimension_semantics = [#tpu.dimension_semantics<parallel>], iteration_bounds = array<i64: 2>, scalar_prefetch = 0 : i64, scratch_operands = 0 : i64, tpu.core_type = #tpu.core_type<tc>, window_params = [{transform_indices = @transform_0, window_bounds = array<i64: 1, 18, 18, 4>}, {pipeline_mode = #tpu.pipeline_mode<synchronous>, transform_indices = @transform_1, window_bounds = array<i64: 2, 24, 16>}, {transform_indices = @transform_2, window_bounds = array<i64: 1, 16, 2, 16, 16>}, {transform_indices = @transform_3, window_bounds = array<i64: 1, 1, 8>}, {transform_indices = @transform_4, window_bounds = array<i64: 1, 1, 8>}]} {
    %cst = arith.constant 0.000000e+00 : f32
    %0 = vector.broadcast %cst : f32 to vector<1x8xf32>
    %cst_0 = arith.constant 0.000000e+00 : f32
    %1 = vector.broadcast %cst_0 : f32 to vector<1x8xf32>
    %c0 = arith.constant 0 : index
    %c0_1 = arith.constant 0 : index
    %c0_2 = arith.constant 0 : index
    %c0_3 = arith.constant 0 : index
    %2 = vector.load %arg1[%c0, %c0_1, %c0_2, %c0_3] : memref<1x18x18x4xf32, #tpu.memory_space<vmem>>, vector<1x16x16x4xf32>
    %3 = vector.shape_cast %2 : vector<1x16x16x4xf32> to vector<16x16x4xf32>
    %c0_4 = arith.constant 0 : index
    %c0_5 = arith.constant 0 : index
    %c1 = arith.constant 1 : index
    %c0_6 = arith.constant 0 : index
    %4 = vector.load %arg1[%c0_4, %c0_5, %c1, %c0_6] : memref<1x18x18x4xf32, #tpu.memory_space<vmem>>, vector<1x16x16x4xf32>
    %5 = vector.shape_cast %4 : vector<1x16x16x4xf32> to vector<16x16x4xf32>
    %c0_7 = arith.constant 0 : index
    %c0_8 = arith.constant 0 : index
    %c2 = arith.constant 2 : index
    %c0_9 = arith.constant 0 : index
    %6 = vector.load %arg1[%c0_7, %c0_8, %c2, %c0_9] : memref<1x18x18x4xf32, #tpu.memory_space<vmem>>, vector<1x16x16x4xf32>
    %7 = vector.shape_cast %6 : vector<1x16x16x4xf32> to vector<16x16x4xf32>
    %c0_10 = arith.constant 0 : index
    %c1_11 = arith.constant 1 : index
    %c0_12 = arith.constant 0 : index
    %c0_13 = arith.constant 0 : index
    %8 = vector.load %arg1[%c0_10, %c1_11, %c0_12, %c0_13] : memref<1x18x18x4xf32, #tpu.memory_space<vmem>>, vector<1x16x16x4xf32>
    %9 = vector.shape_cast %8 : vector<1x16x16x4xf32> to vector<16x16x4xf32>
    %c0_14 = arith.constant 0 : index
    %c1_15 = arith.constant 1 : index
    %c1_16 = arith.constant 1 : index
    %c0_17 = arith.constant 0 : index
    %10 = vector.load %arg1[%c0_14, %c1_15, %c1_16, %c0_17] : memref<1x18x18x4xf32, #tpu.memory_space<vmem>>, vector<1x16x16x4xf32>
    %11 = vector.shape_cast %10 : vector<1x16x16x4xf32> to vector<16x16x4xf32>
    %c0_18 = arith.constant 0 : index
    %c1_19 = arith.constant 1 : index
    %c2_20 = arith.constant 2 : index
    %c0_21 = arith.constant 0 : index
    %12 = vector.load %arg1[%c0_18, %c1_19, %c2_20, %c0_21] : memref<1x18x18x4xf32, #tpu.memory_space<vmem>>, vector<1x16x16x4xf32>
    %13 = vector.shape_cast %12 : vector<1x16x16x4xf32> to vector<16x16x4xf32>
    %14 = tpu.concatenate %3, %5, %7, %9, %11, %13 in 2 : vector<16x16x4xf32>, vector<16x16x4xf32>, vector<16x16x4xf32>, vector<16x16x4xf32>, vector<16x16x4xf32>, vector<16x16x4xf32> -> vector<16x16x24xf32>
    %15 = vector.shape_cast %14 : vector<16x16x24xf32> to vector<256x24xf32>
    %16 = arith.truncf %15 : vector<256x24xf32> to vector<256x24xbf16>
    %c0_22 = arith.constant 0 : index
    %c0_23 = arith.constant 0 : index
    %c0_24 = arith.constant 0 : index
    %17 = vector.load %arg2[%c0_22, %c0_23, %c0_24] : memref<2x24x16xbf16, #tpu.memory_space<vmem>>, vector<1x24x16xbf16>
    %18 = vector.shape_cast %17 : vector<1x24x16xbf16> to vector<24x16xbf16>
    %cst_25 = arith.constant dense<0.000000e+00> : vector<256x16xf32>
    %19 = tpu.matmul %16, %18, %cst_25 {dimension_numbers = #tpu.dot_dimension_numbers<[1], [0], [0], [1], [0, 0, 1, 1], [], []>} : vector<256x24xbf16>, vector<24x16xbf16>, vector<256x16xf32> -> vector<256x16xf32>
    %20 = vector.shape_cast %19 : vector<256x16xf32> to vector<16x16x16xf32>
    %c0_26 = arith.constant 0 : index
    %c0_27 = arith.constant 0 : index
    %c0_28 = arith.constant 0 : index
    %c0_29 = arith.constant 0 : index
    %c0_30 = arith.constant 0 : index
    %21 = vector.load %arg3[%c0_26, %c0_27, %c0_28, %c0_29, %c0_30] : memref<1x16x2x16x16xf32, #tpu.memory_space<vmem>>, vector<1x16x1x16x16xf32>
    %22 = vector.shape_cast %21 : vector<1x16x1x16x16xf32> to vector<16x16x16xf32>
    %23 = vector.shape_cast %20 : vector<16x16x16xf32> to vector<1x16x1x16x16xf32>
    tpu.vector_store %arg3[%c0_26, %c0_27, %c0_28, %c0_29, %c0_30], %23 {strides = array<i32>} : memref<1x16x2x16x16xf32, #tpu.memory_space<vmem>>, vector<1x16x1x16x16xf32>,
    %cst_31 = arith.constant dense<0.000000e+00> : vector<16xf32>
    %24 = vector.multi_reduction <add>, %19, %cst_31 [0] : vector<256x16xf32> to vector<16xf32>
    %25 = vector.shape_cast %24 : vector<16xf32> to vector<1x16xf32>
    %26 = arith.mulf %19, %19 : vector<256x16xf32>
    %cst_32 = arith.constant dense<0.000000e+00> : vector<16xf32>
    %27 = vector.multi_reduction <add>, %26, %cst_32 [0] : vector<256x16xf32> to vector<16xf32>
    %28 = vector.shape_cast %27 : vector<16xf32> to vector<1x16xf32>
    %29 = vector.extract_strided_slice %25 {offsets = [0, 0], sizes = [1, 8], strides = [1, 1]} : vector<1x16xf32> to vector<1x8xf32>
    %30 = arith.addf %0, %29 : vector<1x8xf32>
    %31 = vector.extract_strided_slice %25 {offsets = [0, 8], sizes = [1, 8], strides = [1, 1]} : vector<1x16xf32> to vector<1x8xf32>
    %32 = arith.addf %30, %31 : vector<1x8xf32>
    %33 = vector.extract_strided_slice %28 {offsets = [0, 0], sizes = [1, 8], strides = [1, 1]} : vector<1x16xf32> to vector<1x8xf32>
    %34 = arith.addf %1, %33 : vector<1x8xf32>
    %35 = vector.extract_strided_slice %28 {offsets = [0, 8], sizes = [1, 8], strides = [1, 1]} : vector<1x16xf32> to vector<1x8xf32>
    %36 = arith.addf %34, %35 : vector<1x8xf32>
    %c0_33 = arith.constant 0 : index
    %c1_34 = arith.constant 1 : index
    %c0_35 = arith.constant 0 : index
    %c0_36 = arith.constant 0 : index
    %37 = vector.load %arg1[%c0_33, %c1_34, %c0_35, %c0_36] : memref<1x18x18x4xf32, #tpu.memory_space<vmem>>, vector<1x16x16x4xf32>
    %38 = vector.shape_cast %37 : vector<1x16x16x4xf32> to vector<16x16x4xf32>
    %c0_37 = arith.constant 0 : index
    %c1_38 = arith.constant 1 : index
    %c1_39 = arith.constant 1 : index
    %c0_40 = arith.constant 0 : index
    %39 = vector.load %arg1[%c0_37, %c1_38, %c1_39, %c0_40] : memref<1x18x18x4xf32, #tpu.memory_space<vmem>>, vector<1x16x16x4xf32>
    %40 = vector.shape_cast %39 : vector<1x16x16x4xf32> to vector<16x16x4xf32>
    %c0_41 = arith.constant 0 : index
    %c1_42 = arith.constant 1 : index
    %c2_43 = arith.constant 2 : index
    %c0_44 = arith.constant 0 : index
    %41 = vector.load %arg1[%c0_41, %c1_42, %c2_43, %c0_44] : memref<1x18x18x4xf32, #tpu.memory_space<vmem>>, vector<1x16x16x4xf32>
    %42 = vector.shape_cast %41 : vector<1x16x16x4xf32> to vector<16x16x4xf32>
    %c0_45 = arith.constant 0 : index
    %c2_46 = arith.constant 2 : index
    %c0_47 = arith.constant 0 : index
    %c0_48 = arith.constant 0 : index
    %43 = vector.load %arg1[%c0_45, %c2_46, %c0_47, %c0_48] : memref<1x18x18x4xf32, #tpu.memory_space<vmem>>, vector<1x16x16x4xf32>
    %44 = vector.shape_cast %43 : vector<1x16x16x4xf32> to vector<16x16x4xf32>
    %c0_49 = arith.constant 0 : index
    %c2_50 = arith.constant 2 : index
    %c1_51 = arith.constant 1 : index
    %c0_52 = arith.constant 0 : index
    %45 = vector.load %arg1[%c0_49, %c2_50, %c1_51, %c0_52] : memref<1x18x18x4xf32, #tpu.memory_space<vmem>>, vector<1x16x16x4xf32>
    %46 = vector.shape_cast %45 : vector<1x16x16x4xf32> to vector<16x16x4xf32>
    %c0_53 = arith.constant 0 : index
    %c2_54 = arith.constant 2 : index
    %c2_55 = arith.constant 2 : index
    %c0_56 = arith.constant 0 : index
    %47 = vector.load %arg1[%c0_53, %c2_54, %c2_55, %c0_56] : memref<1x18x18x4xf32, #tpu.memory_space<vmem>>, vector<1x16x16x4xf32>
    %48 = vector.shape_cast %47 : vector<1x16x16x4xf32> to vector<16x16x4xf32>
    %49 = tpu.concatenate %38, %40, %42, %44, %46, %48 in 2 : vector<16x16x4xf32>, vector<16x16x4xf32>, vector<16x16x4xf32>, vector<16x16x4xf32>, vector<16x16x4xf32>, vector<16x16x4xf32> -> vector<16x16x24xf32>
    %50 = vector.shape_cast %49 : vector<16x16x24xf32> to vector<256x24xf32>
    %51 = arith.truncf %50 : vector<256x24xf32> to vector<256x24xbf16>
    %c1_57 = arith.constant 1 : index
    %c0_58 = arith.constant 0 : index
    %c0_59 = arith.constant 0 : index
    %52 = vector.load %arg2[%c1_57, %c0_58, %c0_59] : memref<2x24x16xbf16, #tpu.memory_space<vmem>>, vector<1x24x16xbf16>
    %53 = vector.shape_cast %52 : vector<1x24x16xbf16> to vector<24x16xbf16>
    %cst_60 = arith.constant dense<0.000000e+00> : vector<256x16xf32>
    %54 = tpu.matmul %51, %53, %cst_60 {dimension_numbers = #tpu.dot_dimension_numbers<[1], [0], [0], [1], [0, 0, 1, 1], [], []>} : vector<256x24xbf16>, vector<24x16xbf16>, vector<256x16xf32> -> vector<256x16xf32>
    %55 = vector.shape_cast %54 : vector<256x16xf32> to vector<16x16x16xf32>
    %c0_61 = arith.constant 0 : index
    %c0_62 = arith.constant 0 : index
    %c1_63 = arith.constant 1 : index
    %c0_64 = arith.constant 0 : index
    %c0_65 = arith.constant 0 : index
    %56 = vector.load %arg3[%c0_61, %c0_62, %c1_63, %c0_64, %c0_65] : memref<1x16x2x16x16xf32, #tpu.memory_space<vmem>>, vector<1x16x1x16x16xf32>
    %57 = vector.shape_cast %56 : vector<1x16x1x16x16xf32> to vector<16x16x16xf32>
    %58 = vector.shape_cast %55 : vector<16x16x16xf32> to vector<1x16x1x16x16xf32>
    tpu.vector_store %arg3[%c0_61, %c0_62, %c1_63, %c0_64, %c0_65], %58 {strides = array<i32>} : memref<1x16x2x16x16xf32, #tpu.memory_space<vmem>>, vector<1x16x1x16x16xf32>,
    %cst_66 = arith.constant dense<0.000000e+00> : vector<16xf32>
    %59 = vector.multi_reduction <add>, %54, %cst_66 [0] : vector<256x16xf32> to vector<16xf32>
    %60 = vector.shape_cast %59 : vector<16xf32> to vector<1x16xf32>
    %61 = arith.mulf %54, %54 : vector<256x16xf32>
    %cst_67 = arith.constant dense<0.000000e+00> : vector<16xf32>
    %62 = vector.multi_reduction <add>, %61, %cst_67 [0] : vector<256x16xf32> to vector<16xf32>
    %63 = vector.shape_cast %62 : vector<16xf32> to vector<1x16xf32>
    %64 = vector.extract_strided_slice %60 {offsets = [0, 0], sizes = [1, 8], strides = [1, 1]} : vector<1x16xf32> to vector<1x8xf32>
    %65 = arith.addf %32, %64 : vector<1x8xf32>
    %66 = vector.extract_strided_slice %60 {offsets = [0, 8], sizes = [1, 8], strides = [1, 1]} : vector<1x16xf32> to vector<1x8xf32>
    %67 = arith.addf %65, %66 : vector<1x8xf32>
    %68 = vector.extract_strided_slice %63 {offsets = [0, 0], sizes = [1, 8], strides = [1, 1]} : vector<1x16xf32> to vector<1x8xf32>
    %69 = arith.addf %36, %68 : vector<1x8xf32>
    %70 = vector.extract_strided_slice %63 {offsets = [0, 8], sizes = [1, 8], strides = [1, 1]} : vector<1x16xf32> to vector<1x8xf32>
    %71 = arith.addf %69, %70 : vector<1x8xf32>
    %c0_68 = arith.constant 0 : index
    %c0_69 = arith.constant 0 : index
    %c0_70 = arith.constant 0 : index
    %72 = vector.load %arg4[%c0_68, %c0_69, %c0_70] : memref<1x1x8xf32, #tpu.memory_space<vmem>>, vector<1x1x8xf32>
    %73 = vector.shape_cast %72 : vector<1x1x8xf32> to vector<1x8xf32>
    %74 = vector.shape_cast %67 : vector<1x8xf32> to vector<1x1x8xf32>
    tpu.vector_store %arg4[%c0_68, %c0_69, %c0_70], %74 {strides = array<i32>} : memref<1x1x8xf32, #tpu.memory_space<vmem>>, vector<1x1x8xf32>,
    %c0_71 = arith.constant 0 : index
    %c0_72 = arith.constant 0 : index
    %c0_73 = arith.constant 0 : index
    %75 = vector.load %arg5[%c0_71, %c0_72, %c0_73] : memref<1x1x8xf32, #tpu.memory_space<vmem>>, vector<1x1x8xf32>
    %76 = vector.shape_cast %75 : vector<1x1x8xf32> to vector<1x8xf32>
    %77 = vector.shape_cast %71 : vector<1x8xf32> to vector<1x1x8xf32>
    tpu.vector_store %arg5[%c0_71, %c0_72, %c0_73], %77 {strides = array<i32>} : memref<1x1x8xf32, #tpu.memory_space<vmem>>, vector<1x1x8xf32>,
    return
  }
  func.func @transform_0(%arg0: i32) -> (i32, i32, i32, i32) {
    %c0_i32 = arith.constant 0 : i32
    %c0_i32_0 = arith.constant 0 : i32
    %c0_i32_1 = arith.constant 0 : i32
    %c0_i32_2 = arith.constant 0 : i32
    return %arg0, %c0_i32, %c0_i32_0, %c0_i32_1 : i32, i32, i32, i32
  }
  func.func @transform_1(%arg0: i32) -> (i32, i32, i32) {
    %c0_i32 = arith.constant 0 : i32
    %c0_i32_0 = arith.constant 0 : i32
    %c0_i32_1 = arith.constant 0 : i32
    %c0_i32_2 = arith.constant 0 : i32
    return %c0_i32, %c0_i32_0, %c0_i32_1 : i32, i32, i32
  }
  func.func @transform_2(%arg0: i32) -> (i32, i32, i32, i32, i32) {
    %c0_i32 = arith.constant 0 : i32
    %c0_i32_0 = arith.constant 0 : i32
    %c0_i32_1 = arith.constant 0 : i32
    %c0_i32_2 = arith.constant 0 : i32
    %c0_i32_3 = arith.constant 0 : i32
    return %arg0, %c0_i32, %c0_i32_0, %c0_i32_1, %c0_i32_2 : i32, i32, i32, i32, i32
  }
  func.func @transform_3(%arg0: i32) -> (i32, i32, i32) {
    %c0_i32 = arith.constant 0 : i32
    %c0_i32_0 = arith.constant 0 : i32
    %c0_i32_1 = arith.constant 0 : i32
    return %arg0, %c0_i32, %c0_i32_0 : i32, i32, i32
  }
  func.func @transform_4(%arg0: i32) -> (i32, i32, i32) {
    %c0_i32 = arith.constant 0 : i32
    %c0_i32_0 = arith.constant 0 : i32
    %c0_i32_1 = arith.constant 0 : i32
    return %arg0, %c0_i32, %c0_i32_0 : i32, i32, i32
  }
}

</mosaic_0001>

<bundles_post_ra>
// kernel: tpu_custom_call.1
= control target key start
LH: loop header
LB: loop body
LE: loop exit
PB: predicated region body
PF: predicated region fallthrough
CT: control target
= control target key end

     0   :  { %10 = vsyncpa [#allocation3], 0  ;;  %s6684_s0 = inlined_call_operand.vmem [shape: f32[2,18,18,4], index: 0, kind: input, shape index: {}]   ;;  %s6685_s1 = inlined_call_operand.vmem [shape: bf16[2,24,16], index: 1, kind: input, shape index: {}]   ;;  %s6686_s2 = inlined_call_operand.hbm [shape: f32[2,16,2,16,16], index: 2, kind: output, shape index: {0}]   ;;  %s6687_s3 = inlined_call_operand.hbm [shape: f32[2,1,8], index: 3, kind: output, shape index: {1}]   ;;  %s6688_s4 = inlined_call_operand.hbm [shape: f32[2,1,8], index: 4, kind: output, shape index: {2}]  }
   0x1   :  { %12 = vsyncpa [#allocation3 + $0x1], 0 }
   0x2   :  { %13 = vsyncpa [#allocation5], 0 }
   0x3   :  { %15 = vsyncpa [#allocation5 + $0x1], 0  ;;  %s4813_s15 = smov 0   ;;  %s4815_s16 = smov 0  }
   0x4   :  { %s4817_s17 = smov 0   ;;  %s4819_s18 = smov 0  }
   0x5 LB: > { %s4834_s19 = sadd.s32 4294967295, %s4776_s18   ;;  %s3282_s20 = sadd.s32 4294967294, %s4776_s18   ;;  %s4776_s18 = sphi %s4819_s18, %s6791_s18   ;;  %s4772_s17 = sphi %s4817_s17, %s6790_s17   ;;  %s4768_s16 = sphi %s4815_s16, %s6789_s16   ;;  %s4764_s15 = sphi %s4813_s15, %s6788_s15  }
   0x6   : > { %s4838_s21 = sadd.s32 1, %s4776_s18   ;;  %s75_s22 = sadd.s32 1, %s4772_s17 }
   0x7   : > { %s72_s23 = ssub.s32 %s4776_s18, %s4838_s21  ;;  %p85_p0 = scmp.ne.s32.totalorder %s4772_s17, %s4768_s16 }
   0x8   : > { %p73_p1 = scmp.eq.s32.totalorder %s72_s23, 0  ;;  %p86_p2 = scmp.eq.s32.totalorder %s4834_s19, 1 }
   0x9   : > { %p91_p3 = scmp.ne.s32.totalorder %s4768_s16, %s4764_s15  ;;  %p92_p4 = scmp.eq.s32.totalorder %s3282_s20, 1 }
   0xa   : > { %s4851_s24 = scalar_select %p73_p1, %s4772_s17, %s75_s22  }
   0xb   : > { %p4853_p5 = por %p86_p2, %p85_p0  ;;  %p4857_p6 = por %p92_p4, %p91_p3 }
   0xc   : > { %p3285_p7 = scmp.ge.s32.totalorder %s4776_s18, 1  ;;  %p173_p8 = scmp.lt.s32.totalorder %s4776_s18, 3 }
   0xe   : > { %p174_p9 = pnand %p3285_p7, %p173_p8 }
  0x10   : > { %177 = sbr.rel (%p174_p9) target bundleno = 869 (0x365), region = 28 }
  0x17   : > { %p207_p10 = scmp.lt.s32.totalorder %s4834_s19, 1  ;;  %s4778_s6 = smov 4   ;;  %vm1288_vm0 = vcmask 1043456   ;;  %vm1046_vm1 = vcmask 31744   ;;  %vm1079_vm2 = vcmask 64512   ;;  %vm1112_vm3 = vcmask 97280  }
  0x18   : > { %s4779_s7 = smov 8   ;;  %s4780_s8 = smov 12   ;;  %vm1145_vm4 = vcmask 130048   ;;  %vm1178_vm5 = vcmask 162816   ;;  %vm1239_vm6 = vcmask 195584  }
  0x19   : > { %s208_s27 = scalar_select %p207_p10, %s4834_s19, 1 }
  0x1a   : > { %s4781_s9 = smov 16   ;;  %s4782_s14 = smov 20  }
  0x1b   : > { %s3765_s28 = smul.u32 432, %s208_s27  ;;  %s6292_s29 = sand.u32 1, %s4768_s16  }
  0x1c   : > { %s3286_s30 = sshll.u32 %s6292_s29, 9  ;;  %s3120_s13 = scalar_lea.sflag [#allocation3], %s6292_s29 }
  0x1d   : > { %s4868_s5 = scalar_lea.vmem %s6684_s0, %s3765_s28  ;;  %s4784_s22 = smov [#allocation2]  }
  0x1e   : > { %v4871_v0 = vld [vmem:[%s4868_s5 + $0x31] sm:$0xff]  ;;  %v4874_v1 = vld [vmem:[%s4868_s5 + $0x39] sm:$0xff]  ;;  %v245_v2 = vld [vmem:[%s4868_s5 + $0x1] sm:$0xff]  ;;  %s4658_s23 = sshll.u32 %s4784_s22, 4  ;;  %s4659_s23 = int_to_ptr.vmem [resolvable:$false] %s4658_s23 }
  0x1f   : > { %v4879_v3 = vpack.i.bf16 %v4874_v1, %v4871_v0  ;;  %v246_v4 = vld [vmem:[%s4868_s5 + $0x9] sm:$0xff]  ;;  %v4886_v6 = vld [vmem:[%s4868_s5 + $0x51] sm:$0xff]  ;;  %v247_v8 = vld [vmem:[%s4868_s5 + $0x19] sm:$0xff]  ;;  %s4660_s27 = scalar_lea.vmem %s4659_s23, 16384 }
  0x20   : > { %v4883_v5 = vld [vmem:[%s4868_s5 + $0x49] sm:$0xff]  ;;  %v3822_v7 = vpack.i.bf16 %v246_v4, %v245_v2  ;;  %v248_v9 = vld [vmem:[%s4868_s5 + $0x21] sm:$0xff]  ;;  %v4900_v12 = vld [vmem:[%s4868_s5 + $0x79] sm:$0xff] }
  0x21   : > { %3833 = vrot.lane.b32.xlu1 %v4879_v3, %s4778_s6  ;;  %v4894_v10 = vpack.i.bf16 %v4886_v6, %v4883_v5  ;;  %v4897_v11 = vpack.i.bf16 %v248_v9, %v247_v8  ;;  %v4903_v13 = vld [vmem:[%s4868_s5 + $0x81] sm:$0xff]  ;;  %v4909_v15 = vld [vmem:[%s4868_s5 + $0x69] sm:$0xff]  ;;  %v4152_v17 = vpack.i.bf16 %v4883_v5, %v4874_v1  ;;  %v4922_v19 = vld [vmem:[%s4868_s5 + $0xf1] sm:$0xff] }
  0x22   : > { %3823 = vrot.lane.b32.xlu0 %v3822_v7, %s4778_s6  ;;  %v4906_v14 = vld [vmem:[%s4868_s5 + $0x61] sm:$0xff]  ;;  %v4919_v18 = vpack.i.bf16 %v4903_v13, %v4900_v12  ;;  %v259_v21 = vld [vmem:[%s4868_s5 + $0xa9] sm:$0xff]  ;;  %v260_v22 = vld [vmem:[%s4868_s5 + $0xb1] sm:$0xff]  ;;  %v4107_v23 = vpack.i.bf16 %v4871_v0, %v4922_v19  ;;  %v4212_v56 = vpack.i.bf16 %v4900_v12, %v4909_v15 }
  0x23   : > { %v4157_v16 = vpack.i.bf16 %v4906_v14, %v4886_v6  ;;  %v4928_v20 = vpack.i.bf16 %v4909_v15, %v4906_v14  ;;  %v4935_v24 = vld [vmem:[%s4868_s5 + $0x91] sm:$0xff]  ;;  %v258_v25 = vld [vmem:[%s4868_s5 + $0x99] sm:$0xff]  ;;  %v4940_v26 = vpack.i.bf16 %v260_v22, %v259_v21  ;;  %v264_v29 = vld [vmem:[%s4868_s5 + $0xe1] sm:$0xff] }
  0x24   : > { %v4945_v27 = vpack.i.bf16 %v258_v25, %v4935_v24  ;;  %v263_v28 = vld [vmem:[%s4868_s5 + $0xd9] sm:$0xff]  ;;  %v261_v30 = vld [vmem:[%s4868_s5 + $0xc1] sm:$0xff]  ;;  %v262_v31 = vld [vmem:[%s4868_s5 + $0xc9] sm:$0xff]  ;;  %v4217_v55 = vpack.i.bf16 %v4935_v24, %v4903_v13 }
  0x25   : > { %3838 = vrot.lane.b32.xlu1 %v4894_v10, %s4778_s6  ;;  %v4953_v32 = vpack.i.bf16 %v264_v29, %v263_v28  ;;  %v4957_v33 = vpack.i.bf16 %v262_v31, %v261_v30  ;;  %v267_v34 = vld [vmem:[%s4868_s5 + $0x109] sm:$0xff]  ;;  %v268_v35 = vld [vmem:[%s4868_s5 + $0x111] sm:$0xff]  ;;  %v266_v36 = vld [vmem:[%s4868_s5 + $0xf9] sm:$0xff] }
  0x26   : > { %3828 = vrot.lane.b32.xlu0 %v4897_v11, %s4778_s6  ;;  %v3877_v37 = vpack.i.bf16 %v268_v35, %v267_v34  ;;  %v3872_v38 = vpack.i.bf16 %v266_v36, %v4922_v19  ;;  %v271_v39 = vld [vmem:[%s4868_s5 + $0x139] sm:$0xff]  ;;  %v272_v40 = vld [vmem:[%s4868_s5 + $0x141] sm:$0xff]  ;;  %v270_v42 = vld [vmem:[%s4868_s5 + $0x129] sm:$0xff] }
  0x27   : > { %v269_v41 = vld [vmem:[%s4868_s5 + $0x121] sm:$0xff]  ;;  %v3887_v43 = vpack.i.bf16 %v272_v40, %v271_v39  ;;  %v275_v45 = vld [vmem:[%s4868_s5 + $0x169] sm:$0xff]  ;;  %v276_v46 = vld [vmem:[%s4868_s5 + $0x171] sm:$0xff] }
  0x28   : > { %v3882_v44 = vpack.i.bf16 %v270_v42, %v269_v41  ;;  %v273_v47 = vld [vmem:[%s4868_s5 + $0x151] sm:$0xff]  ;;  %v274_v48 = vld [vmem:[%s4868_s5 + $0x159] sm:$0xff]  ;;  %v3897_v49 = vpack.i.bf16 %v276_v46, %v275_v45  ;;  %v280_v52 = vld [vmem:[%s4868_s5 + $0x22] sm:$0xff] }
  0x29   : > { %3848 = vrot.lane.b32.xlu1 %v4919_v18, %s4778_s6  ;;  %v3892_v50 = vpack.i.bf16 %v274_v48, %v273_v47  ;;  %v279_v51 = vld [vmem:[%s4868_s5 + $0x1a] sm:$0xff]  ;;  %v277_v53 = vld [vmem:[%s4868_s5 + $0x2] sm:$0xff]  ;;  %v278_v54 = vld [vmem:[%s4868_s5 + $0xa] sm:$0xff] }
  0x2a   : > { %3843 = vrot.lane.b32.xlu0 %v4928_v20, %s4778_s6  ;;  %v4988_v57 = vpack.i.bf16 %v280_v52, %v279_v51  ;;  %v3902_v58 = vpack.i.bf16 %v278_v54, %v277_v53  ;;  %v283_v59 = vld [vmem:[%s4868_s5 + $0x4a] sm:$0xff]  ;;  %v284_v60 = vld [vmem:[%s4868_s5 + $0x52] sm:$0xff]  ;;  %v282_v62 = vld [vmem:[%s4868_s5 + $0x3a] sm:$0xff] }
  0x2b   : > { %v281_v61 = vld [vmem:[%s4868_s5 + $0x32] sm:$0xff]  ;;  %v4997_v63 = vpack.i.bf16 %v284_v60, %v283_v59  ;;  %v287_v4 = vld [vmem:[%s4868_s5 + $0x7a] sm:$0xff]  ;;  %v288_v7 = vld [vmem:[%s4868_s5 + $0x82] sm:$0xff] }
  0x2c   : > { %v5000_v2 = vpack.i.bf16 %v282_v62, %v281_v61  ;;  %v285_v8 = vld [vmem:[%s4868_s5 + $0x62] sm:$0xff]  ;;  %v286_v9 = vld [vmem:[%s4868_s5 + $0x6a] sm:$0xff]  ;;  %v5008_v21 = vpack.i.bf16 %v288_v7, %v287_v4  ;;  %v292_v28 = vld [vmem:[%s4868_s5 + $0xb2] sm:$0xff] }
  0x2d   : > { %3858 = vrot.lane.b32.xlu1 %v4940_v26, %s4778_s6  ;;  %v5012_v22 = vpack.i.bf16 %v286_v9, %v285_v8  ;;  %v291_v25 = vld [vmem:[%s4868_s5 + $0xaa] sm:$0xff]  ;;  %v289_v29 = vld [vmem:[%s4868_s5 + $0x92] sm:$0xff]  ;;  %v290_v30 = vld [vmem:[%s4868_s5 + $0x9a] sm:$0xff] }
  0x2e   : > { %3853 = vrot.lane.b32.xlu0 %v4945_v27, %s4778_s6  ;;  %v5020_v31 = vpack.i.bf16 %v292_v28, %v291_v25  ;;  %v5024_v34 = vpack.i.bf16 %v290_v30, %v289_v29  ;;  %v295_v35 = vld [vmem:[%s4868_s5 + $0xda] sm:$0xff]  ;;  %v296_v36 = vld [vmem:[%s4868_s5 + $0xe2] sm:$0xff]  ;;  %v299_v41 = vld [vmem:[%s4868_s5 + $0x10a] sm:$0xff] }
  0x2f   : > { %v3947_v39 = vpack.i.bf16 %v296_v36, %v295_v35  ;;  %v300_v42 = vld [vmem:[%s4868_s5 + $0x112] sm:$0xff]  ;;  %v303_v47 = vld [vmem:[%s4868_s5 + $0x13a] sm:$0xff]  ;;  %v304_v48 = vld [vmem:[%s4868_s5 + $0x142] sm:$0xff] }
  0x30   : > { %v3957_v45 = vpack.i.bf16 %v300_v42, %v299_v41  ;;  %v3967_v51 = vpack.i.bf16 %v304_v48, %v303_v47  ;;  %v307_v53 = vld [vmem:[%s4868_s5 + $0x16a] sm:$0xff]  ;;  %v308_v54 = vld [vmem:[%s4868_s5 + $0x172] sm:$0xff]  ;;  %v306_v59 = vld [vmem:[%s4868_s5 + $0x15a] sm:$0xff] }
  0x31   : > { %3868 = vrot.lane.b32.xlu1 %v4953_v32, %s4778_s6  ;;  %v3977_v60 = vpack.i.bf16 %v308_v54, %v307_v53  ;;  %v5053_v62 = vld [vmem:[%s4868_s5 + $0x30] sm:$0xff]  ;;  %v5056_v4 = vld [vmem:[%s4868_s5 + $0x38] sm:$0xff]  ;;  %v5062_v8 = vld [vmem:[%s4868_s5 + $0x20] sm:$0xff] }
  0x32   : > { %3863 = vrot.lane.b32.xlu0 %v4957_v33, %s4778_s6  ;;  %v5059_v7 = vld [vmem:[%s4868_s5 + $0x18] sm:$0xff]  ;;  %v5067_v9 = vpack.i.bf16 %v5056_v4, %v5053_v62  ;;  %v5073_v28 = vld [vmem:[%s4868_s5 + $0x60] sm:$0xff]  ;;  %v5076_v29 = vld [vmem:[%s4868_s5 + $0x68] sm:$0xff] }
  0x33   : > { %v3982_v25 = vpack.i.bf16 %v5062_v8, %v5059_v7  ;;  %v5079_v30 = vld [vmem:[%s4868_s5 + $0x48] sm:$0xff]  ;;  %v5082_v35 = vld [vmem:[%s4868_s5 + $0x50] sm:$0xff]  ;;  %v5088_v36 = vpack.i.bf16 %v5076_v29, %v5073_v28  ;;  %v3297_v41 = vld [vmem:[%s4868_s5 + $0x80] sm:$0xff] }
  0x34   : > { %v3301_v47 = vld [vmem:[%s4868_s5 + $0xb0] sm:$0xff]  ;;  %v3305_v53 = vld [vmem:[%s4868_s5 + $0xe0] sm:$0xff] }
  0x35   : > { %3878 = vrot.lane.b32.xlu1 %v3877_v37, %s4778_s6  ;;  %v293_v37 = vld [vmem:[%s4868_s5 + $0xc2] sm:$0xff]  ;;  %v4624_v0 = vld [vmem:[%s6685_s1 + $0xc] sm:$0xff]  }
  0x36   : > { %3873 = vrot.lane.b32.xlu0 %v3872_v38, %s4778_s6  ;;  %v294_v38 = vld [vmem:[%s4868_s5 + $0xca] sm:$0xff]  ;;  %3727 = vmatprep.subr.bf16.mxu1 %v4624_v0 }
  0x37   : > { %v3942_v40 = vpack.i.bf16 %v294_v38, %v293_v37  ;;  %v5093_v37 = vpack.i.bf16 %v5082_v35, %v5079_v30  ;;  %v3298_v38 = vld [vmem:[%s4868_s5 + $0x90] sm:$0xff]  ;;  %3728 = vmatpush3.bf16.msra.mxu1 %v4624_v0 }
  0x38   : > { %v3367_v0 = vld [vmem:[%s4868_s5 + $0xca] sm:$0xff] }
  0x39   : > { %3888 = vrot.lane.b32.xlu1 %v3887_v43, %s4778_s6  ;;  %v297_v43 = vld [vmem:[%s4868_s5 + $0xf2] sm:$0xff] }
  0x3a   : > { %3883 = vrot.lane.b32.xlu0 %v3882_v44, %s4778_s6  ;;  %v298_v44 = vld [vmem:[%s4868_s5 + $0xfa] sm:$0xff] }
  0x3b   : > { %v3952_v46 = vpack.i.bf16 %v298_v44, %v297_v43  ;;  %v3302_v44 = vld [vmem:[%s4868_s5 + $0xc0] sm:$0xff] }
  0x3d   : > { %3898 = vrot.lane.b32.xlu1 %v3897_v49, %s4778_s6  ;;  %v301_v49 = vld [vmem:[%s4868_s5 + $0x122] sm:$0xff] }
  0x3e   : > { %3893 = vrot.lane.b32.xlu0 %v3892_v50, %s4778_s6  ;;  %v302_v50 = vld [vmem:[%s4868_s5 + $0x12a] sm:$0xff] }
  0x3f   : > { %v3962_v52 = vpack.i.bf16 %v302_v50, %v301_v49  ;;  %v3306_v50 = vld [vmem:[%s4868_s5 + $0xf0] sm:$0xff] }
  0x41   : > { %3908 = vrot.lane.b32.xlu1 %v4988_v57, %s4779_s7 }
  0x42   : > { %3903 = vrot.lane.b32.xlu0 %v3902_v58, %s4779_s7  ;;  %v305_v58 = vld [vmem:[%s4868_s5 + $0x152] sm:$0xff] }
  0x43   : > { %v3972_v61 = vpack.i.bf16 %v306_v59, %v305_v58  ;;  %v3310_v59 = vld [vmem:[%s4868_s5 + $0x120] sm:$0xff] }
  0x45   : > { %3918 = vrot.lane.b32.xlu1 %v4997_v63, %s4779_s7 }
  0x46   : > { %3913 = vrot.lane.b32.xlu0 %v5000_v2, %s4779_s7 }
  0x49   : > { %3928 = vrot.lane.b32.xlu1 %v5008_v21, %s4779_s7 }
  0x4a   : > { %3923 = vrot.lane.b32.xlu0 %v5012_v22, %s4779_s7 }
  0x4d   : > { %3938 = vrot.lane.b32.xlu1 %v5020_v31, %s4779_s7 }
  0x4e   : > { %3933 = vrot.lane.b32.xlu0 %v5024_v34, %s4779_s7 }
  0x51   : > { %3948 = vrot.lane.b32.xlu1 %v3947_v39, %s4779_s7  ;;  %v3299_v39 = vld [vmem:[%s4868_s5 + $0x98] sm:$0xff] }
  0x52   : > { %3943 = vrot.lane.b32.xlu0 %v3942_v40, %s4779_s7  ;;  %v3296_v40 = vld [vmem:[%s4868_s5 + $0x78] sm:$0xff]  ;;  %v5101_v42 = vpack.i.bf16 %v3299_v39, %v3298_v38 }
  0x53   : > { %v5105_v43 = vpack.i.bf16 %v3297_v41, %v3296_v40  ;;  %v3314_v40 = vld [vmem:[%s4868_s5 + $0x150] sm:$0xff]  ;;  %v3315_v41 = vld [vmem:[%s4868_s5 + $0x158] sm:$0xff] }
  0x55   : > { %3958 = vrot.lane.b32.xlu1 %v3957_v45, %s4779_s7  ;;  %v3303_v45 = vld [vmem:[%s4868_s5 + $0xc8] sm:$0xff] }
  0x56   : > { %3953 = vrot.lane.b32.xlu0 %v3952_v46, %s4779_s7  ;;  %v3300_v46 = vld [vmem:[%s4868_s5 + $0xa8] sm:$0xff]  ;;  %v5113_v48 = vpack.i.bf16 %v3303_v45, %v3302_v44  ;;  %v3312_v44 = vld [vmem:[%s4868_s5 + $0x138] sm:$0xff]  ;;  %v3313_v45 = vld [vmem:[%s4868_s5 + $0x140] sm:$0xff] }
  0x57   : > { %v5117_v49 = vpack.i.bf16 %v3301_v47, %v3300_v46  ;;  %v4047_v46 = vpack.i.bf16 %v3315_v41, %v3314_v40  ;;  %v4042_v47 = vpack.i.bf16 %v3313_v45, %v3312_v44 }
  0x59   : > { %3968 = vrot.lane.b32.xlu1 %v3967_v51, %s4779_s7  ;;  %v3307_v51 = vld [vmem:[%s4868_s5 + $0xf8] sm:$0xff] }
  0x5a   : > { %3963 = vrot.lane.b32.xlu0 %v3962_v52, %s4779_s7  ;;  %v3304_v52 = vld [vmem:[%s4868_s5 + $0xd8] sm:$0xff]  ;;  %v4027_v54 = vpack.i.bf16 %v3307_v51, %v3306_v50  ;;  %v3318_v50 = vld [vmem:[%s4868_s5 + $0x180] sm:$0xff]  ;;  %v3319_v51 = vld [vmem:[%s4868_s5 + $0x188] sm:$0xff] }
  0x5b   : > { %v5127_v58 = vpack.i.bf16 %v3305_v53, %v3304_v52  ;;  %v3316_v52 = vld [vmem:[%s4868_s5 + $0x168] sm:$0xff]  ;;  %v3317_v53 = vld [vmem:[%s4868_s5 + $0x170] sm:$0xff] }
  0x5d   : > { %3978 = vrot.lane.b32.xlu1 %v3977_v60, %s4779_s7  ;;  %v3311_v60 = vld [vmem:[%s4868_s5 + $0x128] sm:$0xff] }
  0x5e   : > { %3973 = vrot.lane.b32.xlu0 %v3972_v61, %s4779_s7  ;;  %v3308_v61 = vld [vmem:[%s4868_s5 + $0x108] sm:$0xff]  ;;  %v4037_v38 = vpack.i.bf16 %v3311_v60, %v3310_v59  ;;  %v4052_v59 = vpack.i.bf16 %v3317_v53, %v3316_v52  ;;  %v4622_v60 = vld [vmem:[%s6685_s1] sm:$0xff]  }
  0x5f   : > { %3691 = vmatprep.subr.bf16.mxu0 %v4622_v60  ;;  %v3364_v53 = vld [vmem:[%s4868_s5 + $0xaa] sm:$0xff] }
  0x60   : > { %3692 = vmatpush3.bf16.msra.mxu0 %v4622_v60  ;;  %v3449_v60 = vld [vmem:[%s4868_s5 + $0xc9] sm:$0xff] }
  0x61   : > { %3988 = vrot.lane.b32.xlu1 %v5067_v9, %s4780_s8 }
  0x62   : > { %3983 = vrot.lane.b32.xlu0 %v3982_v25, %s4780_s8  ;;  %v3309_v25 = vld [vmem:[%s4868_s5 + $0x110] sm:$0xff] }
  0x63   : > { %v4032_v39 = vpack.i.bf16 %v3309_v25, %v3308_v61  ;;  %v4623_v61 = vld [vmem:[%s6685_s1 + $0x8] ss:$0 sps:$4 sm:$0xff]  }
  0x64   : > { %3763 = vmatprep.subr.msk.bf16.mxu0 %vm1288_vm0, %v4623_v61  ;;  %v1290_v25 = vsel %vm1288_vm0, %v4623_v61, 0 }
  0x65   : > { %3998 = vrot.lane.b32.xlu1 %v5088_v36, %s4780_s8  ;;  %3694 = vmatpush3.bf16.msra.mxu0 %v1290_v25  ;;  %v3366_v25 = vld [vmem:[%s4868_s5 + $0xc2] sm:$0xff] }
  0x66   : > { %3993 = vrot.lane.b32.xlu0 %v5093_v37, %s4780_s8 }
  0x69   : > { %4008 = vrot.lane.b32.xlu1 %v5101_v42, %s4780_s8 }
  0x6a   : > { %4003 = vrot.lane.b32.xlu0 %v5105_v43, %s4780_s8 }
  0x6d   : > { %4018 = vrot.lane.b32.xlu1 %v5113_v48, %s4780_s8 }
  0x6e   : > { %4013 = vrot.lane.b32.xlu0 %v5117_v49, %s4780_s8 }
  0x71   : > { %4028 = vrot.lane.b32.xlu1 %v4027_v54, %s4780_s8  ;;  %v4057_v54 = vpack.i.bf16 %v3319_v51, %v3318_v50 }
  0x72   : > { %4023 = vrot.lane.b32.xlu0 %v5127_v58, %s4780_s8 }
  0x75   : > { %4038 = vrot.lane.b32.xlu1 %v4037_v38, %s4780_s8 }
  0x76   : > { %4033 = vrot.lane.b32.xlu0 %v4032_v39, %s4780_s8 }
  0x79   : > { %4048 = vrot.lane.b32.xlu1 %v4047_v46, %s4780_s8 }
  0x7a   : > { %4043 = vrot.lane.b32.xlu0 %v4042_v47, %s4780_s8 }
  0x7d   : > { %4058 = vrot.lane.b32.xlu1 %v4057_v54, %s4780_s8 }
  0x7e   : > { %4053 = vrot.lane.b32.xlu0 %v4052_v59, %s4780_s8 }
  0x81   : > { %4068 = vrot.lane.b32.xlu1 %v4879_v3, %s4781_s9 }
  0x82   : > { %4063 = vrot.lane.b32.xlu0 %v4897_v11, %s4781_s9 }
  0x85   : > { %4078 = vrot.lane.b32.xlu1 %v4928_v20, %s4781_s9 }
  0x86   : > { %4073 = vrot.lane.b32.xlu0 %v4894_v10, %s4781_s9 }
  0x89   : > { %4088 = vrot.lane.b32.xlu1 %v4945_v27, %s4781_s9 }
  0x8a   : > { %4083 = vrot.lane.b32.xlu0 %v4919_v18, %s4781_s9 }
  0x8d   : > { %4098 = vrot.lane.b32.xlu1 %v4957_v33, %s4781_s9 }
  0x8e   : > { %4093 = vrot.lane.b32.xlu0 %v4940_v26, %s4781_s9 }
  0x91   : > { %4108 = vrot.lane.b32.xlu1 %v4107_v23, %s4781_s9 }
  0x92   : > { %4103 = vrot.lane.b32.xlu0 %v4953_v32, %s4781_s9 }
  0x93   : > { %v5180_v38 = vpop.permute.xlu1 %3833 }
  0x94   : > { %v5182_v33 = vpop.permute.xlu0 %3823 }
  0x95   : > { %4118 = vrot.lane.b32.xlu1 %v4897_v11, %s4778_s6 }
  0x96   : > { %4113 = vrot.lane.b32.xlu0 %v4988_v57, %s4782_s14 }
  0x97   : > { %v5188_v26 = vpop.permute.xlu1 %3838 }
  0x98   : > { %v5190_v39 = vpop.permute.xlu0 %3828 }
  0x99   : > { %4128 = vrot.lane.b32.xlu1 %v4879_v3, %s4778_s6  ;;  %v4625_v3 = vld [vmem:[%s6685_s1 + $0x14] ss:$0 sps:$4 sm:$0xff]  }
  0x9a   : > { %4123 = vrot.lane.b32.xlu0 %v5000_v2, %s4782_s14  ;;  %3764 = vmatprep.subr.msk.bf16.mxu1 %vm1288_vm0, %v4625_v3  ;;  %v2738_v32 = vsel %vm1288_vm0, %v4625_v3, 0 }
  0x9b   : > { %v5199_v19 = vpop.permute.xlu1 %3848  ;;  %3730 = vmatpush3.bf16.msra.mxu1 %v2738_v32 }
  0x9c   : > { %v5201_v11 = vpop.permute.xlu0 %3843 }
  0x9d   : > { %4138 = vrot.lane.b32.xlu1 %v5000_v2, %s4779_s7 }
  0x9e   : > { %4133 = vrot.lane.b32.xlu0 %v4988_v57, %s4779_s7 }
  0x9f   : > { %v5210_v23 = vpop.permute.xlu1 %3858 }
  0xa0   : > { %v5214_v40 = vpop.permute.xlu0 %3853 }
  0xa1   : > { %4148 = vrot.lane.b32.xlu1 %v5093_v37, %s4780_s8 }
  0xa2   : > { %4143 = vrot.lane.b32.xlu0 %v5067_v9, %s4780_s8 }
  0xa3   : > { %v5220_v41 = vpop.permute.xlu1 %3868 }
  0xa4   : > { %6720 = vst [vmem:[#allocation9_spill] sm:$0xff] %v5220_v41  ;;  %v5222_v44 = vpop.permute.xlu0 %3863 }
  0xa5   : > { %6721 = vst [vmem:[#allocation10_spill] sm:$0xff] %v5222_v44  ;;  %4158 = vrot.lane.b32.xlu1 %v4157_v16, %s4781_s9 }
  0xa6   : > { %4153 = vrot.lane.b32.xlu0 %v4152_v17, %s4781_s9 }
  0xa7   : > { %v5232_v57 = vpop.permute.xlu1 %3878 }
  0xa8   : > { %6722 = vst [vmem:[#allocation11_spill] sm:$0xff] %v5232_v57  ;;  %v5234_v37 = vpop.permute.xlu0 %3873  ;;  %v3342_v57 = vld [vmem:[%s4868_s5 + $0x121] sm:$0xff] }
  0xa9   : > { %6723 = vst [vmem:[#allocation12_spill] sm:$0xff] %v5234_v37  ;;  %4168 = vrot.lane.b32.xlu1 %v4997_v63, %s4782_s14 }
  0xaa   : > { %4163 = vrot.lane.b32.xlu0 %v5000_v2, %s4782_s14 }
  0xab   : > { %v5240_v9 = vpop.permute.xlu1 %3888 }
  0xac   : > { %6724 = vst [vmem:[#allocation13_spill] sm:$0xff] %v5240_v9  ;;  %v5242_v45 = vpop.permute.xlu0 %3883  ;;  %v3549_v9 = vld [vmem:[%s4868_s5 + $0x111] sm:$0xff] }
  0xad   : > { %6725 = vst [vmem:[#allocation14_spill] sm:$0xff] %v5242_v45  ;;  %4178 = vrot.lane.b32.xlu1 %v4894_v10, %s4778_s6  ;;  %v3580_v45 = vld [vmem:[%s4868_s5 + $0x10a] sm:$0xff] }
  0xae   : > { %4173 = vrot.lane.b32.xlu0 %v4997_v63, %s4782_s14 }
  0xaf   : > { %v5248_v1 = vpop.permute.xlu1 %3898 }
  0xb0   : > { %6726 = vst [vmem:[#allocation15_spill] sm:$0xff] %v5248_v1  ;;  %v5250_v5 = vpop.permute.xlu0 %3893 }
  0xb1   : > { %6727 = vst [vmem:[#allocation16_spill] sm:$0xff] %v5250_v5  ;;  %4188 = vrot.lane.b32.xlu1 %v4928_v20, %s4778_s6 }
  0xb2   : > { %4183 = vrot.lane.b32.xlu0 %v5012_v22, %s4782_s14 }
  0xb3   : > { %v5256_v6 = vpop.permute.xlu1 %3908 }
  0xb4   : > { %v5258_v14 = vpop.permute.xlu0 %3903 }
  0xb5   : > { %4198 = vrot.lane.b32.xlu1 %v5012_v22, %s4779_s7 }
  0xb6   : > { %4193 = vrot.lane.b32.xlu0 %v4997_v63, %s4779_s7 }
  0xb7   : > { %v5264_v10 = vpop.permute.xlu1 %3918 }
  0xb8   : > { %v5266_v16 = vpop.permute.xlu0 %3913 }
  0xb9   : > { %4208 = vrot.lane.b32.xlu1 %v5105_v43, %s4780_s8  ;;  %v3540_v43 = vld [vmem:[%s4868_s5 + $0xa9] sm:$0xff] }
  0xba   : > { %4203 = vrot.lane.b32.xlu0 %v5088_v36, %s4780_s8 }
  0xbb   : > { %v5272_v17 = vpop.permute.xlu1 %3928 }
  0xbc   : > { %v5274_v20 = vpop.permute.xlu0 %3923 }
  0xbd   : > { %4218 = vrot.lane.b32.xlu1 %v4217_v55, %s4781_s9 }
  0xbe   : > { %4213 = vrot.lane.b32.xlu0 %v4212_v56, %s4781_s9 }
  0xbf   : > { %v5284_v63 = vpop.permute.xlu1 %3938 }
  0xc0   : > { %v5286_v2 = vpop.permute.xlu0 %3933 }
  0xc1   : > { %4228 = vrot.lane.b32.xlu1 %v5008_v21, %s4782_s14 }
  0xc2   : > { %4223 = vrot.lane.b32.xlu0 %v5012_v22, %s4782_s14  ;;  %v3542_v22 = vld [vmem:[%s4868_s5 + $0xc1] sm:$0xff] }
  0xc3   : > { %v5292_v13 = vpop.permute.xlu1 %3948  ;;  %v4307_v32 = vpack.i.bf16 %v3449_v60, %v3542_v22 }
  0xc4   : > { %6728 = vst [vmem:[#allocation17_spill] sm:$0xff] %v5292_v13  ;;  %v5294_v24 = vpop.permute.xlu0 %3943 }
  0xc5   : > { %6729 = vst [vmem:[#allocation18_spill] sm:$0xff] %v5294_v24  ;;  %4238 = vrot.lane.b32.xlu1 %v4919_v18, %s4778_s6  ;;  %v3541_v18 = vld [vmem:[%s4868_s5 + $0xb1] sm:$0xff] }
  0xc6   : > { %4233 = vrot.lane.b32.xlu0 %v5008_v21, %s4782_s14  ;;  %v4277_v47 = vpack.i.bf16 %v3542_v22, %v3541_v18  ;;  %v3339_v22 = vld [vmem:[%s4868_s5 + $0xf9] sm:$0xff] }
  0xc7   : > { %v5300_v12 = vpop.permute.xlu1 %3958 }
  0xc8   : > { %6730 = vst [vmem:[#allocation19_spill] sm:$0xff] %v5300_v12  ;;  %v5302_v15 = vpop.permute.xlu0 %3953 }
  0xc9   : > { %6731 = vst [vmem:[#allocation20_spill] sm:$0xff] %v5302_v15  ;;  %4248 = vrot.lane.b32.xlu1 %v4945_v27, %s4778_s6  ;;  %v3539_v27 = vld [vmem:[%s4868_s5 + $0x99] sm:$0xff] }
  0xca   : > { %4243 = vrot.lane.b32.xlu0 %v5024_v34, %s4782_s14 }
  0xcb   : > { %v5308_v55 = vpop.permute.xlu1 %3968 }
  0xcc   : > { %6732 = vst [vmem:[#allocation21_spill] sm:$0xff] %v5308_v55  ;;  %v5310_v56 = vpop.permute.xlu0 %3963  ;;  %v3548_v55 = vld [vmem:[%s4868_s5 + $0x109] sm:$0xff] }
  0xcd   : > { %6733 = vst [vmem:[#allocation22_spill] sm:$0xff] %v5310_v56  ;;  %4258 = vrot.lane.b32.xlu1 %v5024_v34, %s4779_s7  ;;  %v5428_v12 = vpack.i.bf16 %v3549_v9, %v3548_v55  ;;  %v3906_v9 = vunpack.i.h.bf16 %v5258_v14  ;;  %v3905_v55 = vunpack.i.l.bf16 %v5258_v14 }
  0xce   : > { %4253 = vrot.lane.b32.xlu0 %v5008_v21, %s4779_s7  ;;  %v4272_v21 = vpack.i.bf16 %v3540_v43, %v3539_v27 }
  0xcf   : > { %v5318_v36 = vpop.permute.xlu1 %3978 }
  0xd0   : > { %6734 = vst [vmem:[#allocation23_spill] sm:$0xff] %v5318_v36  ;;  %v5322_v46 = vpop.permute.xlu0 %3973 }
  0xd1   : > { %6735 = vst [vmem:[#allocation24_spill] sm:$0xff] %v5322_v46  ;;  %4268 = vrot.lane.b32.xlu1 %v5117_v49, %s4780_s8  ;;  %v3365_v49 = vld [vmem:[%s4868_s5 + $0xb2] sm:$0xff] }
  0xd2   : > { %4263 = vrot.lane.b32.xlu0 %v5101_v42, %s4780_s8  ;;  %v4297_v42 = vpack.i.bf16 %v3541_v18, %v3540_v43  ;;  %v4292_v59 = vpack.i.bf16 %v3365_v49, %v3364_v53  ;;  %v3544_v53 = vld [vmem:[%s4868_s5 + $0xd9] sm:$0xff] }
  0xd3   : > { %v5328_v50 = vpop.permute.xlu1 %3988 }
  0xd4   : > { %v5330_v51 = vpop.permute.xlu0 %3983 }
  0xd5   : > { %4278 = vrot.lane.b32.xlu1 %v4277_v47, %s4781_s9  ;;  %v3545_v47 = vld [vmem:[%s4868_s5 + $0xe1] sm:$0xff] }
  0xd6   : > { %4273 = vrot.lane.b32.xlu0 %v4272_v21, %s4781_s9 }
  0xd7   : > { %v5334_v52 = vpop.permute.xlu1 %3998 }
  0xd8   : > { %v5338_v54 = vpop.permute.xlu0 %3993 }
  0xd9   : > { %4288 = vrot.lane.b32.xlu1 %v5020_v31, %s4782_s14  ;;  %v4302_v31 = vpack.i.bf16 %v3367_v0, %v3366_v25  ;;  %v4332_v25 = vpack.i.bf16 %v3544_v53, %v3449_v60  ;;  %v3576_v0 = vld [vmem:[%s4868_s5 + $0xda] sm:$0xff]  ;;  %v3452_v60 = vld [vmem:[%s4868_s5 + $0xf1] sm:$0xff] }
  0xda   : > { %4283 = vrot.lane.b32.xlu0 %v5024_v34, %s4782_s14 }
  0xdb   : > { %v5345_v61 = vpop.permute.xlu1 %4008 }
  0xdc   : > { %v5349_v3 = vpop.permute.xlu0 %4003 }
  0xdd   : > { %4298 = vrot.lane.b32.xlu1 %v4297_v42, %s4778_s6  ;;  %v4337_v42 = vpack.i.bf16 %v3339_v22, %v3545_v47 }
  0xde   : > { %4293 = vrot.lane.b32.xlu0 %v4292_v59, %s4782_s14 }
  0xdf   : > { %v5353_v18 = vpop.permute.xlu1 %4018 }
  0xe0   : > { %6736 = vst [vmem:[#allocation25_spill] sm:$0xff] %v5353_v18  ;;  %v5355_v34 = vpop.permute.xlu0 %4013 }
  0xe1   : > { %4308 = vrot.lane.b32.xlu1 %v4307_v32, %s4778_s6 }
  0xe2   : > { %4303 = vrot.lane.b32.xlu0 %v4302_v31, %s4782_s14 }
  0xe3   : > { %v5359_v27 = vpop.permute.xlu1 %4028 }
  0xe4   : > { %6737 = vst [vmem:[#allocation26_spill] sm:$0xff] %v5359_v27  ;;  %v5361_v43 = vpop.permute.xlu0 %4023  ;;  %v3985_v27 = vunpack.i.l.bf16 %v5330_v51 }
  0xe5   : > { %6738 = vst [vmem:[#allocation27_spill] sm:$0xff] %v5361_v43  ;;  %4318 = vrot.lane.b32.xlu1 %v4302_v31, %s4779_s7 }
  0xe6   : > { %4313 = vrot.lane.b32.xlu0 %v4292_v59, %s4779_s7  ;;  %v3577_v59 = vld [vmem:[%s4868_s5 + $0xe2] sm:$0xff] }
  0xe7   : > { %v5367_v21 = vpop.permute.xlu1 %4038  ;;  %v4347_v1 = vpack.i.bf16 %v3577_v59, %v3576_v0  ;;  %v3371_v0 = vld [vmem:[%s4868_s5 + $0xfa] sm:$0xff] }
  0xe8   : > { %6739 = vst [vmem:[#allocation28_spill] sm:$0xff] %v5367_v21  ;;  %v5370_v49 = vpop.permute.xlu0 %4033  ;;  %v3581_v21 = vld [vmem:[%s4868_s5 + $0x112] sm:$0xff] }
  0xe9   : > { %6740 = vst [vmem:[#allocation29_spill] sm:$0xff] %v5370_v49  ;;  %4328 = vrot.lane.b32.xlu1 %v5127_v58, %s4780_s8  ;;  %v3343_v49 = vld [vmem:[%s4868_s5 + $0x129] sm:$0xff]  ;;  %v5439_v15 = vpack.i.bf16 %v3581_v21, %v3580_v45 }
  0xea   : > { %4323 = vrot.lane.b32.xlu0 %v5113_v48, %s4780_s8  ;;  %v4357_v48 = vpack.i.bf16 %v3545_v47, %v3544_v53  ;;  %v3516_v53 = vld [vmem:[%s4868_s5 + $0x108] sm:$0xff]  ;;  %v5445_v37 = vpack.i.bf16 %v3343_v49, %v3342_v57  ;;  %v3831_v57 = vunpack.i.h.bf16 %v5190_v39  ;;  %v3830_v49 = vunpack.i.l.bf16 %v5190_v39 }
  0xeb   : > { %v5378_v32 = vpop.permute.xlu1 %4048 }
  0xec   : > { %6741 = vst [vmem:[#allocation30_spill] sm:$0xff] %v5378_v32  ;;  %v5380_v36 = vpop.permute.xlu0 %4043 }
  0xed   : > { %6742 = vst [vmem:[#allocation31_spill] sm:$0xff] %v5380_v36  ;;  %4338 = vrot.lane.b32.xlu1 %v4337_v42, %s4781_s9  ;;  %v3370_v42 = vld [vmem:[%s4868_s5 + $0xf2] sm:$0xff] }
  0xee   : > { %4333 = vrot.lane.b32.xlu0 %v4332_v25, %s4781_s9  ;;  %v4367_v25 = vpack.i.bf16 %v3339_v22, %v3452_v60  ;;  %v3514_v60 = vld [vmem:[%s4868_s5 + $0xf0] sm:$0xff] }
  0xef   : > { %v5384_v58 = vpop.permute.xlu1 %4058 }
  0xf0   : > { %6743 = vst [vmem:[#allocation32_spill] sm:$0xff] %v5384_v58  ;;  %v5386_v46 = vpop.permute.xlu0 %4053  ;;  %v5399_v58 = vpack.i.bf16 %v3371_v0, %v3370_v42  ;;  %v3515_v42 = vld [vmem:[%s4868_s5 + $0xf8] sm:$0xff] }
  0xf1   : > { %6744 = vst [vmem:[#allocation33_spill] sm:$0xff] %v5386_v46  ;;  %4348 = vrot.lane.b32.xlu1 %v4347_v1, %s4782_s14  ;;  %v4382_v32 = vpack.i.bf16 %v3515_v42, %v3514_v60  ;;  %v214_v60 = vld [vmem:[%s4868_s5 + $0x8] sm:$0xff] }
  0xf2   : > { %4343 = vrot.lane.b32.xlu0 %v4302_v31, %s4782_s14 }
  0xf3   : > { %v5391_v5 = vpop.permute.xlu1 %4068 }
  0xf4   : > { %v5395_v59 = vpop.permute.xlu0 %4063  ;;  %v4071_v13 = vunpack.i.h.bf16 %v5391_v5 }
  0xf5   : > { %4358 = vrot.lane.b32.xlu1 %v4357_v48, %s4778_s6  ;;  %v3517_v48 = vld [vmem:[%s4868_s5 + $0x110] sm:$0xff]  ;;  %v4066_v14 = vunpack.i.h.bf16 %v5395_v59 }
  0xf6   : > { %4353 = vrot.lane.b32.xlu0 %v4347_v1, %s4782_s14  ;;  %v4387_v46 = vpack.i.bf16 %v3517_v48, %v3516_v53  ;;  %v3825_v53 = vunpack.i.l.bf16 %v5182_v33  ;;  %v213_v48 = vld [vmem:[%s4868_s5] sm:$0xff] }
  0xf7   : > { %v5401_v47 = vpop.permute.xlu1 %4078 }
  0xf8   : > { %v5403_v31 = vpop.permute.xlu0 %4073  ;;  %v1047_v45 = vsel %vm1046_vm1, %v213_v48, %v3825_v53  ;;  %v3991_v48 = vunpack.i.h.bf16 %v5328_v50 }
  0xf9   : > { %4368 = vrot.lane.b32.xlu1 %v4367_v25, %s4778_s6  ;;  %v1080_v53 = vsel %vm1079_vm2, %v1047_v45, %v3905_v55  ;;  %v4070_v55 = vunpack.i.l.bf16 %v5391_v5  ;;  %v1049_v45 = vsel %vm1046_vm1, %v5059_v7, %v3830_v49 }
  0xfa   : > { %4363 = vrot.lane.b32.xlu0 %v5399_v58, %s4782_s14  ;;  %v1113_v39 = vsel %vm1112_vm3, %v1080_v53, %v3985_v27  ;;  %v1050_v27 = vsel %vm1046_vm1, %v5062_v8, %v3831_v57  ;;  %v3835_v53 = vunpack.i.l.bf16 %v5180_v38 }
  0xfb   : > { %v5410_v22 = vpop.permute.xlu1 %4088 }
  0xfc   : > { %v5414_v0 = vpop.permute.xlu0 %4083 }
  0xfd   : > { %4378 = vrot.lane.b32.xlu1 %v5399_v58, %s4779_s7 }
  0xfe   : > { %4373 = vrot.lane.b32.xlu0 %v4347_v1, %s4779_s7  ;;  %v3826_v1 = vunpack.i.h.bf16 %v5182_v33  ;;  %v3910_v33 = vunpack.i.l.bf16 %v5256_v6 }
  0xff   : > { %v5421_v36 = vpop.permute.xlu1 %4098 }
 0x100   : > { %6745 = vst [vmem:[#allocation34_spill] sm:$0xff] %v5421_v36  ;;  %v5423_v56 = vpop.permute.xlu0 %4093  ;;  %v1048_v21 = vsel %vm1046_vm1, %v214_v60, %v3826_v1 }
 0x101   : > { %6746 = vst [vmem:[#allocation35_spill] sm:$0xff] %v5423_v56  ;;  %4388 = vrot.lane.b32.xlu1 %v4387_v46, %s4780_s8  ;;  %v1081_v1 = vsel %vm1079_vm2, %v1048_v21, %v3906_v9 }
 0x102   : > { %4383 = vrot.lane.b32.xlu0 %v4382_v32, %s4780_s8  ;;  %v3986_v32 = vunpack.i.h.bf16 %v5330_v51  ;;  %v3911_v51 = vunpack.i.h.bf16 %v5256_v6 }
 0x103   : > { %v5437_v42 = vpop.permute.xlu1 %4108 }
 0x104   : > { %6747 = vst [vmem:[#allocation36_spill] sm:$0xff] %v5437_v42  ;;  %v5443_v46 = vpop.permute.xlu0 %4103  ;;  %v1114_v6 = vsel %vm1112_vm3, %v1081_v1, %v3986_v32  ;;  %v3374_v1 = vld [vmem:[%s4868_s5 + $0x122] sm:$0xff] }
 0x105   : > { %6748 = vst [vmem:[#allocation37_spill] sm:$0xff] %v5443_v46  ;;  %4398 = vrot.lane.b32.xlu1 %v5428_v12, %s4781_s9  ;;  %v4065_v46 = vunpack.i.l.bf16 %v5395_v59  ;;  %v3990_v59 = vunpack.i.l.bf16 %v5328_v50  ;;  %v1147_v50 = vsel %vm1145_vm4, %v1114_v6, %v4066_v14 }
 0x106   : > { %4393 = vrot.lane.b32.xlu0 %v4367_v25, %s4781_s9 }
 0x107   : > { %v5461_v43 = vpop.permute.xlu1 %4118  ;;  %v1146_v9 = vsel %vm1145_vm4, %v1113_v39, %v4065_v46  ;;  %v1083_v46 = vsel %vm1079_vm2, %v1050_v27, %v3911_v51 }
 0x108   : > { %v4114_v60 = vpop.permute.xlu0 %4113  ;;  %v1116_v8 = vsel %vm1112_vm3, %v1083_v46, %v3991_v48  ;;  %v3375_v48 = vld [vmem:[%s4868_s5 + $0x12a] sm:$0xff]  ;;  %v5522_v46 = vsel %vm1046_vm1, %v5053_v62, %v3835_v53 }
 0x109   : > { %v4116_v25 = vunpack.i.h.bf16 %v4114_v60  ;;  %v4115_v24 = vunpack.i.l.bf16 %v4114_v60  ;;  %4408 = vrot.lane.b32.xlu1 %v5439_v15, %s4782_s14  ;;  %v1149_v60 = vsel %vm1145_vm4, %v1116_v8, %v4071_v13  ;;  %v5514_v13 = vld [vmem:[%s4868_s5 + $0x128] sm:$0xff] }
 0x10a   : > { %4403 = vrot.lane.b32.xlu0 %v5399_v58, %s4782_s14  ;;  %v1082_v58 = vsel %vm1079_vm2, %v1049_v45, %v3910_v33  ;;  %v3840_v33 = vunpack.i.l.bf16 %v5188_v26 }
 0x10b   : > { %v5481_v21 = vpop.permute.xlu1 %4128  ;;  %v1179_v32 = vsel %vm1178_vm5, %v1146_v9, %v4115_v24  ;;  %v1180_v5 = vsel %vm1178_vm5, %v1147_v50, %v4116_v25  ;;  %v1115_v49 = vsel %vm1112_vm3, %v1082_v58, %v3990_v59  ;;  %v5501_v59 = vld [vmem:[%s4868_s5 + $0x138] sm:$0xff]  ;;  %v5504_v25 = vld [vmem:[%s4868_s5 + $0x140] sm:$0xff] }
 0x10c   : > { %v4124_v14 = vpop.permute.xlu0 %4123  ;;  %v1211_v7 = vpack.c.bf16 %v1180_v5, %v1179_v32  ;;  %v1148_v51 = vsel %vm1145_vm4, %v1115_v49, %v4070_v55  ;;  %v5511_v55 = vld [vmem:[%s4868_s5 + $0x120] sm:$0xff]  ;;  %v5532_v49 = vpack.i.bf16 %v3375_v48, %v3374_v1  ;;  %v4457_v62 = vpack.i.bf16 %v5504_v25, %v5501_v59 }
 0x10d   : > { %v4126_v57 = vunpack.i.h.bf16 %v4124_v14  ;;  %v4125_v24 = vunpack.i.l.bf16 %v4124_v14  ;;  %4418 = vrot.lane.b32.xlu1 %v5445_v37, %s4781_s9  ;;  %v3552_v50 = vld [vmem:[%s4868_s5 + $0x139] sm:$0xff]  ;;  %v3553_v32 = vld [vmem:[%s4868_s5 + $0x141] sm:$0xff]  ;;  %v6749_v14 = vunpack.i.h.bf16 %v5180_v38 }
 0x10e   : > { %4413 = vrot.lane.b32.xlu0 %v5428_v12, %s4781_s9  ;;  %3695 = vmatprep.mubr.msk.bf16.mxu0 %vm1239_vm6, %v1211_v7  ;;  %v3584_v5 = vld [vmem:[%s4868_s5 + $0x13a] sm:$0xff]  ;;  %v3585_v58 = vld [vmem:[%s4868_s5 + $0x142] sm:$0xff] }
 0x10f   : > { %v1181_v39 = vsel %vm1178_vm5, %v1148_v51, %v4125_v24  ;;  %v1182_v6 = vsel %vm1178_vm5, %v1149_v60, %v4126_v57  ;;  %v5508_v9 = vpop.permute.xlu1 %4138  ;;  %v5528_v7 = vsel %vm1046_vm1, %v5056_v4, %v6749_v14  ;;  %v5537_v57 = vsel %vm1046_vm1, %v5079_v30, %v3840_v33 }
 0x110   : > { %v4134_v45 = vpop.permute.xlu0 %4133  ;;  %v1212_v27 = vpack.c.bf16 %v1182_v6, %v1181_v39  ;;  %v5548_v30 = vpack.i.bf16 %v3553_v32, %v3552_v50  ;;  %v5550_v24 = vpack.i.bf16 %v3585_v58, %v3584_v5  ;;  %v3915_v33 = vunpack.i.l.bf16 %v5266_v16  ;;  %v3403_v39 = vld [vmem:[%s4868_s5 + $0x20] sm:$0xff]  ;;  %v3402_v32 = vld [vmem:[%s4868_s5 + $0x18] sm:$0xff]  ;;  %v3404_v5 = vld [vmem:[%s4868_s5 + $0x30] sm:$0xff] }
 0x111   : > { %4428 = vrot.lane.b32.xlu1 %v5428_v12, %s4778_s6  ;;  %v4121_v60 = vunpack.i.h.bf16 %v5461_v43  ;;  %v4120_v6 = vunpack.i.l.bf16 %v5461_v43  ;;  %v4130_v50 = vunpack.i.l.bf16 %v5481_v21  ;;  %v4131_v58 = vunpack.i.h.bf16 %v5481_v21  ;;  %v3405_v12 = vld [vmem:[%s4868_s5 + $0x38] sm:$0xff] }
 0x112   : > { %4423 = vrot.lane.b32.xlu0 %v5439_v15, %s4782_s14  ;;  %3696 = vmatmul.mubr.msk.bf16.vlgmr.msra.gmra.mrb[0].mxu0 %vm1239_vm6, %v1212_v27  ;;  %v4140_v14 = vunpack.i.l.bf16 %v5508_v9  ;;  %v4135_v38 = vunpack.i.l.bf16 %v4134_v45  ;;  %v4141_v43 = vunpack.i.h.bf16 %v5508_v9  ;;  %v4136_v8 = vunpack.i.h.bf16 %v4134_v45 }
 0x113   : > { %v4149_v53 = vpop.permute.xlu1 %4148  ;;  %v4111_v27 = vunpack.i.h.bf16 %v5437_v42  ;;  %v2501_v1 = vsel %vm1046_vm1, %v3403_v39, %v4121_v60  ;;  %v2500_v44 = vsel %vm1046_vm1, %v3402_v32, %v4120_v6  ;;  %v2502_v36 = vsel %vm1046_vm1, %v3404_v5, %v4130_v50 }
 0x114   : > { %v4144_v48 = vpop.permute.xlu0 %4143  ;;  %v4150_v25 = vunpack.i.l.bf16 %v4149_v53  ;;  %v4151_v4 = vunpack.i.h.bf16 %v4149_v53  ;;  %v2503_v9 = vsel %vm1046_vm1, %v3405_v12, %v4131_v58  ;;  %v2534_v45 = vsel %vm1079_vm2, %v2502_v36, %v4140_v14 }
 0x115   : > { %4438 = vrot.lane.b32.xlu1 %v5445_v37, %s4778_s6  ;;  %v4145_v51 = vunpack.i.l.bf16 %v4144_v48  ;;  %v4146_v21 = vunpack.i.h.bf16 %v4144_v48  ;;  %v2532_v42 = vsel %vm1079_vm2, %v2500_v44, %v4135_v38  ;;  %v2535_v53 = vsel %vm1079_vm2, %v2503_v9, %v4141_v43 }
 0x116   : > { %4433 = vrot.lane.b32.xlu0 %v5532_v49, %s4782_s14  ;;  %v2533_v48 = vsel %vm1079_vm2, %v2501_v1, %v4136_v8  ;;  %v2566_v39 = vsel %vm1112_vm3, %v2534_v45, %v4150_v25  ;;  %v2567_v32 = vsel %vm1112_vm3, %v2535_v53, %v4151_v4  ;;  %v6751_v43 = vunpack.i.h.bf16 %v5266_v16  ;;  %v3346_v16 = vld [vmem:[%s4868_s5 + $0x151] sm:$0xff] }
 0x117   : > { %v5572_v59 = vpop.permute.xlu1 %4158  ;;  %v2564_v50 = vsel %vm1112_vm3, %v2532_v42, %v4145_v51  ;;  %v2565_v44 = vsel %vm1112_vm3, %v2533_v48, %v4146_v21  ;;  %v6750_v42 = vpack.i.bf16 %v5514_v13, %v5511_v55  ;;  %v4001_v13 = vunpack.i.h.bf16 %v5334_v52 }
 0x118   : > { %v4154_v41 = vpop.permute.xlu0 %4153  ;;  %v4160_v18 = vunpack.i.l.bf16 %v5572_v59  ;;  %v2596_v4 = vsel %vm1145_vm4, %v2564_v50, %v4111_v27  ;;  %v1085_v55 = vsel %vm1079_vm2, %v5528_v7, %v6751_v43  ;;  %v4000_v27 = vunpack.i.l.bf16 %v5334_v52  ;;  %v3347_v7 = vld [vmem:[%s4868_s5 + $0x159] sm:$0xff] }
 0x119   : > { %v4156_v56 = vunpack.i.h.bf16 %v4154_v41  ;;  %4448 = vrot.lane.b32.xlu1 %v5532_v49, %s4779_s7  ;;  %v4155_v60 = vunpack.i.l.bf16 %v4154_v41  ;;  %v6753_v45 = vunpack.i.h.bf16 %v5338_v54  ;;  %v4080_v52 = vunpack.i.l.bf16 %v5401_v47 }
 0x11a   : > { %4443 = vrot.lane.b32.xlu0 %v5439_v15, %s4779_s7  ;;  %v2599_v41 = vsel %vm1145_vm4, %v2567_v32, %v4160_v18  ;;  %v6755_v32 = vunpack.i.h.bf16 %v5403_v31 }
 0x11b   : > { %v4169_v6 = vpop.permute.xlu1 %4168  ;;  %v2598_v15 = vsel %vm1145_vm4, %v2566_v39, %v4156_v56  ;;  %v2597_v51 = vsel %vm1145_vm4, %v2565_v44, %v4155_v60  ;;  %v1084_v56 = vsel %vm1079_vm2, %v5522_v46, %v3915_v33  ;;  %v6752_v46 = vunpack.i.l.bf16 %v5338_v54 }
 0x11c   : > { %v4171_v12 = vunpack.i.h.bf16 %v4169_v6  ;;  %v4170_v5 = vunpack.i.l.bf16 %v4169_v6  ;;  %v4164_v36 = vpop.permute.xlu0 %4163  ;;  %v1118_v60 = vsel %vm1112_vm3, %v1085_v55, %v6753_v45  ;;  %v4081_v39 = vunpack.i.h.bf16 %v5401_v47  ;;  %v5675_v55 = vld [vmem:[%s4868_s5 + $0x170] sm:$0xff] }
 0x11d   : > { %v4166_v38 = vunpack.i.h.bf16 %v4164_v36  ;;  %v4165_v58 = vunpack.i.l.bf16 %v4164_v36  ;;  %4458 = vrot.lane.b32.xlu1 %v4457_v62, %s4780_s8  ;;  %v1117_v33 = vsel %vm1112_vm3, %v1084_v56, %v6752_v46  ;;  %v6754_v6 = vunpack.i.l.bf16 %v5403_v31  ;;  %v3378_v56 = vld [vmem:[%s4868_s5 + $0x152] sm:$0xff] }
 0x11e   : > { %v2630_v8 = vsel %vm1178_vm5, %v2598_v15, %v4170_v5  ;;  %v2631_v1 = vsel %vm1178_vm5, %v2599_v41, %v4171_v12  ;;  %4453 = vrot.lane.b32.xlu0 %v6750_v42, %s4780_s8  ;;  %v1151_v54 = vsel %vm1145_vm4, %v1118_v60, %v6755_v32  ;;  %v6756_v12 = vunpack.i.h.bf16 %v5188_v26  ;;  %v3557_v46 = vld [vmem:[%s4868_s5 + $0x171] sm:$0xff] }
 0x11f   : > { %v2661_v18 = vpack.c.bf16 %v2631_v1, %v2630_v8  ;;  %v5605_v62 = vpop.permute.xlu1 %4178  ;;  %v2628_v25 = vsel %vm1178_vm5, %v2596_v4, %v4165_v58  ;;  %v2629_v14 = vsel %vm1178_vm5, %v2597_v51, %v4166_v38  ;;  %v1150_v50 = vsel %vm1145_vm4, %v1117_v33, %v6754_v6 }
 0x120   : > { %v4174_v21 = vpop.permute.xlu0 %4173  ;;  %v2660_v9 = vpack.c.bf16 %v2629_v14, %v2628_v25  ;;  %v1054_v5 = vsel %vm1046_vm1, %v5082_v35, %v6756_v12  ;;  %v3845_v47 = vunpack.i.l.bf16 %v5201_v11  ;;  %v6757_v41 = vunpack.i.l.bf16 %v5264_v10 }
 0x121   : > { %v4176_v53 = vunpack.i.h.bf16 %v4174_v21  ;;  %v4175_v48 = vunpack.i.l.bf16 %v4174_v21  ;;  %4468 = vrot.lane.b32.xlu1 %v5548_v30, %s4781_s9  ;;  %v6758_v26 = vunpack.i.h.bf16 %v5264_v10  ;;  %v5653_v58 = vpack.i.bf16 %v3347_v7, %v3346_v16 }
 0x122   : > { %4463 = vrot.lane.b32.xlu0 %v5445_v37, %s4781_s9  ;;  %3731 = vmatprep.mubr.msk.bf16.mxu1 %vm1239_vm6, %v2660_v9  ;;  %v1086_v37 = vsel %vm1079_vm2, %v5537_v57, %v6757_v41  ;;  %v3846_v10 = vunpack.i.h.bf16 %v5201_v11  ;;  %v5672_v11 = vld [vmem:[%s4868_s5 + $0x168] sm:$0xff]  ;;  %v5681_v9 = vld [vmem:[%s4868_s5 + $0x158] sm:$0xff]  ;;  %v3851_v33 = vunpack.i.h.bf16 %v5199_v19  ;;  %v5688_v45 = vsel %vm1046_vm1, %v5073_v28, %v3845_v47 }
 0x123   : > { %v1183_v36 = vsel %vm1178_vm5, %v1150_v50, %v4175_v48  ;;  %v1184_v44 = vsel %vm1178_vm5, %v1151_v54, %v4176_v53  ;;  %3732 = vmatmul.mubr.msk.bf16.vlgmr.msra.gmra.mrb[0].mxu1 %vm1239_vm6, %v2661_v18  ;;  %v5644_v31 = vpop.permute.xlu1 %4188  ;;  %v1087_v35 = vsel %vm1079_vm2, %v1054_v5, %v6758_v26  ;;  %v1119_v8 = vsel %vm1112_vm3, %v1086_v37, %v4000_v27  ;;  %v3379_v18 = vld [vmem:[%s4868_s5 + $0x15a] sm:$0xff]  ;;  %v3406_v26 = vld [vmem:[%s4868_s5 + $0x48] sm:$0xff] }
 0x124   : > { %v1213_v15 = vpack.c.bf16 %v1184_v44, %v1183_v36  ;;  %v4184_v38 = vpop.permute.xlu0 %4183  ;;  %v1120_v1 = vsel %vm1112_vm3, %v1087_v35, %v4001_v13  ;;  %v1152_v57 = vsel %vm1145_vm4, %v1119_v8, %v4080_v52  ;;  %v5678_v13 = vld [vmem:[%s4868_s5 + $0x150] sm:$0xff]  ;;  %v3850_v60 = vunpack.i.l.bf16 %v5199_v19  ;;  %v3408_v35 = vld [vmem:[%s4868_s5 + $0x60] sm:$0xff] }
 0x125   : > { %v4186_v42 = vunpack.i.h.bf16 %v4184_v38  ;;  %v4185_v4 = vunpack.i.l.bf16 %v4184_v38  ;;  %4478 = vrot.lane.b32.xlu1 %v5550_v24, %s4782_s14  ;;  %v1153_v51 = vsel %vm1145_vm4, %v1120_v1, %v4081_v39  ;;  %v5695_v53 = vsel %vm1046_vm1, %v5076_v29, %v3846_v10  ;;  %v3407_v36 = vld [vmem:[%s4868_s5 + $0x50] sm:$0xff]  ;;  %v3409_v1 = vld [vmem:[%s4868_s5 + $0x68] sm:$0xff] }
 0x126   : > { %4473 = vrot.lane.b32.xlu0 %v5532_v49, %s4782_s14  ;;  %3699 = vmatprep.mubr.msk.bf16.mxu0 %vm1239_vm6, %v1213_v15  ;;  %v3556_v49 = vld [vmem:[%s4868_s5 + $0x169] sm:$0xff]  ;;  %v5700_v48 = vpack.i.bf16 %v3379_v18, %v3378_v56  ;;  %v4527_v28 = vpack.i.bf16 %v5675_v55, %v5672_v11  ;;  %v3931_v16 = vunpack.i.h.bf16 %v5272_v17  ;;  %v3930_v7 = vunpack.i.l.bf16 %v5272_v17  ;;  %v4626_v11 = vld [vmem:[%s4868_s5 + $0x78] sm:$0xff]  ;;  %v4627_v55 = vld [vmem:[%s4868_s5 + $0x80] sm:$0xff] }
 0x127   : > { %v1185_v25 = vsel %vm1178_vm5, %v1152_v57, %v4185_v4  ;;  %v1186_v14 = vsel %vm1178_vm5, %v1153_v51, %v4186_v42  ;;  %v5669_v43 = vpop.permute.xlu1 %4198  ;;  %v4522_v29 = vpack.i.bf16 %v5681_v9, %v5678_v13  ;;  %v5708_v52 = vpack.i.bf16 %v3557_v46, %v3556_v49 }
 0x128   : > { %v1214_v27 = vpack.c.bf16 %v1186_v14, %v1185_v25  ;;  %v4194_v21 = vpop.permute.xlu0 %4193  ;;  %v3926_v6 = vunpack.i.h.bf16 %v5274_v20  ;;  %v3925_v50 = vunpack.i.l.bf16 %v5274_v20  ;;  %v4006_v32 = vunpack.i.h.bf16 %v5349_v3 }
 0x129   : > { %4488 = vrot.lane.b32.xlu1 %v5653_v58, %s4781_s9  ;;  %v4181_v54 = vunpack.i.h.bf16 %v5605_v62  ;;  %v4005_v5 = vunpack.i.l.bf16 %v5349_v3  ;;  %v4086_v47 = vunpack.i.h.bf16 %v5414_v0  ;;  %v4180_v44 = vunpack.i.l.bf16 %v5605_v62 }
 0x12a   : > { %4483 = vrot.lane.b32.xlu0 %v5548_v30, %s4781_s9  ;;  %3700 = vmatmul.mubr.msk.bf16.gmra.mrb[4].mxu0 %vm1239_vm6, %v1214_v27  ;;  %v4190_v41 = vunpack.i.l.bf16 %v5644_v31  ;;  %v4085_v37 = vunpack.i.l.bf16 %v5414_v0  ;;  %v4191_v15 = vunpack.i.h.bf16 %v5644_v31  ;;  %v4200_v38 = vunpack.i.l.bf16 %v5669_v43 }
 0x12b   : > { %v4209_v39 = vpop.permute.xlu1 %4208  ;;  %v4195_v8 = vunpack.i.l.bf16 %v4194_v21  ;;  %v4201_v62 = vunpack.i.h.bf16 %v5669_v43  ;;  %v4196_v42 = vunpack.i.h.bf16 %v4194_v21  ;;  %v2505_v51 = vsel %vm1046_vm1, %v3407_v36, %v4181_v54 }
 0x12c   : > { %v4204_v12 = vpop.permute.xlu0 %4203  ;;  %v4210_v4 = vunpack.i.l.bf16 %v4209_v39  ;;  %v4211_v56 = vunpack.i.h.bf16 %v4209_v39  ;;  %v2504_v25 = vsel %vm1046_vm1, %v3406_v26, %v4180_v44  ;;  %v2506_v14 = vsel %vm1046_vm1, %v3408_v35, %v4190_v41 }
 0x12d   : > { %4498 = vrot.lane.b32.xlu1 %v5548_v30, %s4778_s6  ;;  %v4205_v10 = vunpack.i.l.bf16 %v4204_v12  ;;  %v4161_v30 = vunpack.i.h.bf16 %v5572_v59  ;;  %v4206_v31 = vunpack.i.h.bf16 %v4204_v12  ;;  %v2507_v43 = vsel %vm1046_vm1, %v3409_v1, %v4191_v15 }
 0x12e   : > { %4493 = vrot.lane.b32.xlu0 %v5550_v24, %s4782_s14  ;;  %v2538_v21 = vsel %vm1079_vm2, %v2506_v14, %v4200_v38  ;;  %v2536_v59 = vsel %vm1079_vm2, %v2504_v25, %v4195_v8  ;;  %v2539_v39 = vsel %vm1079_vm2, %v2507_v43, %v4201_v62  ;;  %v2537_v54 = vsel %vm1079_vm2, %v2505_v51, %v4196_v42 }
 0x12f   : > { %v5730_v57 = vpop.permute.xlu1 %4218  ;;  %v2570_v12 = vsel %vm1112_vm3, %v2538_v21, %v4210_v4  ;;  %v2568_v36 = vsel %vm1112_vm3, %v2536_v59, %v4205_v10  ;;  %v2571_v41 = vsel %vm1112_vm3, %v2539_v39, %v4211_v56  ;;  %v2569_v26 = vsel %vm1112_vm3, %v2537_v54, %v4206_v31 }
 0x130   : > { %v4214_v18 = vpop.permute.xlu0 %4213  ;;  %v4220_v27 = vunpack.i.l.bf16 %v5730_v57  ;;  %v2600_v51 = vsel %vm1145_vm4, %v2568_v36, %v4161_v30  ;;  %v1088_v56 = vsel %vm1079_vm2, %v5688_v45, %v3925_v50  ;;  %v1089_v30 = vsel %vm1079_vm2, %v5695_v53, %v3926_v6  ;;  %v3589_v53 = vld [vmem:[%s4868_s5 + $0x172] sm:$0xff]  ;;  %v3351_v36 = vld [vmem:[%s4868_s5 + $0x189] sm:$0xff] }
 0x131   : > { %v4216_v49 = vunpack.i.h.bf16 %v4214_v18  ;;  %4508 = vrot.lane.b32.xlu1 %v5653_v58, %s4778_s6  ;;  %v4215_v46 = vunpack.i.l.bf16 %v4214_v18  ;;  %v1121_v50 = vsel %vm1112_vm3, %v1088_v56, %v4005_v5  ;;  %v1122_v21 = vsel %vm1112_vm3, %v1089_v30, %v4006_v32 }
 0x132   : > { %4503 = vrot.lane.b32.xlu0 %v5700_v48, %s4782_s14  ;;  %v2603_v8 = vsel %vm1145_vm4, %v2571_v41, %v4220_v27  ;;  %v4091_v6 = vunpack.i.h.bf16 %v5410_v22  ;;  %v1154_v5 = vsel %vm1145_vm4, %v1121_v50, %v4085_v37  ;;  %v1155_v3 = vsel %vm1145_vm4, %v1122_v21, %v4086_v47  ;;  %v6759_v50 = vld [vmem:[#allocation35_spill] sm:$0xff] }
 0x133   : > { %v4229_v44 = vpop.permute.xlu1 %4228  ;;  %v2602_v1 = vsel %vm1145_vm4, %v2570_v12, %v4216_v49  ;;  %v2601_v42 = vsel %vm1145_vm4, %v2569_v26, %v4215_v46  ;;  %v4011_v49 = vunpack.i.h.bf16 %v5345_v61  ;;  %v4090_v46 = vunpack.i.l.bf16 %v5410_v22  ;;  %v3350_v12 = vld [vmem:[%s4868_s5 + $0x181] sm:$0xff] }
 0x134   : > { %v4231_v35 = vunpack.i.h.bf16 %v4229_v44  ;;  %v4230_v15 = vunpack.i.l.bf16 %v4229_v44  ;;  %v4224_v38 = vpop.permute.xlu0 %4223  ;;  %v1057_v22 = vsel %vm1046_vm1, %v4626_v11, %v3850_v60  ;;  %v3856_v44 = vunpack.i.h.bf16 %v5214_v40 }
 0x135   : > { %v4226_v18 = vunpack.i.h.bf16 %v4224_v38  ;;  %v4225_v62 = vunpack.i.l.bf16 %v4224_v38  ;;  %4518 = vrot.lane.b32.xlu1 %v5700_v48, %s4779_s7  ;;  %v1090_v9 = vsel %vm1079_vm2, %v1057_v22, %v3930_v7  ;;  %v3855_v7 = vunpack.i.l.bf16 %v5214_v40  ;;  %v3413_v22 = vld [vmem:[%s4868_s5 + $0x98] sm:$0xff] }
 0x136   : > { %v2634_v4 = vsel %vm1178_vm5, %v2602_v1, %v4230_v15  ;;  %v2635_v10 = vsel %vm1178_vm5, %v2603_v8, %v4231_v35  ;;  %4513 = vrot.lane.b32.xlu0 %v5550_v24, %s4779_s7  ;;  %v4010_v24 = vunpack.i.l.bf16 %v5345_v61  ;;  %v3588_v61 = vld [vmem:[%s4868_s5 + $0x16a] sm:$0xff]  ;;  %v3935_v41 = vunpack.i.l.bf16 %v5286_v2 }
 0x137   : > { %v2663_v31 = vpack.c.bf16 %v2635_v10, %v2634_v4  ;;  %v2632_v25 = vsel %vm1178_vm5, %v2600_v51, %v4225_v62  ;;  %v2633_v14 = vsel %vm1178_vm5, %v2601_v42, %v4226_v18  ;;  %v5764_v27 = vpop.permute.xlu1 %4238  ;;  %v3936_v38 = vunpack.i.h.bf16 %v5286_v2  ;;  %v3382_v18 = vld [vmem:[%s4868_s5 + $0x182] sm:$0xff]  ;;  %v3383_v62 = vld [vmem:[%s4868_s5 + $0x18a] sm:$0xff]  ;;  %v4629_v2 = vld [vmem:[%s4868_s5 + $0x98] sm:$0xff] }
 0x138   : > { %v2662_v43 = vpack.c.bf16 %v2633_v14, %v2632_v25  ;;  %v4234_v45 = vpop.permute.xlu0 %4233  ;;  %v1123_v47 = vsel %vm1112_vm3, %v1090_v9, %v4010_v24  ;;  %v3861_v40 = vunpack.i.h.bf16 %v5210_v23  ;;  %v3860_v42 = vunpack.i.l.bf16 %v5210_v23  ;;  %v4628_v4 = vld [vmem:[%s4868_s5 + $0x90] sm:$0xff] }
 0x139   : > { %v4236_v20 = vunpack.i.h.bf16 %v4234_v45  ;;  %v4235_v59 = vunpack.i.l.bf16 %v4234_v45  ;;  %4528 = vrot.lane.b32.xlu1 %v4527_v28, %s4780_s8  ;;  %v1058_v28 = vsel %vm1046_vm1, %v4627_v55, %v3851_v33  ;;  %v1156_v17 = vsel %vm1145_vm4, %v1123_v47, %v4090_v46  ;;  %v3412_v46 = vld [vmem:[%s4868_s5 + $0x90] sm:$0xff] }
 0x13a   : > { %4523 = vrot.lane.b32.xlu0 %v4522_v29, %s4780_s8  ;;  %3735 = vmatprep.mubr.msk.bf16.mxu1 %vm1239_vm6, %v2662_v43  ;;  %v1091_v19 = vsel %vm1079_vm2, %v1058_v28, %v3931_v16  ;;  %v5816_v29 = vpack.i.bf16 %v3589_v53, %v3588_v61  ;;  %v1059_v10 = vsel %vm1046_vm1, %v4628_v4, %v3855_v7  ;;  %v3941_v56 = vunpack.i.h.bf16 %v5284_v63 }
 0x13b   : > { %v1187_v0 = vsel %vm1178_vm5, %v1154_v5, %v4235_v59  ;;  %v1188_v32 = vsel %vm1178_vm5, %v1155_v3, %v4236_v20  ;;  %3736 = vmatmul.mubr.msk.bf16.gmra.mrb[4].mxu1 %vm1239_vm6, %v2663_v31  ;;  %v5808_v13 = vpop.permute.xlu1 %4248  ;;  %v1124_v37 = vsel %vm1112_vm3, %v1091_v19, %v4011_v49  ;;  %v1060_v51 = vsel %vm1046_vm1, %v4629_v2, %v3856_v44  ;;  %v3411_v20 = vld [vmem:[%s4868_s5 + $0x80] sm:$0xff] }
 0x13c   : > { %v1215_v60 = vpack.c.bf16 %v1188_v32, %v1187_v0  ;;  %v4244_v33 = vpop.permute.xlu0 %4243  ;;  %v1157_v16 = vsel %vm1145_vm4, %v1124_v37, %v4091_v6  ;;  %v3940_v31 = vunpack.i.l.bf16 %v5284_v63  ;;  %v5853_v25 = vsel %vm1079_vm2, %v1059_v10, %v3935_v41  ;;  %v3410_v6 = vld [vmem:[%s4868_s5 + $0x78] sm:$0xff] }
 0x13d   : > { %v4246_v39 = vunpack.i.h.bf16 %v4244_v33  ;;  %v4245_v54 = vunpack.i.l.bf16 %v4244_v33  ;;  %4538 = vrot.lane.b32.xlu1 %v5708_v52, %s4781_s9  ;;  %v5856_v30 = vsel %vm1079_vm2, %v1060_v51, %v3936_v38  ;;  %v4241_v49 = vunpack.i.h.bf16 %v5764_v27  ;;  %v5903_v51 = vld [vmem:[%s4868_s5 + $0x180] sm:$0xff] }
 0x13e   : > { %4533 = vrot.lane.b32.xlu0 %v5653_v58, %s4781_s9  ;;  %3703 = vmatprep.mubr.msk.bf16.mxu0 %vm1239_vm6, %v1215_v60  ;;  %v5837_v58 = vpack.i.bf16 %v3351_v36, %v3350_v12  ;;  %v5860_v43 = vpack.i.bf16 %v3383_v62, %v3382_v18  ;;  %v4015_v45 = vunpack.i.l.bf16 %v5355_v34  ;;  %v4096_v21 = vunpack.i.h.bf16 %v6759_v50  ;;  %v3529_v18 = vld [vmem:[%s4868_s5 + $0x1a0] sm:$0xff] }
 0x13f   : > { %v1189_v26 = vsel %vm1178_vm5, %v1156_v17, %v4245_v54  ;;  %v1190_v35 = vsel %vm1178_vm5, %v1157_v16, %v4246_v39  ;;  %v4259_v15 = vpop.permute.xlu1 %4258  ;;  %v4240_v59 = vunpack.i.l.bf16 %v5764_v27  ;;  %v4250_v61 = vunpack.i.l.bf16 %v5808_v13  ;;  %v3592_v63 = vld [vmem:[%s4868_s5 + $0x19a] sm:$0xff] }
 0x140   : > { %v1216_v8 = vpack.c.bf16 %v1190_v35, %v1189_v26  ;;  %v4254_v1 = vpop.permute.xlu0 %4253  ;;  %v4095_v53 = vunpack.i.l.bf16 %v6759_v50  ;;  %v4251_v5 = vunpack.i.h.bf16 %v5808_v13  ;;  %v4260_v3 = vunpack.i.l.bf16 %v4259_v15 }
 0x141   : > { %4548 = vrot.lane.b32.xlu1 %v5816_v29, %s4782_s14  ;;  %v4255_v11 = vunpack.i.l.bf16 %v4254_v1  ;;  %v4261_v55 = vunpack.i.h.bf16 %v4259_v15  ;;  %v4256_v28 = vunpack.i.h.bf16 %v4254_v1  ;;  %v4221_v9 = vunpack.i.h.bf16 %v5730_v57  ;;  %v3528_v1 = vld [vmem:[%s4868_s5 + $0x198] sm:$0xff] }
 0x142   : > { %4543 = vrot.lane.b32.xlu0 %v5700_v48, %s4782_s14  ;;  %3704 = vmatmul.mubr.msk.bf16.gmra.mrb[8].mxu0 %vm1239_vm6, %v1216_v8  ;;  %v4016_v48 = vunpack.i.h.bf16 %v5355_v34  ;;  %v2509_v19 = vsel %vm1046_vm1, %v3411_v20, %v4241_v49  ;;  %v2508_v13 = vsel %vm1046_vm1, %v3410_v6, %v4240_v59  ;;  %v2510_v37 = vsel %vm1046_vm1, %v3412_v46, %v4250_v61 }
 0x143   : > { %v4269_v14 = vpop.permute.xlu1 %4268  ;;  %v2511_v7 = vsel %vm1046_vm1, %v3413_v22, %v4251_v5  ;;  %v2542_v57 = vsel %vm1079_vm2, %v2510_v37, %v4260_v3  ;;  %v2540_v17 = vsel %vm1079_vm2, %v2508_v13, %v4255_v11  ;;  %v2541_v36 = vsel %vm1079_vm2, %v2509_v19, %v4256_v28  ;;  %v6760_v11 = vld [vmem:[#allocation25_spill] sm:$0xff]  ;;  %v6761_v37 = vld [vmem:[#allocation34_spill] sm:$0xff] }
 0x144   : > { %v4264_v24 = vpop.permute.xlu0 %4263  ;;  %v4270_v27 = vunpack.i.l.bf16 %v4269_v14  ;;  %v4271_v60 = vunpack.i.h.bf16 %v4269_v14  ;;  %v2543_v12 = vsel %vm1079_vm2, %v2511_v7, %v4261_v55  ;;  %v5906_v14 = vld [vmem:[%s4868_s5 + $0x188] sm:$0xff]  ;;  %v4597_v3 = vpack.i.bf16 %v3529_v18, %v3528_v1 }
 0x145   : > { %4558 = vrot.lane.b32.xlu1 %v5837_v58, %s4781_s9  ;;  %v4265_v0 = vunpack.i.l.bf16 %v4264_v24  ;;  %v4266_v33 = vunpack.i.h.bf16 %v4264_v24  ;;  %v4021_v22 = vunpack.i.h.bf16 %v6760_v11  ;;  %v4020_v55 = vunpack.i.l.bf16 %v6760_v11  ;;  %v3561_v13 = vld [vmem:[%s4868_s5 + $0x1a1] sm:$0xff] }
 0x146   : > { %4553 = vrot.lane.b32.xlu0 %v5708_v52, %s4781_s9  ;;  %v2574_v44 = vsel %vm1112_vm3, %v2542_v57, %v4270_v27  ;;  %v2575_v26 = vsel %vm1112_vm3, %v2543_v12, %v4271_v60  ;;  %v1126_v19 = vsel %vm1112_vm3, %v5856_v30, %v4016_v48  ;;  %v4630_v30 = vld [vmem:[%s4868_s5 + $0xa8] sm:$0xff] }
 0x147   : > { %v5876_v32 = vpop.permute.xlu1 %4278  ;;  %v2573_v35 = vsel %vm1112_vm3, %v2541_v36, %v4266_v33  ;;  %v1159_v34 = vsel %vm1145_vm4, %v1126_v19, %v4096_v21  ;;  %v1061_v48 = vsel %vm1046_vm1, %v4630_v30, %v3860_v42  ;;  %v3417_v30 = vld [vmem:[%s4868_s5 + $0xc8] sm:$0xff] }
 0x148   : > { %v4274_v47 = vpop.permute.xlu0 %4273  ;;  %v4280_v39 = vunpack.i.l.bf16 %v5876_v32  ;;  %v1094_v21 = vsel %vm1079_vm2, %v1061_v48, %v3940_v31  ;;  %v6762_v31 = vld [vmem:[#allocation10_spill] sm:$0xff] }
 0x149   : > { %v4276_v54 = vunpack.i.h.bf16 %v4274_v47  ;;  %4568 = vrot.lane.b32.xlu1 %v5708_v52, %s4778_s6  ;;  %v4275_v16 = vunpack.i.l.bf16 %v4274_v47  ;;  %v2572_v52 = vsel %vm1112_vm3, %v2540_v17, %v4265_v0  ;;  %v4592_v0 = vpack.i.bf16 %v5906_v14, %v5903_v51  ;;  %v3560_v47 = vld [vmem:[%s4868_s5 + $0x199] sm:$0xff] }
 0x14a   : > { %4563 = vrot.lane.b32.xlu0 %v5816_v29, %s4782_s14  ;;  %v2607_v62 = vsel %vm1145_vm4, %v2575_v26, %v4280_v39  ;;  %v2604_v59 = vsel %vm1145_vm4, %v2572_v52, %v4221_v9  ;;  %v1125_v9 = vsel %vm1112_vm3, %v5853_v25, %v4015_v45  ;;  %v4101_v39 = vunpack.i.h.bf16 %v6761_v37  ;;  %v4631_v45 = vld [vmem:[%s4868_s5 + $0xb0] sm:$0xff] }
 0x14b   : > { %v4289_v41 = vpop.permute.xlu1 %4288  ;;  %v2606_v4 = vsel %vm1145_vm4, %v2574_v44, %v4276_v54  ;;  %v2605_v49 = vsel %vm1145_vm4, %v2573_v35, %v4275_v16  ;;  %v4100_v54 = vunpack.i.l.bf16 %v6761_v37  ;;  %v1158_v25 = vsel %vm1145_vm4, %v1125_v9, %v4095_v53  ;;  %v6767_v9 = vld [vmem:[#allocation37_spill] sm:$0xff] }
 0x14c   : > { %v4291_v15 = vunpack.i.h.bf16 %v4289_v41  ;;  %v4290_v38 = vunpack.i.l.bf16 %v4289_v41  ;;  %v4284_v8 = vpop.permute.xlu0 %4283  ;;  %v1062_v7 = vsel %vm1046_vm1, %v4631_v45, %v3861_v40  ;;  %v4607_v57 = vpack.i.bf16 %v3561_v13, %v3560_v47  ;;  %v3414_v37 = vld [vmem:[%s4868_s5 + $0xa8] sm:$0xff] }
 0x14d   : > { %v4286_v10 = vunpack.i.h.bf16 %v4284_v8  ;;  %v4285_v2 = vunpack.i.l.bf16 %v4284_v8  ;;  %4578 = vrot.lane.b32.xlu1 %v5837_v58, %s4778_s6  ;;  %v1095_v23 = vsel %vm1079_vm2, %v1062_v7, %v3941_v56  ;;  %v1127_v17 = vsel %vm1112_vm3, %v1094_v21, %v4020_v55  ;;  %v3593_v56 = vld [vmem:[%s4868_s5 + $0x1a2] sm:$0xff]  ;;  %s4783_s6 = smov 120  }
 0x14e   : > { %v2638_v24 = vsel %vm1178_vm5, %v2606_v4, %v4290_v38  ;;  %v2639_v20 = vsel %vm1178_vm5, %v2607_v62, %v4291_v15  ;;  %4573 = vrot.lane.b32.xlu0 %v5860_v43, %s4782_s14  ;;  %v1128_v16 = vsel %vm1112_vm3, %v1095_v23, %v4021_v22  ;;  %v1160_v44 = vsel %vm1145_vm4, %v1127_v17, %v4100_v54  ;;  %v6763_v62 = vld [vmem:[#allocation9_spill] sm:$0xff]  ;;  %v6766_v22 = vld [vmem:[#allocation27_spill] sm:$0xff] }
 0x14f   : > { %v2665_v61 = vpack.c.bf16 %v2639_v20, %v2638_v24  ;;  %v2636_v6 = vsel %vm1178_vm5, %v2604_v59, %v4285_v2  ;;  %v2637_v46 = vsel %vm1178_vm5, %v2605_v49, %v4286_v10  ;;  %v5916_v5 = vpop.permute.xlu1 %4298  ;;  %v1161_v52 = vsel %vm1145_vm4, %v1128_v16, %v4101_v39  ;;  %v4632_v2 = vld [vmem:[%s4868_s5 + $0xc0] sm:$0xff]  ;;  %v4633_v24 = vld [vmem:[%s4868_s5 + $0xc8] sm:$0xff] }
 0x150   : > { %v2664_v28 = vpack.c.bf16 %v2637_v46, %v2636_v6  ;;  %v4294_v27 = vpop.permute.xlu0 %4293  ;;  %v3866_v41 = vunpack.i.h.bf16 %v6762_v31  ;;  %v3865_v26 = vunpack.i.l.bf16 %v6762_v31  ;;  %v4617_v18 = vpack.i.bf16 %v3593_v56, %v3592_v63  ;;  %v6764_v59 = vld [vmem:[#allocation17_spill] sm:$0xff] }
 0x151   : > { %v4296_v60 = vunpack.i.h.bf16 %v4294_v27  ;;  %v4295_v33 = vunpack.i.l.bf16 %v4294_v27  ;;  %4588 = vrot.lane.b32.xlu1 %v5860_v43, %s4779_s7  ;;  %v3871_v4 = vunpack.i.h.bf16 %v6763_v62  ;;  %v3870_v10 = vunpack.i.l.bf16 %v6763_v62  ;;  %v3416_v39 = vld [vmem:[%s4868_s5 + $0xc0] sm:$0xff] }
 0x152   : > { %4583 = vrot.lane.b32.xlu0 %v5816_v29, %s4779_s7  ;;  %3739 = vmatprep.mubr.msk.bf16.mxu1 %vm1239_vm6, %v2664_v28  ;;  %v1063_v49 = vsel %vm1046_vm1, %v4632_v2, %v3865_v26  ;;  %v5987_v20 = vsel %vm1046_vm1, %v4633_v24, %v3866_v41  ;;  %v3950_v6 = vunpack.i.l.bf16 %v6764_v59  ;;  %v4026_v55 = vunpack.i.h.bf16 %v6766_v22 }
 0x153   : > { %v1191_v53 = vsel %vm1178_vm5, %v1158_v25, %v4295_v33  ;;  %v1192_v50 = vsel %vm1178_vm5, %v1159_v34, %v4296_v60  ;;  %3740 = vmatmul.mubr.msk.bf16.gmra.mrb[8].mxu1 %vm1239_vm6, %v2665_v61  ;;  %v5956_v29 = vpop.permute.xlu1 %4308  ;;  %v3951_v61 = vunpack.i.h.bf16 %v6764_v59  ;;  %v4301_v28 = vunpack.i.h.bf16 %v5916_v5  ;;  %v3415_v60 = vld [vmem:[%s4868_s5 + $0xb0] sm:$0xff] }
 0x154   : > { %v1217_v42 = vpack.c.bf16 %v1192_v50, %v1191_v53  ;;  %v4304_v40 = vpop.permute.xlu0 %4303  ;;  %v4106_v19 = vunpack.i.h.bf16 %v6767_v9  ;;  %v4300_v33 = vunpack.i.l.bf16 %v5916_v5  ;;  %v4310_v47 = vunpack.i.l.bf16 %v5956_v29 }
 0x155   : > { %v4306_v12 = vunpack.i.h.bf16 %v4304_v40  ;;  %v4305_v36 = vunpack.i.l.bf16 %v4304_v40  ;;  %4598 = vrot.lane.b32.xlu1 %v4597_v3, %s4780_s8  ;;  %v6765_v3 = vld [vmem:[#allocation18_spill] sm:$0xff]  ;;  %v4105_v13 = vunpack.i.l.bf16 %v6767_v9  ;;  %v4311_v54 = vunpack.i.h.bf16 %v5956_v29 }
 0x156   : > { %4593 = vrot.lane.b32.xlu0 %v4592_v0, %s4780_s8  ;;  %3707 = vmatprep.mubr.msk.bf16.mxu0 %vm1239_vm6, %v1217_v42  ;;  %v3946_v11 = vunpack.i.h.bf16 %v6765_v3  ;;  %v4025_v0 = vunpack.i.l.bf16 %v6766_v22  ;;  %v4281_v50 = vunpack.i.h.bf16 %v5876_v32  ;;  %v2513_v21 = vsel %vm1046_vm1, %v3415_v60, %v4301_v28  ;;  %s3654_s8 = sshll.u32 %s4834_s19, 13 }
 0x157   : > { %v1193_v35 = vsel %vm1178_vm5, %v1160_v44, %v4305_v36  ;;  %v1194_v15 = vsel %vm1178_vm5, %v1161_v52, %v4306_v12  ;;  %v4319_v38 = vpop.permute.xlu1 %4318  ;;  %v2512_v29 = vsel %vm1046_vm1, %v3414_v37, %v4300_v33  ;;  %v2515_v16 = vsel %vm1046_vm1, %v3417_v30, %v4311_v54  ;;  %v6768_v54 = vld [vmem:[#allocation26_spill] sm:$0xff]  ;;  %s6563_s12 = scalar_lea.hbm %s6686_s2, %s3654_s8 }
 0x158   : > { %v1218_v8 = vpack.c.bf16 %v1194_v15, %v1193_v35  ;;  %v4314_v1 = vpop.permute.xlu0 %4313  ;;  %v4320_v25 = vunpack.i.l.bf16 %v4319_v38  ;;  %v4321_v48 = vunpack.i.h.bf16 %v4319_v38 }
 0x159   : > { %4608 = vrot.lane.b32.xlu1 %v4607_v57, %s4781_s9  ;;  %v4315_v34 = vunpack.i.l.bf16 %v4314_v1  ;;  %v4316_v45 = vunpack.i.h.bf16 %v4314_v1  ;;  %v2514_v57 = vsel %vm1046_vm1, %v3416_v39, %v4310_v47  ;;  %v1097_v39 = vsel %vm1079_vm2, %v5987_v20, %v3946_v11 }
 0x15a   : > { %4603 = vrot.lane.b32.xlu0 %v5837_v58, %s4781_s9  ;;  %3708 = vmatmul.mubr.msk.bf16.gmra.mrb[12].mxu0 %vm1239_vm6, %v1218_v8  ;;  %v3945_v58 = vunpack.i.l.bf16 %v6765_v3  ;;  %v2546_v12 = vsel %vm1079_vm2, %v2514_v57, %v4320_v25  ;;  %v2547_v32 = vsel %vm1079_vm2, %v2515_v16, %v4321_v48  ;;  %v4031_v25 = vunpack.i.h.bf16 %v6768_v54 }
 0x15b   : > { %v4329_v46 = vpop.permute.xlu1 %4328  ;;  %v2544_v36 = vsel %vm1079_vm2, %v2512_v29, %v4315_v34  ;;  %v2545_v52 = vsel %vm1079_vm2, %v2513_v21, %v4316_v45  ;;  %v4030_v34 = vunpack.i.l.bf16 %v6768_v54 }
 0x15c   : > { %v4324_v27 = vpop.permute.xlu0 %4323  ;;  %v4330_v7 = vunpack.i.l.bf16 %v4329_v46  ;;  %v4331_v23 = vunpack.i.h.bf16 %v4329_v46 }
 0x15d   : > { %4618 = vrot.lane.b32.xlu1 %v4617_v18, %s4782_s14  ;;  %v4325_v5 = vunpack.i.l.bf16 %v4324_v27  ;;  %v4326_v42 = vunpack.i.h.bf16 %v4324_v27  ;;  %v1096_v27 = vsel %vm1079_vm2, %v1063_v49, %v3945_v58  ;;  %v1130_v49 = vsel %vm1112_vm3, %v1097_v39, %v4026_v55  ;;  %v4635_v55 = vld [vmem:[%s4868_s5 + $0xe0] sm:$0xff] }
 0x15e   : > { %4613 = vrot.lane.b32.xlu0 %v5860_v43, %s4782_s14  ;;  %v2578_v63 = vsel %vm1112_vm3, %v2546_v12, %v4330_v7  ;;  %v2579_v41 = vsel %vm1112_vm3, %v2547_v32, %v4331_v23  ;;  %v1129_v45 = vsel %vm1112_vm3, %v1096_v27, %v4025_v0  ;;  %v1163_v20 = vsel %vm1145_vm4, %v1130_v49, %v4106_v19  ;;  %v4634_v23 = vld [vmem:[%s4868_s5 + $0xd8] sm:$0xff] }
 0x15f   : > { %v6008_v53 = vpop.permute.xlu1 %4338  ;;  %v2576_v56 = vsel %vm1112_vm3, %v2544_v36, %v4325_v5  ;;  %v2577_v26 = vsel %vm1112_vm3, %v2545_v52, %v4326_v42  ;;  %v6769_v5 = vld [vmem:[#allocation36_spill] sm:$0xff]  ;;  %v1162_v21 = vsel %vm1145_vm4, %v1129_v45, %v4105_v13  ;;  %v1065_v22 = vsel %vm1046_vm1, %v4634_v23, %v3870_v10 }
 0x160   : > { %v4334_v40 = vpop.permute.xlu0 %4333  ;;  %v4340_v43 = vunpack.i.l.bf16 %v6008_v53  ;;  %v2608_v28 = vsel %vm1145_vm4, %v2576_v56, %v4281_v50  ;;  %v4110_v50 = vunpack.i.l.bf16 %v6769_v5  ;;  %v4341_v11 = vunpack.i.h.bf16 %v6008_v53  ;;  %v3419_v56 = vld [vmem:[%s4868_s5 + $0xe0] sm:$0xff] }
 0x161   : > { %v4336_v17 = vunpack.i.h.bf16 %v4334_v40  ;;  %v4335_v44 = vunpack.i.l.bf16 %v4334_v40  ;;  %v1066_v0 = vsel %vm1046_vm1, %v4635_v55, %v3871_v4  ;;  %v1098_v53 = vsel %vm1079_vm2, %v1065_v22, %v3950_v6 }
 0x162   : > { %v2611_v8 = vsel %vm1145_vm4, %v2579_v41, %v4340_v43  ;;  %v1099_v10 = vsel %vm1079_vm2, %v1066_v0, %v3951_v61  ;;  %v1131_v62 = vsel %vm1112_vm3, %v1098_v53, %v4030_v34 }
 0x163   : > { %v4349_v31 = vpop.permute.xlu1 %4348  ;;  %v2610_v1 = vsel %vm1145_vm4, %v2578_v63, %v4336_v17  ;;  %v2609_v24 = vsel %vm1145_vm4, %v2577_v26, %v4335_v44  ;;  %v1132_v4 = vsel %vm1112_vm3, %v1099_v10, %v4031_v25  ;;  %v1164_v43 = vsel %vm1145_vm4, %v1131_v62, %v4110_v50  ;;  %v3418_v63 = vld [vmem:[%s4868_s5 + $0xd8] sm:$0xff] }
 0x164   : > { %v4351_v35 = vunpack.i.h.bf16 %v4349_v31  ;;  %v4350_v15 = vunpack.i.l.bf16 %v4349_v31  ;;  %v4344_v38 = vpop.permute.xlu0 %4343  ;;  %v1165_v17 = vsel %vm1145_vm4, %v1132_v4, %v4341_v11  ;;  %v6770_v26 = vld [vmem:[#allocation12_spill] sm:$0xff] }
 0x165   : > { %v4346_v18 = vunpack.i.h.bf16 %v4344_v38  ;;  %v4345_v2 = vunpack.i.l.bf16 %v4344_v38  ;;  %v3421_v38 = vld [vmem:[%s4868_s5 + $0xf8] sm:$0xff] }
 0x166   : > { %v2642_v46 = vsel %vm1178_vm5, %v2610_v1, %v4350_v15  ;;  %v2643_v3 = vsel %vm1178_vm5, %v2611_v8, %v4351_v35  ;;  %v3876_v35 = vunpack.i.h.bf16 %v6770_v26  ;;  %v3420_v15 = vld [vmem:[%s4868_s5 + $0xf0] sm:$0xff] }
 0x167   : > { %v2667_v60 = vpack.c.bf16 %v2643_v3, %v2642_v46  ;;  %v2640_v33 = vsel %vm1178_vm5, %v2608_v28, %v4345_v2  ;;  %v2641_v47 = vsel %vm1178_vm5, %v2609_v24, %v4346_v18  ;;  %v4359_v37 = vpop.permute.xlu1 %4358 }
 0x168   : > { %v2666_v30 = vpack.c.bf16 %v2641_v47, %v2640_v33  ;;  %v4354_v48 = vpop.permute.xlu0 %4353  ;;  %v4361_v44 = vunpack.i.h.bf16 %v4359_v37  ;;  %v4360_v32 = vunpack.i.l.bf16 %v4359_v37 }
 0x169   : > { %v4356_v58 = vunpack.i.h.bf16 %v4354_v48  ;;  %v4355_v7 = vunpack.i.l.bf16 %v4354_v48 }
 0x16a   : > { %3743 = vmatprep.mubr.msk.bf16.mxu1 %vm1239_vm6, %v2666_v30  ;;  %v2517_v28 = vsel %vm1046_vm1, %v3419_v56, %v4361_v44  ;;  %v2516_v27 = vsel %vm1046_vm1, %v3418_v63, %v4360_v32  ;;  %v6773_v44 = vld [vmem:[#allocation11_spill] sm:$0xff] }
 0x16b   : > { %v1195_v13 = vsel %vm1178_vm5, %v1162_v21, %v4355_v7  ;;  %v1196_v9 = vsel %vm1178_vm5, %v1163_v20, %v4356_v58  ;;  %3744 = vmatmul.mubr.msk.bf16.gmra.mrb[12].mxu1 %vm1239_vm6, %v2667_v60  ;;  %v4369_v19 = vpop.permute.xlu1 %4368  ;;  %v3881_v32 = vunpack.i.h.bf16 %v6773_v44 }
 0x16c   : > { %v1219_v42 = vpack.c.bf16 %v1196_v9, %v1195_v13  ;;  %v4364_v40 = vpop.permute.xlu0 %4363  ;;  %v4371_v31 = vunpack.i.h.bf16 %v4369_v19  ;;  %v4370_v41 = vunpack.i.l.bf16 %v4369_v19 }
 0x16d   : > { %v4366_v29 = vunpack.i.h.bf16 %v4364_v40  ;;  %v4365_v57 = vunpack.i.l.bf16 %v4364_v40  ;;  %v3875_v40 = vunpack.i.l.bf16 %v6770_v26  ;;  %v4637_v26 = vld [vmem:[%s4868_s5 + $0xf8] sm:$0xff] }
 0x16e   : > { %3711 = vmatprep.mubr.msk.bf16.mxu0 %vm1239_vm6, %v1219_v42  ;;  %v2519_v37 = vsel %vm1046_vm1, %v3421_v38, %v4371_v31  ;;  %v2518_v39 = vsel %vm1046_vm1, %v3420_v15, %v4370_v41  ;;  %v4636_v31 = vld [vmem:[%s4868_s5 + $0xf0] sm:$0xff]  ;;  %v1068_v15 = vsel %vm1046_vm1, %v4637_v26, %v3876_v35 }
 0x16f   : > { %v1197_v59 = vsel %vm1178_vm5, %v1164_v43, %v4365_v57  ;;  %v1198_v61 = vsel %vm1178_vm5, %v1165_v17, %v4366_v29  ;;  %v4379_v6 = vpop.permute.xlu1 %4378  ;;  %v6771_v43 = vld [vmem:[#allocation20_spill] sm:$0xff]  ;;  %v1067_v41 = vsel %vm1046_vm1, %v4636_v31, %v3875_v40  ;;  %v6774_v38 = vld [vmem:[#allocation19_spill] sm:$0xff] }
 0x170   : > { %v1220_v16 = vpack.c.bf16 %v1198_v61, %v1197_v59  ;;  %v4374_v12 = vpop.permute.xlu0 %4373  ;;  %v4381_v8 = vunpack.i.h.bf16 %v4379_v6  ;;  %v4380_v1 = vunpack.i.l.bf16 %v4379_v6  ;;  %v3956_v17 = vunpack.i.h.bf16 %v6771_v43 }
 0x171   : > { %v4376_v18 = vunpack.i.h.bf16 %v4374_v12  ;;  %v4375_v2 = vunpack.i.l.bf16 %v4374_v12  ;;  %v3955_v59 = vunpack.i.l.bf16 %v6771_v43  ;;  %v3423_v43 = vld [vmem:[%s4868_s5 + $0x110] sm:$0xff] }
 0x172   : > { %3712 = vmatmul.mubr.msk.bf16.gmra.mrb[16].mxu0 %vm1239_vm6, %v1220_v16  ;;  %v2550_v34 = vsel %vm1079_vm2, %v2518_v39, %v4380_v1  ;;  %v2551_v30 = vsel %vm1079_vm2, %v2519_v37, %v4381_v8  ;;  %v6772_v16 = vld [vmem:[#allocation29_spill] sm:$0xff]  ;;  %v3961_v8 = vunpack.i.h.bf16 %v6774_v38  ;;  %v3960_v1 = vunpack.i.l.bf16 %v6774_v38 }
 0x173   : > { %v4389_v36 = vpop.permute.xlu1 %4388  ;;  %v2549_v49 = vsel %vm1079_vm2, %v2517_v28, %v4376_v18  ;;  %v2548_v58 = vsel %vm1079_vm2, %v2516_v27, %v4375_v2  ;;  %v4036_v12 = vunpack.i.h.bf16 %v6772_v16  ;;  %v1100_v2 = vsel %vm1079_vm2, %v1067_v41, %v3955_v59  ;;  %v4640_v38 = vld [vmem:[%s4868_s5 + $0x128] sm:$0xff] }
 0x174   : > { %v4384_v52 = vpop.permute.xlu0 %4383  ;;  %v4391_v24 = vunpack.i.h.bf16 %v4389_v36  ;;  %v4390_v46 = vunpack.i.l.bf16 %v4389_v36  ;;  %v4035_v36 = vunpack.i.l.bf16 %v6772_v16 }
 0x175   : > { %v4386_v60 = vunpack.i.h.bf16 %v4384_v52  ;;  %v4385_v33 = vunpack.i.l.bf16 %v4384_v52  ;;  %v3880_v52 = vunpack.i.l.bf16 %v6773_v44 }
 0x176   : > { %v2582_v7 = vsel %vm1112_vm3, %v2550_v34, %v4390_v46  ;;  %v2583_v5 = vsel %vm1112_vm3, %v2551_v30, %v4391_v24  ;;  %v1101_v24 = vsel %vm1079_vm2, %v1068_v15, %v3956_v17  ;;  %v6775_v46 = vld [vmem:[#allocation28_spill] sm:$0xff]  ;;  %v1133_v35 = vsel %vm1112_vm3, %v1100_v2, %v4035_v36  ;;  %v4638_v34 = vld [vmem:[%s4868_s5 + $0x108] sm:$0xff] }
 0x177   : > { %v4399_v3 = vpop.permute.xlu1 %4398  ;;  %v2580_v21 = vsel %vm1112_vm3, %v2548_v58, %v4385_v33  ;;  %v2581_v20 = vsel %vm1112_vm3, %v2549_v49, %v4386_v60  ;;  %v4040_v28 = vunpack.i.l.bf16 %v6775_v46  ;;  %v1134_v60 = vsel %vm1112_vm3, %v1101_v24, %v4036_v12 }
 0x178   : > { %v4394_v47 = vpop.permute.xlu0 %4393  ;;  %v4401_v54 = vunpack.i.h.bf16 %v4399_v3  ;;  %v4400_v25 = vunpack.i.l.bf16 %v4399_v3  ;;  %v4041_v3 = vunpack.i.h.bf16 %v6775_v46  ;;  %v1069_v30 = vsel %vm1046_vm1, %v4638_v34, %v3880_v52 }
 0x179   : > { %v4396_v48 = vunpack.i.h.bf16 %v4394_v47  ;;  %v4395_v45 = vunpack.i.l.bf16 %v4394_v47 }
 0x17a   : > { %v2614_v55 = vsel %vm1145_vm4, %v2582_v7, %v4400_v25  ;;  %v2615_v0 = vsel %vm1145_vm4, %v2583_v5, %v4401_v54  ;;  %v1102_v5 = vsel %vm1079_vm2, %v1069_v30, %v3960_v1  ;;  %v4641_v1 = vld [vmem:[%s4868_s5 + $0x120] sm:$0xff] }
 0x17b   : > { %v4409_v50 = vpop.permute.xlu1 %4408  ;;  %v2612_v19 = vsel %vm1145_vm4, %v2580_v21, %v4395_v45  ;;  %v2613_v53 = vsel %vm1145_vm4, %v2581_v20, %v4396_v48  ;;  %v4639_v48 = vld [vmem:[%s4868_s5 + $0x110] sm:$0xff] }
 0x17c   : > { %v4411_v11 = vunpack.i.h.bf16 %v4409_v50  ;;  %v4410_v23 = vunpack.i.l.bf16 %v4409_v50  ;;  %v4404_v22 = vpop.permute.xlu0 %4403  ;;  %v1070_v45 = vsel %vm1046_vm1, %v4639_v48, %v3881_v32 }
 0x17d   : > { %v4406_v13 = vunpack.i.h.bf16 %v4404_v22  ;;  %v4405_v9 = vunpack.i.l.bf16 %v4404_v22  ;;  %v1103_v50 = vsel %vm1079_vm2, %v1070_v45, %v3961_v8 }
 0x17e   : > { %v2646_v10 = vsel %vm1178_vm5, %v2614_v55, %v4410_v23  ;;  %v2647_v42 = vsel %vm1178_vm5, %v2615_v0, %v4411_v11  ;;  %v1135_v11 = vsel %vm1112_vm3, %v1102_v5, %v4040_v28  ;;  %v1136_v23 = vsel %vm1112_vm3, %v1103_v50, %v4041_v3 }
 0x17f   : > { %v2669_v62 = vpack.c.bf16 %v2647_v42, %v2646_v10  ;;  %v2644_v4 = vsel %vm1178_vm5, %v2612_v19, %v4405_v9  ;;  %v2645_v29 = vsel %vm1178_vm5, %v2613_v53, %v4406_v13  ;;  %v4419_v57 = vpop.permute.xlu1 %4418 }
 0x180   : > { %v2668_v61 = vpack.c.bf16 %v2645_v29, %v2644_v4  ;;  %v4414_v6 = vpop.permute.xlu0 %4413  ;;  %v4421_v37 = vunpack.i.h.bf16 %v4419_v57  ;;  %v4420_v39 = vunpack.i.l.bf16 %v4419_v57  ;;  %v3422_v57 = vld [vmem:[%s4868_s5 + $0x108] sm:$0xff] }
 0x181   : > { %v4416_v63 = vunpack.i.h.bf16 %v4414_v6  ;;  %v4415_v56 = vunpack.i.l.bf16 %v4414_v6 }
 0x182   : > { %3747 = vmatprep.mubr.msk.bf16.mxu1 %vm1239_vm6, %v2668_v61  ;;  %v1168_v0 = vsel %vm1145_vm4, %v1135_v11, %v4420_v39  ;;  %v1169_v13 = vsel %vm1145_vm4, %v1136_v23, %v4421_v37  ;;  %v6776_v61 = vld [vmem:[#allocation14_spill] sm:$0xff] }
 0x183   : > { %3748 = vmatmul.mubr.msk.bf16.gmra.mrb[16].mxu1 %vm1239_vm6, %v2669_v62  ;;  %v4429_v18 = vpop.permute.xlu1 %4428  ;;  %v1166_v54 = vsel %vm1145_vm4, %v1133_v35, %v4415_v56  ;;  %v1167_v25 = vsel %vm1145_vm4, %v1134_v60, %v4416_v63  ;;  %v3886_v6 = vunpack.i.h.bf16 %v6776_v61 }
 0x184   : > { %v4424_v27 = vpop.permute.xlu0 %4423  ;;  %v4431_v62 = vunpack.i.h.bf16 %v4429_v18  ;;  %v4430_v4 = vunpack.i.l.bf16 %v4429_v18 }
 0x185   : > { %v4426_v33 = vunpack.i.h.bf16 %v4424_v27  ;;  %v4425_v47 = vunpack.i.l.bf16 %v4424_v27 }
 0x186   : > { %v2521_v56 = vsel %vm1046_vm1, %v3423_v43, %v4431_v62  ;;  %v2520_v31 = vsel %vm1046_vm1, %v3422_v57, %v4430_v4  ;;  %v6779_v62 = vld [vmem:[#allocation13_spill] sm:$0xff] }
 0x187   : > { %v1199_v49 = vsel %vm1178_vm5, %v1166_v54, %v4425_v47  ;;  %v1200_v58 = vsel %vm1178_vm5, %v1167_v25, %v4426_v33  ;;  %v4439_v7 = vpop.permute.xlu1 %4438  ;;  %v3891_v4 = vunpack.i.h.bf16 %v6779_v62 }
 0x188   : > { %v1221_v21 = vpack.c.bf16 %v1200_v58, %v1199_v49  ;;  %v4434_v20 = vpop.permute.xlu0 %4433  ;;  %v4441_v17 = vunpack.i.h.bf16 %v4439_v7  ;;  %v4440_v59 = vunpack.i.l.bf16 %v4439_v7 }
 0x189   : > { %v4436_v22 = vunpack.i.h.bf16 %v4434_v20  ;;  %v4435_v55 = vunpack.i.l.bf16 %v4434_v20  ;;  %v3885_v20 = vunpack.i.l.bf16 %v6776_v61  ;;  %v4643_v61 = vld [vmem:[%s4868_s5 + $0x128] sm:$0xff] }
 0x18a   : > { %3715 = vmatprep.mubr.msk.bf16.mxu0 %vm1239_vm6, %v1221_v21  ;;  %v2523_v8 = vsel %vm1046_vm1, %v4640_v38, %v4441_v17  ;;  %v2522_v18 = vsel %vm1046_vm1, %v4641_v1, %v4440_v59  ;;  %v4642_v17 = vld [vmem:[%s4868_s5 + $0x120] sm:$0xff] }
 0x18b   : > { %v1201_v9 = vsel %vm1178_vm5, %v1168_v0, %v4435_v55  ;;  %v1202_v19 = vsel %vm1178_vm5, %v1169_v13, %v4436_v22  ;;  %v4449_v53 = vpop.permute.xlu1 %4448  ;;  %v6777_v0 = vld [vmem:[#allocation22_spill] sm:$0xff]  ;;  %v1071_v59 = vsel %vm1046_vm1, %v4642_v17, %v3885_v20 }
 0x18c   : > { %v1222_v10 = vpack.c.bf16 %v1202_v19, %v1201_v9  ;;  %v4444_v42 = vpop.permute.xlu0 %4443  ;;  %v4451_v16 = vunpack.i.h.bf16 %v4449_v53  ;;  %v4450_v12 = vunpack.i.l.bf16 %v4449_v53  ;;  %v3966_v13 = vunpack.i.h.bf16 %v6777_v0 }
 0x18d   : > { %v4446_v36 = vunpack.i.h.bf16 %v4444_v42  ;;  %v4445_v44 = vunpack.i.l.bf16 %v4444_v42  ;;  %v3965_v9 = vunpack.i.l.bf16 %v6777_v0  ;;  %v3427_v0 = vld [vmem:[%s4868_s5 + $0x140] sm:$0xff] }
 0x18e   : > { %3716 = vmatmul.mubr.msk.bf16.gmra.mrb[20].mxu0 %vm1239_vm6, %v1222_v10  ;;  %v2554_v46 = vsel %vm1079_vm2, %v2522_v18, %v4450_v12  ;;  %v2555_v3 = vsel %vm1079_vm2, %v2523_v8, %v4451_v16  ;;  %v6778_v10 = vld [vmem:[#allocation31_spill] sm:$0xff]  ;;  %v1072_v16 = vsel %vm1046_vm1, %v4643_v61, %v3886_v6  ;;  %v6780_v12 = vld [vmem:[#allocation21_spill] sm:$0xff] }
 0x18f   : > { %v4459_v40 = vpop.permute.xlu1 %4458  ;;  %v2553_v35 = vsel %vm1079_vm2, %v2521_v56, %v4446_v36  ;;  %v2552_v60 = vsel %vm1079_vm2, %v2520_v31, %v4445_v44  ;;  %v4046_v42 = vunpack.i.h.bf16 %v6778_v10  ;;  %v3971_v36 = vunpack.i.h.bf16 %v6780_v12  ;;  %v6781_v56 = vld [vmem:[#allocation30_spill] sm:$0xff] }
 0x190   : > { %v4454_v29 = vpop.permute.xlu0 %4453  ;;  %v4461_v32 = vunpack.i.h.bf16 %v4459_v40  ;;  %v4460_v52 = vunpack.i.l.bf16 %v4459_v40  ;;  %v4045_v40 = vunpack.i.l.bf16 %v6778_v10  ;;  %v3970_v44 = vunpack.i.l.bf16 %v6780_v12  ;;  %v4646_v12 = vld [vmem:[%s4868_s5 + $0x158] sm:$0xff] }
 0x191   : > { %v4456_v41 = vunpack.i.h.bf16 %v4454_v29  ;;  %v4455_v26 = vunpack.i.l.bf16 %v4454_v29  ;;  %v3890_v29 = vunpack.i.l.bf16 %v6779_v62  ;;  %v4051_v31 = vunpack.i.h.bf16 %v6781_v56 }
 0x192   : > { %v2586_v33 = vsel %vm1112_vm3, %v2554_v46, %v4460_v52  ;;  %v2587_v47 = vsel %vm1112_vm3, %v2555_v3, %v4461_v32  ;;  %v1104_v52 = vsel %vm1079_vm2, %v1071_v59, %v3965_v9  ;;  %v4644_v46 = vld [vmem:[%s4868_s5 + $0x138] sm:$0xff] }
 0x193   : > { %v4469_v63 = vpop.permute.xlu1 %4468  ;;  %v2584_v39 = vsel %vm1112_vm3, %v2552_v60, %v4455_v26  ;;  %v2585_v54 = vsel %vm1112_vm3, %v2553_v35, %v4456_v41  ;;  %v4050_v41 = vunpack.i.l.bf16 %v6781_v56  ;;  %v1137_v6 = vsel %vm1112_vm3, %v1104_v52, %v4045_v40 }
 0x194   : > { %v4464_v15 = vpop.permute.xlu0 %4463  ;;  %v4471_v2 = vunpack.i.h.bf16 %v4469_v63  ;;  %v4470_v24 = vunpack.i.l.bf16 %v4469_v63  ;;  %v1105_v63 = vsel %vm1079_vm2, %v1072_v16, %v3966_v13  ;;  %v1073_v3 = vsel %vm1046_vm1, %v4644_v46, %v3890_v29 }
 0x195   : > { %v4466_v28 = vunpack.i.h.bf16 %v4464_v15  ;;  %v4465_v27 = vunpack.i.l.bf16 %v4464_v15  ;;  %v1138_v15 = vsel %vm1112_vm3, %v1105_v63, %v4046_v42 }
 0x196   : > { %v2618_v48 = vsel %vm1145_vm4, %v2586_v33, %v4470_v24  ;;  %v2619_v45 = vsel %vm1145_vm4, %v2587_v47, %v4471_v2  ;;  %v1106_v47 = vsel %vm1079_vm2, %v1073_v3, %v3970_v44  ;;  %v4647_v44 = vld [vmem:[%s4868_s5 + $0x150] sm:$0xff] }
 0x197   : > { %v4479_v37 = vpop.permute.xlu1 %4478  ;;  %v2616_v7 = vsel %vm1145_vm4, %v2584_v39, %v4465_v27  ;;  %v2617_v5 = vsel %vm1145_vm4, %v2585_v54, %v4466_v28  ;;  %v4645_v28 = vld [vmem:[%s4868_s5 + $0x140] sm:$0xff] }
 0x198   : > { %v4481_v25 = vunpack.i.h.bf16 %v4479_v37  ;;  %v4480_v34 = vunpack.i.l.bf16 %v4479_v37  ;;  %v4474_v30 = vpop.permute.xlu0 %4473  ;;  %v1074_v27 = vsel %vm1046_vm1, %v4645_v28, %v3891_v4 }
 0x199   : > { %v4476_v49 = vunpack.i.h.bf16 %v4474_v30  ;;  %v4475_v58 = vunpack.i.l.bf16 %v4474_v30  ;;  %v1107_v37 = vsel %vm1079_vm2, %v1074_v27, %v3971_v36 }
 0x19a   : > { %v2650_v50 = vsel %vm1178_vm5, %v2618_v48, %v4480_v34  ;;  %v2651_v21 = vsel %vm1178_vm5, %v2619_v45, %v4481_v25  ;;  %v1139_v25 = vsel %vm1112_vm3, %v1106_v47, %v4050_v41  ;;  %v1140_v34 = vsel %vm1112_vm3, %v1107_v37, %v4051_v31 }
 0x19b   : > { %v2671_v11 = vpack.c.bf16 %v2651_v21, %v2650_v50  ;;  %v2648_v23 = vsel %vm1178_vm5, %v2616_v7, %v4475_v58  ;;  %v2649_v22 = vsel %vm1178_vm5, %v2617_v5, %v4476_v49  ;;  %v4489_v55 = vpop.permute.xlu1 %4488 }
 0x19c   : > { %v2670_v19 = vpack.c.bf16 %v2649_v22, %v2648_v23  ;;  %v4484_v53 = vpop.permute.xlu0 %4483  ;;  %v4491_v1 = vunpack.i.h.bf16 %v4489_v55  ;;  %v4490_v18 = vunpack.i.l.bf16 %v4489_v55  ;;  %v3426_v55 = vld [vmem:[%s4868_s5 + $0x138] sm:$0xff] }
 0x19d   : > { %v4486_v57 = vunpack.i.h.bf16 %v4484_v53  ;;  %v4485_v43 = vunpack.i.l.bf16 %v4484_v53 }
 0x19e   : > { %3751 = vmatprep.mubr.msk.bf16.mxu1 %vm1239_vm6, %v2670_v19  ;;  %v1172_v45 = vsel %vm1145_vm4, %v1139_v25, %v4490_v18  ;;  %v1173_v49 = vsel %vm1145_vm4, %v1140_v34, %v4491_v1  ;;  %v6782_v19 = vld [vmem:[#allocation16_spill] sm:$0xff] }
 0x19f   : > { %3752 = vmatmul.mubr.msk.bf16.gmra.mrb[20].mxu1 %vm1239_vm6, %v2671_v11  ;;  %v4499_v32 = vpop.permute.xlu1 %4498  ;;  %v1170_v2 = vsel %vm1145_vm4, %v1137_v6, %v4485_v43  ;;  %v1171_v24 = vsel %vm1145_vm4, %v1138_v15, %v4486_v57  ;;  %v3896_v53 = vunpack.i.h.bf16 %v6782_v19 }
 0x1a0   : > { %v4494_v26 = vpop.permute.xlu0 %4493  ;;  %v4501_v11 = vunpack.i.h.bf16 %v4499_v32  ;;  %v4500_v23 = vunpack.i.l.bf16 %v4499_v32 }
 0x1a1   : > { %v4496_v38 = vunpack.i.h.bf16 %v4494_v26  ;;  %v4495_v8 = vunpack.i.l.bf16 %v4494_v26 }
 0x1a2   : > { %v2525_v43 = vsel %vm1046_vm1, %v3427_v0, %v4501_v11  ;;  %v2524_v17 = vsel %vm1046_vm1, %v3426_v55, %v4500_v23  ;;  %v6785_v11 = vld [vmem:[#allocation15_spill] sm:$0xff] }
 0x1a3   : > { %v1203_v35 = vsel %vm1178_vm5, %v1170_v2, %v4495_v8  ;;  %v1204_v60 = vsel %vm1178_vm5, %v1171_v24, %v4496_v38  ;;  %v4509_v33 = vpop.permute.xlu1 %4508  ;;  %v3901_v23 = vunpack.i.h.bf16 %v6785_v11 }
 0x1a4   : > { %v1223_v39 = vpack.c.bf16 %v1204_v60, %v1203_v35  ;;  %v4504_v54 = vpop.permute.xlu0 %4503  ;;  %v4511_v13 = vunpack.i.h.bf16 %v4509_v33  ;;  %v4510_v9 = vunpack.i.l.bf16 %v4509_v33 }
 0x1a5   : > { %v4506_v30 = vunpack.i.h.bf16 %v4504_v54  ;;  %v4505_v48 = vunpack.i.l.bf16 %v4504_v54  ;;  %v3895_v54 = vunpack.i.l.bf16 %v6782_v19  ;;  %v4649_v19 = vld [vmem:[%s4868_s5 + $0x158] sm:$0xff] }
 0x1a6   : > { %3719 = vmatprep.mubr.msk.bf16.mxu0 %vm1239_vm6, %v1223_v39  ;;  %v2527_v36 = vsel %vm1046_vm1, %v4646_v12, %v4511_v13  ;;  %v2526_v32 = vsel %vm1046_vm1, %v4647_v44, %v4510_v9  ;;  %v4648_v13 = vld [vmem:[%s4868_s5 + $0x150] sm:$0xff] }
 0x1a7   : > { %v1205_v58 = vsel %vm1178_vm5, %v1172_v45, %v4505_v48  ;;  %v1206_v7 = vsel %vm1178_vm5, %v1173_v49, %v4506_v30  ;;  %v4519_v5 = vpop.permute.xlu1 %4518  ;;  %v6783_v45 = vld [vmem:[#allocation24_spill] sm:$0xff]  ;;  %v1075_v9 = vsel %vm1046_vm1, %v4648_v13, %v3895_v54 }
 0x1a8   : > { %v1224_v50 = vpack.c.bf16 %v1206_v7, %v1205_v58  ;;  %v4514_v21 = vpop.permute.xlu0 %4513  ;;  %v4521_v10 = vunpack.i.h.bf16 %v4519_v5  ;;  %v4520_v42 = vunpack.i.l.bf16 %v4519_v5  ;;  %v3976_v49 = vunpack.i.h.bf16 %v6783_v45 }
 0x1a9   : > { %v4516_v40 = vunpack.i.h.bf16 %v4514_v21  ;;  %v4515_v62 = vunpack.i.l.bf16 %v4514_v21  ;;  %v3975_v58 = vunpack.i.l.bf16 %v6783_v45 }
 0x1aa   : > { %3720 = vmatmul.mubr.msk.bf16.gmra.mrb[24].mxu0 %vm1239_vm6, %v1224_v50  ;;  %v2558_v56 = vsel %vm1079_vm2, %v2526_v32, %v4520_v42  ;;  %v2559_v31 = vsel %vm1079_vm2, %v2527_v36, %v4521_v10  ;;  %v6784_v50 = vld [vmem:[#allocation33_spill] sm:$0xff]  ;;  %v1076_v10 = vsel %vm1046_vm1, %v4649_v19, %v3896_v53  ;;  %v6786_v42 = vld [vmem:[#allocation23_spill] sm:$0xff] }
 0x1ab   : > { %v4529_v20 = vpop.permute.xlu1 %4528  ;;  %v2557_v6 = vsel %vm1079_vm2, %v2525_v43, %v4516_v40  ;;  %v2556_v15 = vsel %vm1079_vm2, %v2524_v17, %v4515_v62  ;;  %v4056_v21 = vunpack.i.h.bf16 %v6784_v50  ;;  %v3981_v40 = vunpack.i.h.bf16 %v6786_v42  ;;  %v6787_v43 = vld [vmem:[#allocation32_spill] sm:$0xff] }
 0x1ac   : > { %v4524_v22 = vpop.permute.xlu0 %4523  ;;  %v4531_v4 = vunpack.i.h.bf16 %v4529_v20  ;;  %v4530_v29 = vunpack.i.l.bf16 %v4529_v20  ;;  %v4055_v20 = vunpack.i.l.bf16 %v6784_v50  ;;  %v3980_v62 = vunpack.i.l.bf16 %v6786_v42 }
 0x1ad   : > { %v4526_v59 = vunpack.i.h.bf16 %v4524_v22  ;;  %v4525_v61 = vunpack.i.l.bf16 %v4524_v22  ;;  %v3900_v22 = vunpack.i.l.bf16 %v6785_v11  ;;  %v4061_v17 = vunpack.i.h.bf16 %v6787_v43  ;;  %v4652_v11 = vld [vmem:[%s4868_s5 + $0x170] sm:$0xff] }
 0x1ae   : > { %v2590_v38 = vsel %vm1112_vm3, %v2558_v56, %v4530_v29  ;;  %v2591_v8 = vsel %vm1112_vm3, %v2559_v31, %v4531_v4  ;;  %v1108_v29 = vsel %vm1079_vm2, %v1075_v9, %v3975_v58  ;;  %v4650_v56 = vld [vmem:[%s4868_s5 + $0x168] sm:$0xff] }
 0x1af   : > { %v4539_v57 = vpop.permute.xlu1 %4538  ;;  %v2588_v18 = vsel %vm1112_vm3, %v2556_v15, %v4525_v61  ;;  %v2589_v2 = vsel %vm1112_vm3, %v2557_v6, %v4526_v59  ;;  %v4060_v59 = vunpack.i.l.bf16 %v6787_v43  ;;  %v1141_v53 = vsel %vm1112_vm3, %v1108_v29, %v4055_v20 }
 0x1b0   : > { %v4534_v16 = vpop.permute.xlu0 %4533  ;;  %v4541_v52 = vunpack.i.h.bf16 %v4539_v57  ;;  %v4540_v63 = vunpack.i.l.bf16 %v4539_v57  ;;  %v1109_v57 = vsel %vm1079_vm2, %v1076_v10, %v3976_v49  ;;  %v1077_v31 = vsel %vm1046_vm1, %v4650_v56, %v3900_v22  ;;  %v4653_v22 = vld [vmem:[%s4868_s5 + $0x168] sm:$0xff] }
 0x1b1   : > { %v4536_v41 = vunpack.i.h.bf16 %v4534_v16  ;;  %v4535_v26 = vunpack.i.l.bf16 %v4534_v16  ;;  %v1142_v16 = vsel %vm1112_vm3, %v1109_v57, %v4056_v21 }
 0x1b2   : > { %v2622_v28 = vsel %vm1145_vm4, %v2590_v38, %v4540_v63  ;;  %v2623_v27 = vsel %vm1145_vm4, %v2591_v8, %v4541_v52  ;;  %v1110_v8 = vsel %vm1079_vm2, %v1077_v31, %v3980_v62 }
 0x1b3   : > { %v4549_v1 = vpop.permute.xlu1 %4548  ;;  %v2620_v33 = vsel %vm1145_vm4, %v2588_v18, %v4535_v26  ;;  %v2621_v47 = vsel %vm1145_vm4, %v2589_v2, %v4536_v41  ;;  %v4651_v41 = vld [vmem:[%s4868_s5 + $0x170] sm:$0xff]  ;;  %s6295_s5 = scalar_lea.vmem [#allocation2], %s3286_s30 }
 0x1b4   : > { %v4551_v24 = vunpack.i.h.bf16 %v4549_v1  ;;  %v4550_v46 = vunpack.i.l.bf16 %v4549_v1  ;;  %v4544_v3 = vpop.permute.xlu0 %4543  ;;  %v1078_v26 = vsel %vm1046_vm1, %v4651_v41, %v3901_v23  ;;  %s3141_s9 = sshll.u32 %s6295_s5, 4  ;;  %s6565_s9 = int_to_ptr.vmem [resolvable:$true] %s3141_s9 }
 0x1b5   : > { %v4546_v35 = vunpack.i.h.bf16 %v4544_v3  ;;  %v4545_v60 = vunpack.i.l.bf16 %v4544_v3  ;;  %v1111_v1 = vsel %vm1079_vm2, %v1078_v26, %v3981_v40  ;;  %s4654_s14 = scalar_lea.vmem %s6565_s9, 8192  ;;  %p4661_p0 = scmp.lt.s32.totalorder %s6565_s9, %s4659_s23 }
 0x1b6   : > { %v2654_v37 = vsel %vm1178_vm5, %v2622_v28, %v4550_v46  ;;  %v2655_v39 = vsel %vm1178_vm5, %v2623_v27, %v4551_v24  ;;  %v1143_v24 = vsel %vm1112_vm3, %v1110_v8, %v4060_v59  ;;  %v1144_v46 = vsel %vm1112_vm3, %v1111_v1, %v4061_v17  ;;  %p4655_p11 = scmp.ne.s32.totalorder %s6565_s9, %s4654_s14  ;;  %p4662_p1 = scmp.lt.s32.totalorder %s4660_s27, %s4654_s14 }
 0x1b7   : > { %v2673_v25 = vpack.c.bf16 %v2655_v39, %v2654_v37  ;;  %v2652_v34 = vsel %vm1178_vm5, %v2620_v33, %v4545_v60  ;;  %v2653_v30 = vsel %vm1178_vm5, %v2621_v47, %v4546_v35  ;;  %v4559_v48 = vpop.permute.xlu1 %4558 }
 0x1b8   : > { %v2672_v7 = vpack.c.bf16 %v2653_v30, %v2652_v34  ;;  %v4554_v5 = vpop.permute.xlu0 %4553  ;;  %v4561_v44 = vunpack.i.h.bf16 %v4559_v48  ;;  %v4560_v32 = vunpack.i.l.bf16 %v4559_v48  ;;  %p4656_p12 = pnand %p4655_p11, %p4853_p5  ;;  %p4663_p2 = por %p4662_p1, %p4661_p0 }
 0x1b9   : > { %v4556_v55 = vunpack.i.h.bf16 %v4554_v5  ;;  %v4555_v0 = vunpack.i.l.bf16 %v4554_v5 }
 0x1ba   : > { %3755 = vmatprep.mubr.msk.bf16.mxu1 %vm1239_vm6, %v2672_v7  ;;  %v1176_v27 = vsel %vm1145_vm4, %v1143_v24, %v4560_v32  ;;  %v1177_v35 = vsel %vm1145_vm4, %v1144_v46, %v4561_v44  ;;  %p4657_p13 = pneg %p4656_p12 }
 0x1bb   : > { %3756 = vmatmul.mubr.msk.bf16.gmra.mrb[24].mxu1 %vm1239_vm6, %v2673_v25  ;;  %v4569_v4 = vpop.permute.xlu1 %4568  ;;  %v1174_v52 = vsel %vm1145_vm4, %v1141_v53, %v4555_v0  ;;  %v1175_v63 = vsel %vm1145_vm4, %v1142_v16, %v4556_v55 }
 0x1bc   : > { %v4564_v61 = vpop.permute.xlu0 %4563  ;;  %v4571_v25 = vunpack.i.h.bf16 %v4569_v4  ;;  %v4570_v34 = vunpack.i.l.bf16 %v4569_v4  ;;  %p4664_p3 = pnand %p4663_p2, %p4657_p13 }
 0x1bd   : > { %v4566_v12 = vunpack.i.h.bf16 %v4564_v61  ;;  %v4565_v36 = vunpack.i.l.bf16 %v4564_v61 }
 0x1be   : > { %v2529_v23 = vsel %vm1046_vm1, %v4652_v11, %v4571_v25  ;;  %v2528_v55 = vsel %vm1046_vm1, %v4653_v22, %v4570_v34 }
 0x1bf   : > { %v1207_v6 = vsel %vm1178_vm5, %v1174_v52, %v4565_v36  ;;  %v1208_v15 = vsel %vm1178_vm5, %v1175_v63, %v4566_v12  ;;  %v4579_v38 = vpop.permute.xlu1 %4578 }
 0x1c0   : > { %v1225_v18 = vpack.c.bf16 %v1208_v15, %v1207_v6  ;;  %v4574_v2 = vpop.permute.xlu0 %4573  ;;  %v4581_v48 = vunpack.i.h.bf16 %v4579_v38  ;;  %v4580_v45 = vunpack.i.l.bf16 %v4579_v38 }
 0x1c1   : > { %v4576_v3 = vunpack.i.h.bf16 %v4574_v2  ;;  %v4575_v28 = vunpack.i.l.bf16 %v4574_v2 }
 0x1c2   : > { %3723 = vmatprep.mubr.msk.bf16.mxu0 %vm1239_vm6, %v1225_v18  ;;  %v2531_v19 = vsel %vm1046_vm1, %v5906_v14, %v4581_v48  ;;  %v2530_v10 = vsel %vm1046_vm1, %v5903_v51, %v4580_v45 }
 0x1c3   : > { %v1209_v60 = vsel %vm1178_vm5, %v1176_v27, %v4575_v28  ;;  %v1210_v33 = vsel %vm1178_vm5, %v1177_v35, %v4576_v3  ;;  %v4589_v47 = vpop.permute.xlu1 %4588 }
 0x1c4   : > { %v1226_v37 = vpack.c.bf16 %v1210_v33, %v1209_v60  ;;  %v4584_v39 = vpop.permute.xlu0 %4583  ;;  %v4591_v49 = vunpack.i.h.bf16 %v4589_v47  ;;  %v4590_v58 = vunpack.i.l.bf16 %v4589_v47 }
 0x1c5   : > { %v4586_v7 = vunpack.i.h.bf16 %v4584_v39  ;;  %v4585_v5 = vunpack.i.l.bf16 %v4584_v39 }
 0x1c6   : > { %3724 = vmatmul.mubr.msk.bf16.gmra.mrb[28].mxu0 %vm1239_vm6, %v1226_v37  ;;  %v2562_v62 = vsel %vm1079_vm2, %v2530_v10, %v4590_v58  ;;  %v2563_v4 = vsel %vm1079_vm2, %v2531_v19, %v4591_v49 }
 0x1c7   : > { %v4599_v54 = vpop.permute.xlu1 %4598  ;;  %v2561_v43 = vsel %vm1079_vm2, %v2529_v23, %v4586_v7  ;;  %v2560_v17 = vsel %vm1079_vm2, %v2528_v55, %v4585_v5 }
 0x1c8   : > { %v4594_v30 = vpop.permute.xlu0 %4593  ;;  %v4601_v50 = vunpack.i.h.bf16 %v4599_v54  ;;  %v4600_v21 = vunpack.i.l.bf16 %v4599_v54 }
 0x1c9   : > { %v4596_v0 = vunpack.i.h.bf16 %v4594_v30  ;;  %v4595_v13 = vunpack.i.l.bf16 %v4594_v30 }
 0x1ca   : > { %v2594_v59 = vsel %vm1112_vm3, %v2562_v62, %v4600_v21  ;;  %v2595_v61 = vsel %vm1112_vm3, %v2563_v4, %v4601_v50 }
 0x1cb   : > { %v4609_v20 = vpop.permute.xlu1 %4608  ;;  %v2592_v53 = vsel %vm1112_vm3, %v2560_v17, %v4595_v13  ;;  %v2593_v51 = vsel %vm1112_vm3, %v2561_v43, %v4596_v0 }
 0x1cc   : > { %v4604_v9 = vpop.permute.xlu0 %4603  ;;  %v4611_v42 = vunpack.i.h.bf16 %v4609_v20  ;;  %v4610_v40 = vunpack.i.l.bf16 %v4609_v20 }
 0x1cd   : > { %v4606_v29 = vunpack.i.h.bf16 %v4604_v9  ;;  %v4605_v57 = vunpack.i.l.bf16 %v4604_v9 }
 0x1ce   : > { %v2626_v44 = vsel %vm1145_vm4, %v2594_v59, %v4610_v40  ;;  %v2627_v32 = vsel %vm1145_vm4, %v2595_v61, %v4611_v42 }
 0x1cf   : > { %v4619_v14 = vpop.permute.xlu1 %4618  ;;  %v2624_v56 = vsel %vm1145_vm4, %v2592_v53, %v4605_v57  ;;  %v2625_v31 = vsel %vm1145_vm4, %v2593_v51, %v4606_v29 }
 0x1d0   : > { %v4621_v16 = vunpack.i.h.bf16 %v4619_v14  ;;  %v4620_v12 = vunpack.i.l.bf16 %v4619_v14  ;;  %v4614_v36 = vpop.permute.xlu0 %4613 }
 0x1d1   : > { %v4616_v52 = vunpack.i.h.bf16 %v4614_v36  ;;  %v4615_v63 = vunpack.i.l.bf16 %v4614_v36 }
 0x1d2   : > { %v2658_v41 = vsel %vm1178_vm5, %v2626_v44, %v4620_v12  ;;  %v2659_v26 = vsel %vm1178_vm5, %v2627_v32, %v4621_v16 }
 0x1d3   : > { %v2675_v6 = vpack.c.bf16 %v2659_v26, %v2658_v41  ;;  %v2656_v15 = vsel %vm1178_vm5, %v2624_v56, %v4615_v63  ;;  %v2657_v38 = vsel %vm1178_vm5, %v2625_v31, %v4616_v52 }
 0x1d4   : > { %v2674_v8 = vpack.c.bf16 %v2657_v38, %v2656_v15 }
 0x1d6   : > { %3759 = vmatprep.mubr.msk.bf16.mxu1 %vm1239_vm6, %v2674_v8 }
 0x1d7   : > { %3760 = vmatmul.mubr.msk.bf16.gmra.mrb[28].mxu1 %vm1239_vm6, %v2675_v6 }
 0x1e5   : > { %v3697_v1 = vpop.f32.mrb[0].mxu0 }
 0x1e6   : > { %1455 = vst.msk [vmem:[%s6295_s5 + $0x20] sm:$0xff] %vm1145_vm4, %v3697_v1  ;;  %v1326_v18 = vpop.f32.mrb[1].mxu0  ;;  %v1556_v3 = vmul.f32 %v3697_v1, %v3697_v1  ;;  %v1488_v33 = vsel %vm1145_vm4, %v3697_v1, 0.0 }
 0x1e7   : > { %1453 = vst.msk [vmem:[%s6295_s5] sm:$0xff] %vm1145_vm4, %v1326_v18  ;;  %v1554_v2 = vmul.f32 %v1326_v18, %v1326_v18  ;;  %v3698_v24 = vpop.f32.mrb[2].mxu0  ;;  %v1485_v28 = vsel %vm1145_vm4, %v1326_v18, 0.0 }
 0x1e8   : > { %1456 = vst.msk [vmem:[%s6295_s5 + $0x28] sm:$0xff] %vm1145_vm4, %v3698_v24  ;;  %v1329_v46 = vpop.f32.mrb[3].mxu0  ;;  %v1557_v37 = vmul.f32 %v3698_v24, %v3698_v24  ;;  %v1589_v34 = vsel %vm1145_vm4, %v1556_v3, 0.0  ;;  %v1490_v30 = vsel %vm1145_vm4, %v3698_v24, 0.0 }
 0x1e9   : > { %1454 = vst.msk [vmem:[%s6295_s5 + $0x8] sm:$0xff] %vm1145_vm4, %v1329_v46  ;;  %v1486_v27 = vsel %vm1145_vm4, %v1329_v46, 0.0  ;;  %v1555_v35 = vmul.f32 %v1329_v46, %v1329_v46  ;;  %v1586_v47 = vsel %vm1145_vm4, %v1554_v2, 0.0 }
 0x1ea   : > { %v1487_v60 = vadd.f32 %v1486_v27, %v1485_v28  ;;  %v1591_v49 = vsel %vm1145_vm4, %v1557_v37, 0.0 }
 0x1eb   : > { %v1587_v39 = vsel %vm1145_vm4, %v1555_v35, 0.0 }
 0x1ec   : > { %v1489_v54 = vadd.f32 %v1488_v33, %v1487_v60  ;;  %v1588_v25 = vadd.f32 %v1587_v39, %v1586_v47 }
 0x1ee   : > { %v1590_v48 = vadd.f32 %v1589_v34, %v1588_v25  ;;  %v1491_v45 = vadd.f32 %v1490_v30, %v1489_v54 }
 0x1f0   : > { %v1592_v58 = vadd.f32 %v1591_v49, %v1590_v48 }
 0x1f6   : > { %v3733_v7 = vpop.f32.mrb[0].mxu1 }
 0x1f7   : > { %3617 = vst.msk [vmem:[%s6295_s5 + $0x30] sm:$0xff] %vm1145_vm4, %v3733_v7  ;;  %v2774_v5 = vpop.f32.mrb[1].mxu1  ;;  %v3005_v11 = vmul.f32 %v3733_v7, %v3733_v7  ;;  %v2937_v13 = vsel %vm1145_vm4, %v3733_v7, 0.0 }
 0x1f8   : > { %3615 = vst.msk [vmem:[%s6295_s5 + $0x10] sm:$0xff] %vm1145_vm4, %v2774_v5  ;;  %v3003_v50 = vmul.f32 %v2774_v5, %v2774_v5  ;;  %v3734_v21 = vpop.f32.mrb[2].mxu1  ;;  %v2934_v23 = vsel %vm1145_vm4, %v2774_v5, 0.0 }
 0x1f9   : > { %3618 = vst.msk [vmem:[%s6295_s5 + $0x38] sm:$0xff] %vm1145_vm4, %v3734_v21  ;;  %v2777_v20 = vpop.f32.mrb[3].mxu1  ;;  %v3006_v19 = vmul.f32 %v3734_v21, %v3734_v21  ;;  %v3038_v4 = vsel %vm1145_vm4, %v3005_v11, 0.0  ;;  %v2939_v29 = vsel %vm1145_vm4, %v3734_v21, 0.0 }
 0x1fa   : > { %3616 = vst.msk [vmem:[%s6295_s5 + $0x18] sm:$0xff] %vm1145_vm4, %v2777_v20  ;;  %v2935_v22 = vsel %vm1145_vm4, %v2777_v20, 0.0  ;;  %v3004_v55 = vmul.f32 %v2777_v20, %v2777_v20  ;;  %v3035_v9 = vsel %vm1145_vm4, %v3003_v50, 0.0 }
 0x1fb   : > { %v2936_v0 = vadd.f32 %v2935_v22, %v2934_v23  ;;  %v3040_v53 = vsel %vm1145_vm4, %v3006_v19, 0.0 }
 0x1fc   : > { %v3036_v10 = vsel %vm1145_vm4, %v3004_v55, 0.0 }
 0x1fd   : > { %v2938_v42 = vadd.f32 %v2937_v13, %v2936_v0  ;;  %v3037_v40 = vadd.f32 %v3036_v10, %v3035_v9  ;;  %v3701_v62 = vpop.f32.mrb[4].mxu0 }
 0x1fe   : > { %1459 = vst.msk [vmem:[%s6295_s5 + $0x60] sm:$0xff] %vm1145_vm4, %v3701_v62  ;;  %v1342_v57 = vpop.f32.mrb[5].mxu0  ;;  %v1560_v51 = vmul.f32 %v3701_v62, %v3701_v62  ;;  %v1496_v31 = vsel %vm1145_vm4, %v3701_v62, 0.0 }
 0x1ff   : > { %v3039_v43 = vadd.f32 %v3038_v4, %v3037_v40  ;;  %1457 = vst.msk [vmem:[%s6295_s5 + $0x40] sm:$0xff] %vm1145_vm4, %v1342_v57  ;;  %v1492_v17 = vsel %vm1145_vm4, %v1342_v57, 0.0  ;;  %v1558_v59 = vmul.f32 %v1342_v57, %v1342_v57  ;;  %v3702_v61 = vpop.f32.mrb[6].mxu0  ;;  %v2940_v14 = vadd.f32 %v2939_v29, %v2938_v42 }
 0x200   : > { %v1493_v16 = vadd.f32 %v1492_v17, %v1491_v45  ;;  %1460 = vst.msk [vmem:[%s6295_s5 + $0x68] sm:$0xff] %vm1145_vm4, %v3702_v61  ;;  %v1345_v12 = vpop.f32.mrb[7].mxu0  ;;  %v1561_v41 = vmul.f32 %v3702_v61, %v3702_v61  ;;  %v1597_v38 = vsel %vm1145_vm4, %v1560_v51, 0.0  ;;  %v1498_v8 = vsel %vm1145_vm4, %v3702_v61, 0.0 }
 0x201   : > { %v1593_v36 = vsel %vm1145_vm4, %v1558_v59, 0.0  ;;  %1458 = vst.msk [vmem:[%s6295_s5 + $0x48] sm:$0xff] %vm1145_vm4, %v1345_v12  ;;  %v1494_v44 = vsel %vm1145_vm4, %v1345_v12, 0.0  ;;  %v1559_v32 = vmul.f32 %v1345_v12, %v1345_v12  ;;  %v3041_v52 = vadd.f32 %v3040_v53, %v3039_v43 }
 0x202   : > { %v1594_v63 = vadd.f32 %v1593_v36, %v1592_v58  ;;  %v1495_v56 = vadd.f32 %v1494_v44, %v1493_v16  ;;  %v1599_v2 = vsel %vm1145_vm4, %v1561_v41, 0.0 }
 0x203   : > { %v1595_v26 = vsel %vm1145_vm4, %v1559_v32, 0.0 }
 0x204   : > { %v1497_v6 = vadd.f32 %v1496_v31, %v1495_v56  ;;  %v1596_v15 = vadd.f32 %v1595_v26, %v1594_v63 }
 0x206   : > { %v1598_v1 = vadd.f32 %v1597_v38, %v1596_v15  ;;  %v1499_v18 = vadd.f32 %v1498_v8, %v1497_v6 }
 0x208   : > { %v1600_v24 = vadd.f32 %v1599_v2, %v1598_v1 }
 0x20e   : > { %v3737_v46 = vpop.f32.mrb[4].mxu1 }
 0x20f   : > { %3621 = vst.msk [vmem:[%s6295_s5 + $0x70] sm:$0xff] %vm1145_vm4, %v3737_v46  ;;  %v2790_v3 = vpop.f32.mrb[5].mxu1  ;;  %v3009_v47 = vmul.f32 %v3737_v46, %v3737_v46  ;;  %v2945_v30 = vsel %vm1145_vm4, %v3737_v46, 0.0 }
 0x210   : > { %3619 = vst.msk [vmem:[%s6295_s5 + $0x50] sm:$0xff] %vm1145_vm4, %v2790_v3  ;;  %v2941_v28 = vsel %vm1145_vm4, %v2790_v3, 0.0  ;;  %v3007_v27 = vmul.f32 %v2790_v3, %v2790_v3  ;;  %v3738_v35 = vpop.f32.mrb[6].mxu1 }
 0x211   : > { %v2942_v60 = vadd.f32 %v2941_v28, %v2940_v14  ;;  %3622 = vst.msk [vmem:[%s6295_s5 + $0x78] sm:$0xff] %vm1145_vm4, %v3738_v35  ;;  %v2793_v33 = vpop.f32.mrb[7].mxu1  ;;  %v3010_v48 = vmul.f32 %v3738_v35, %v3738_v35  ;;  %v3046_v5 = vsel %vm1145_vm4, %v3009_v47, 0.0  ;;  %v2947_v50 = vsel %vm1145_vm4, %v3738_v35, 0.0 }
 0x212   : > { %v3042_v37 = vsel %vm1145_vm4, %v3007_v27, 0.0  ;;  %3620 = vst.msk [vmem:[%s6295_s5 + $0x58] sm:$0xff] %vm1145_vm4, %v2793_v33  ;;  %v2943_v39 = vsel %vm1145_vm4, %v2793_v33, 0.0  ;;  %v3008_v54 = vmul.f32 %v2793_v33, %v2793_v33 }
 0x213   : > { %v3043_v25 = vadd.f32 %v3042_v37, %v3041_v52  ;;  %v2944_v34 = vadd.f32 %v2943_v39, %v2942_v60  ;;  %v3048_v0 = vsel %vm1145_vm4, %v3010_v48, 0.0 }
 0x214   : > { %v3044_v45 = vsel %vm1145_vm4, %v3008_v54, 0.0 }
 0x215   : > { %v2946_v49 = vadd.f32 %v2945_v30, %v2944_v34  ;;  %v3045_v58 = vadd.f32 %v3044_v45, %v3043_v25  ;;  %v3705_v7 = vpop.f32.mrb[8].mxu0 }
 0x216   : > { %1463 = vst.msk [vmem:[%s6295_s5 + $0xa0] sm:$0xff] %vm1145_vm4, %v3705_v7  ;;  %v1358_v21 = vpop.f32.mrb[9].mxu0  ;;  %v1564_v13 = vmul.f32 %v3705_v7, %v3705_v7  ;;  %v1504_v57 = vsel %vm1145_vm4, %v3705_v7, 0.0 }
 0x217   : > { %v3047_v20 = vadd.f32 %v3046_v5, %v3045_v58  ;;  %1461 = vst.msk [vmem:[%s6295_s5 + $0x80] sm:$0xff] %vm1145_vm4, %v1358_v21  ;;  %v1500_v11 = vsel %vm1145_vm4, %v1358_v21, 0.0  ;;  %v1562_v23 = vmul.f32 %v1358_v21, %v1358_v21  ;;  %v3706_v22 = vpop.f32.mrb[10].mxu0  ;;  %v2948_v55 = vadd.f32 %v2947_v50, %v2946_v49 }
 0x218   : > { %v1501_v9 = vadd.f32 %v1500_v11, %v1499_v18  ;;  %1464 = vst.msk [vmem:[%s6295_s5 + $0xa8] sm:$0xff] %vm1145_vm4, %v3706_v22  ;;  %v1361_v19 = vpop.f32.mrb[11].mxu0  ;;  %v1565_v43 = vmul.f32 %v3706_v22, %v3706_v22  ;;  %v1605_v14 = vsel %vm1145_vm4, %v1564_v13, 0.0  ;;  %v1506_v53 = vsel %vm1145_vm4, %v3706_v22, 0.0 }
 0x219   : > { %v1601_v10 = vsel %vm1145_vm4, %v1562_v23, 0.0  ;;  %1462 = vst.msk [vmem:[%s6295_s5 + $0x88] sm:$0xff] %vm1145_vm4, %v1361_v19  ;;  %v1502_v42 = vsel %vm1145_vm4, %v1361_v19, 0.0  ;;  %v1563_v40 = vmul.f32 %v1361_v19, %v1361_v19  ;;  %v3049_v62 = vadd.f32 %v3048_v0, %v3047_v20 }
 0x21a   : > { %v1602_v4 = vadd.f32 %v1601_v10, %v1600_v24  ;;  %v1503_v29 = vadd.f32 %v1502_v42, %v1501_v9  ;;  %v1607_v12 = vsel %vm1145_vm4, %v1565_v43, 0.0 }
 0x21b   : > { %v1603_v17 = vsel %vm1145_vm4, %v1563_v40, 0.0 }
 0x21c   : > { %v1505_v59 = vadd.f32 %v1504_v57, %v1503_v29  ;;  %v1604_v61 = vadd.f32 %v1603_v17, %v1602_v4 }
 0x21e   : > { %v1606_v51 = vadd.f32 %v1605_v14, %v1604_v61  ;;  %v1507_v16 = vadd.f32 %v1506_v53, %v1505_v59 }
 0x220   : > { %v1608_v36 = vadd.f32 %v1607_v12, %v1606_v51 }
 0x226   : > { %v3741_v44 = vpop.f32.mrb[8].mxu1 }
 0x227   : > { %3625 = vst.msk [vmem:[%s6295_s5 + $0xb0] sm:$0xff] %vm1145_vm4, %v3741_v44  ;;  %v2806_v32 = vpop.f32.mrb[9].mxu1  ;;  %v3013_v26 = vmul.f32 %v3741_v44, %v3741_v44  ;;  %v2953_v18 = vsel %vm1145_vm4, %v3741_v44, 0.0 }
 0x228   : > { %3623 = vst.msk [vmem:[%s6295_s5 + $0x90] sm:$0xff] %vm1145_vm4, %v2806_v32  ;;  %v2949_v52 = vsel %vm1145_vm4, %v2806_v32, 0.0  ;;  %v3011_v63 = vmul.f32 %v2806_v32, %v2806_v32  ;;  %v3742_v56 = vpop.f32.mrb[10].mxu1 }
 0x229   : > { %v2950_v31 = vadd.f32 %v2949_v52, %v2948_v55  ;;  %3626 = vst.msk [vmem:[%s6295_s5 + $0xb8] sm:$0xff] %vm1145_vm4, %v3742_v56  ;;  %v2809_v41 = vpop.f32.mrb[11].mxu1  ;;  %v3014_v2 = vmul.f32 %v3742_v56, %v3742_v56  ;;  %v3054_v27 = vsel %vm1145_vm4, %v3013_v26, 0.0  ;;  %v2955_v35 = vsel %vm1145_vm4, %v3742_v56, 0.0 }
 0x22a   : > { %v3050_v6 = vsel %vm1145_vm4, %v3011_v63, 0.0  ;;  %3624 = vst.msk [vmem:[%s6295_s5 + $0x98] sm:$0xff] %vm1145_vm4, %v2809_v41  ;;  %v2951_v15 = vsel %vm1145_vm4, %v2809_v41, 0.0  ;;  %v3012_v38 = vmul.f32 %v2809_v41, %v2809_v41 }
 0x22b   : > { %v3051_v8 = vadd.f32 %v3050_v6, %v3049_v62  ;;  %v2952_v1 = vadd.f32 %v2951_v15, %v2950_v31  ;;  %v3056_v25 = vsel %vm1145_vm4, %v3014_v2, 0.0 }
 0x22c   : > { %v3052_v24 = vsel %vm1145_vm4, %v3012_v38, 0.0 }
 0x22d   : > { %v2954_v46 = vadd.f32 %v2953_v18, %v2952_v1  ;;  %v3053_v3 = vadd.f32 %v3052_v24, %v3051_v8  ;;  %v3709_v28 = vpop.f32.mrb[12].mxu0 }
 0x22e   : > { %1467 = vst.msk [vmem:[%s6295_s5 + $0xe0] sm:$0xff] %vm1145_vm4, %v3709_v28  ;;  %v1374_v60 = vpop.f32.mrb[13].mxu0  ;;  %v1568_v34 = vmul.f32 %v3709_v28, %v3709_v28  ;;  %v1512_v21 = vsel %vm1145_vm4, %v3709_v28, 0.0 }
 0x22f   : > { %v3055_v33 = vadd.f32 %v3054_v27, %v3053_v3  ;;  %1465 = vst.msk [vmem:[%s6295_s5 + $0xc0] sm:$0xff] %vm1145_vm4, %v1374_v60  ;;  %v1508_v47 = vsel %vm1145_vm4, %v1374_v60, 0.0  ;;  %v1566_v37 = vmul.f32 %v1374_v60, %v1374_v60  ;;  %v3710_v39 = vpop.f32.mrb[14].mxu0  ;;  %v2956_v54 = vadd.f32 %v2955_v35, %v2954_v46 }
 0x230   : > { %v1509_v30 = vadd.f32 %v1508_v47, %v1507_v16  ;;  %1468 = vst.msk [vmem:[%s6295_s5 + $0xe8] sm:$0xff] %vm1145_vm4, %v3710_v39  ;;  %v1377_v48 = vpop.f32.mrb[15].mxu0  ;;  %v1569_v20 = vmul.f32 %v3710_v39, %v3710_v39  ;;  %v1613_v55 = vsel %vm1145_vm4, %v1568_v34, 0.0  ;;  %v1514_v0 = vsel %vm1145_vm4, %v3710_v39, 0.0 }
 0x231   : > { %v1609_v45 = vsel %vm1145_vm4, %v1566_v37, 0.0  ;;  %1466 = vst.msk [vmem:[%s6295_s5 + $0xc8] sm:$0xff] %vm1145_vm4, %v1377_v48  ;;  %v1510_v49 = vsel %vm1145_vm4, %v1377_v48, 0.0  ;;  %v1567_v58 = vmul.f32 %v1377_v48, %v1377_v48  ;;  %v3057_v7 = vadd.f32 %v3056_v25, %v3055_v33 }
 0x232   : > { %v1610_v5 = vadd.f32 %v1609_v45, %v1608_v36  ;;  %v1511_v50 = vadd.f32 %v1510_v49, %v1509_v30  ;;  %v1615_v19 = vsel %vm1145_vm4, %v1569_v20, 0.0 }
 0x233   : > { %v1611_v11 = vsel %vm1145_vm4, %v1567_v58, 0.0 }
 0x234   : > { %v1513_v23 = vadd.f32 %v1512_v21, %v1511_v50  ;;  %v1612_v22 = vadd.f32 %v1611_v11, %v1610_v5 }
 0x236   : > { %v1614_v13 = vadd.f32 %v1613_v55, %v1612_v22  ;;  %v1515_v9 = vadd.f32 %v1514_v0, %v1513_v23 }
 0x238   : > { %v1616_v10 = vadd.f32 %v1615_v19, %v1614_v13 }
 0x23e   : > { %v3745_v42 = vpop.f32.mrb[12].mxu1 }
 0x23f   : > { %3629 = vst.msk [vmem:[%s6295_s5 + $0xf0] sm:$0xff] %vm1145_vm4, %v3745_v42  ;;  %v2822_v40 = vpop.f32.mrb[13].mxu1  ;;  %v3017_v17 = vmul.f32 %v3745_v42, %v3745_v42  ;;  %v2961_v16 = vsel %vm1145_vm4, %v3745_v42, 0.0 }
 0x240   : > { %3627 = vst.msk [vmem:[%s6295_s5 + $0xd0] sm:$0xff] %vm1145_vm4, %v2822_v40  ;;  %v2957_v62 = vsel %vm1145_vm4, %v2822_v40, 0.0  ;;  %v3015_v4 = vmul.f32 %v2822_v40, %v2822_v40  ;;  %v3746_v29 = vpop.f32.mrb[14].mxu1 }
 0x241   : > { %v2958_v57 = vadd.f32 %v2957_v62, %v2956_v54  ;;  %3630 = vst.msk [vmem:[%s6295_s5 + $0xf8] sm:$0xff] %vm1145_vm4, %v3746_v29  ;;  %v2825_v43 = vpop.f32.mrb[15].mxu1  ;;  %v3018_v12 = vmul.f32 %v3746_v29, %v3746_v29  ;;  %v3062_v63 = vsel %vm1145_vm4, %v3017_v17, 0.0  ;;  %v2963_v56 = vsel %vm1145_vm4, %v3746_v29, 0.0 }
 0x242   : > { %v3058_v59 = vsel %vm1145_vm4, %v3015_v4, 0.0  ;;  %3628 = vst.msk [vmem:[%s6295_s5 + $0xd8] sm:$0xff] %vm1145_vm4, %v2825_v43  ;;  %v2959_v61 = vsel %vm1145_vm4, %v2825_v43, 0.0  ;;  %v3016_v14 = vmul.f32 %v2825_v43, %v2825_v43 }
 0x243   : > { %v3059_v53 = vadd.f32 %v3058_v59, %v3057_v7  ;;  %v2960_v51 = vadd.f32 %v2959_v61, %v2958_v57  ;;  %v3064_v8 = vsel %vm1145_vm4, %v3018_v12, 0.0 }
 0x244   : > { %v3060_v36 = vsel %vm1145_vm4, %v3016_v14, 0.0 }
 0x245   : > { %v2962_v44 = vadd.f32 %v2961_v16, %v2960_v51  ;;  %v3061_v32 = vadd.f32 %v3060_v36, %v3059_v53  ;;  %v3713_v52 = vpop.f32.mrb[16].mxu0 }
 0x246   : > { %1471 = vst.msk [vmem:[%s6295_s5 + $0x120] sm:$0xff] %vm1145_vm4, %v3713_v52  ;;  %v1390_v31 = vpop.f32.mrb[17].mxu0  ;;  %v1572_v1 = vmul.f32 %v3713_v52, %v3713_v52  ;;  %v1520_v60 = vsel %vm1145_vm4, %v3713_v52, 0.0 }
 0x247   : > { %v3063_v41 = vadd.f32 %v3062_v63, %v3061_v32  ;;  %1469 = vst.msk [vmem:[%s6295_s5 + $0x100] sm:$0xff] %vm1145_vm4, %v1390_v31  ;;  %v1516_v26 = vsel %vm1145_vm4, %v1390_v31, 0.0  ;;  %v1570_v6 = vmul.f32 %v1390_v31, %v1390_v31  ;;  %v3714_v15 = vpop.f32.mrb[18].mxu0  ;;  %v2964_v38 = vadd.f32 %v2963_v56, %v2962_v44 }
 0x248   : > { %v1517_v18 = vadd.f32 %v1516_v26, %v1515_v9  ;;  %1472 = vst.msk [vmem:[%s6295_s5 + $0x128] sm:$0xff] %vm1145_vm4, %v3714_v15  ;;  %v1393_v2 = vpop.f32.mrb[19].mxu0  ;;  %v1573_v33 = vmul.f32 %v3714_v15, %v3714_v15  ;;  %v1621_v54 = vsel %vm1145_vm4, %v1572_v1, 0.0  ;;  %v1522_v25 = vsel %vm1145_vm4, %v3714_v15, 0.0 }
 0x249   : > { %v1617_v24 = vsel %vm1145_vm4, %v1570_v6, 0.0  ;;  %1470 = vst.msk [vmem:[%s6295_s5 + $0x108] sm:$0xff] %vm1145_vm4, %v1393_v2  ;;  %v1518_v46 = vsel %vm1145_vm4, %v1393_v2, 0.0  ;;  %v1571_v3 = vmul.f32 %v1393_v2, %v1393_v2  ;;  %v3065_v28 = vadd.f32 %v3064_v8, %v3063_v41 }
 0x24a   : > { %v1618_v27 = vadd.f32 %v1617_v24, %v1616_v10  ;;  %v1519_v35 = vadd.f32 %v1518_v46, %v1517_v18  ;;  %v1623_v48 = vsel %vm1145_vm4, %v1573_v33, 0.0 }
 0x24b   : > { %v1619_v47 = vsel %vm1145_vm4, %v1571_v3, 0.0 }
 0x24c   : > { %v1521_v37 = vadd.f32 %v1520_v60, %v1519_v35  ;;  %v1620_v39 = vadd.f32 %v1619_v47, %v1618_v27 }
 0x24e   : > { %v1622_v34 = vadd.f32 %v1621_v54, %v1620_v39  ;;  %v1523_v30 = vadd.f32 %v1522_v25, %v1521_v37 }
 0x250   : > { %v1624_v45 = vadd.f32 %v1623_v48, %v1622_v34 }
 0x256   : > { %v3749_v49 = vpop.f32.mrb[16].mxu1 }
 0x257   : > { %3633 = vst.msk [vmem:[%s6295_s5 + $0x130] sm:$0xff] %vm1145_vm4, %v3749_v49  ;;  %v2838_v58 = vpop.f32.mrb[17].mxu1  ;;  %v3021_v11 = vmul.f32 %v3749_v49, %v3749_v49  ;;  %v2969_v9 = vsel %vm1145_vm4, %v3749_v49, 0.0 }
 0x258   : > { %3631 = vst.msk [vmem:[%s6295_s5 + $0x110] sm:$0xff] %vm1145_vm4, %v2838_v58  ;;  %v2965_v7 = vsel %vm1145_vm4, %v2838_v58, 0.0  ;;  %v3019_v5 = vmul.f32 %v2838_v58, %v2838_v58  ;;  %v3750_v50 = vpop.f32.mrb[18].mxu1 }
 0x259   : > { %v2966_v21 = vadd.f32 %v2965_v7, %v2964_v38  ;;  %3634 = vst.msk [vmem:[%s6295_s5 + $0x138] sm:$0xff] %vm1145_vm4, %v3750_v50  ;;  %v2841_v20 = vpop.f32.mrb[19].mxu1  ;;  %v3022_v19 = vmul.f32 %v3750_v50, %v3750_v50  ;;  %v3070_v62 = vsel %vm1145_vm4, %v3021_v11, 0.0  ;;  %v2971_v4 = vsel %vm1145_vm4, %v3750_v50, 0.0 }
 0x25a   : > { %v3066_v23 = vsel %vm1145_vm4, %v3019_v5, 0.0  ;;  %3632 = vst.msk [vmem:[%s6295_s5 + $0x118] sm:$0xff] %vm1145_vm4, %v2841_v20  ;;  %v2967_v22 = vsel %vm1145_vm4, %v2841_v20, 0.0  ;;  %v3020_v55 = vmul.f32 %v2841_v20, %v2841_v20 }
 0x25b   : > { %v3067_v0 = vadd.f32 %v3066_v23, %v3065_v28  ;;  %v2968_v13 = vadd.f32 %v2967_v22, %v2966_v21  ;;  %v3072_v43 = vsel %vm1145_vm4, %v3022_v19, 0.0 }
 0x25c   : > { %v3068_v10 = vsel %vm1145_vm4, %v3020_v55, 0.0 }
 0x25d   : > { %v2970_v42 = vadd.f32 %v2969_v9, %v2968_v13  ;;  %v3069_v40 = vadd.f32 %v3068_v10, %v3067_v0 }
 0x25f   : > { %v3071_v29 = vadd.f32 %v3070_v62, %v3069_v40  ;;  %v2972_v57 = vadd.f32 %v2971_v4, %v2970_v42 }
 0x261   : > { %v3717_v17 = vpop.f32.mrb[20].mxu0  ;;  %v3073_v59 = vadd.f32 %v3072_v43, %v3071_v29 }
 0x262   : > { %1475 = vst.msk [vmem:[%s6295_s5 + $0x160] sm:$0xff] %vm1145_vm4, %v3717_v17  ;;  %v1406_v61 = vpop.f32.mrb[21].mxu0  ;;  %v1576_v36 = vmul.f32 %v3717_v17, %v3717_v17  ;;  %v1528_v31 = vsel %vm1145_vm4, %v3717_v17, 0.0 }
 0x263   : > { %1473 = vst.msk [vmem:[%s6295_s5 + $0x140] sm:$0xff] %vm1145_vm4, %v1406_v61  ;;  %v1524_v14 = vsel %vm1145_vm4, %v1406_v61, 0.0  ;;  %v1574_v53 = vmul.f32 %v1406_v61, %v1406_v61  ;;  %v3718_v51 = vpop.f32.mrb[22].mxu0 }
 0x264   : > { %v1525_v16 = vadd.f32 %v1524_v14, %v1523_v30  ;;  %1476 = vst.msk [vmem:[%s6295_s5 + $0x168] sm:$0xff] %vm1145_vm4, %v3718_v51  ;;  %v1409_v12 = vpop.f32.mrb[23].mxu0  ;;  %v1577_v41 = vmul.f32 %v3718_v51, %v3718_v51  ;;  %v1629_v38 = vsel %vm1145_vm4, %v1576_v36, 0.0  ;;  %v1530_v8 = vsel %vm1145_vm4, %v3718_v51, 0.0 }
 0x265   : > { %v1625_v44 = vsel %vm1145_vm4, %v1574_v53, 0.0  ;;  %1474 = vst.msk [vmem:[%s6295_s5 + $0x148] sm:$0xff] %vm1145_vm4, %v1409_v12  ;;  %v1526_v32 = vsel %vm1145_vm4, %v1409_v12, 0.0  ;;  %v1575_v52 = vmul.f32 %v1409_v12, %v1409_v12 }
 0x266   : > { %v1626_v63 = vadd.f32 %v1625_v44, %v1624_v45  ;;  %v1527_v56 = vadd.f32 %v1526_v32, %v1525_v16  ;;  %v1631_v2 = vsel %vm1145_vm4, %v1577_v41, 0.0 }
 0x267   : > { %v1627_v26 = vsel %vm1145_vm4, %v1575_v52, 0.0 }
 0x268   : > { %v1529_v6 = vadd.f32 %v1528_v31, %v1527_v56  ;;  %v1628_v15 = vadd.f32 %v1627_v26, %v1626_v63 }
 0x26a   : > { %v1630_v1 = vadd.f32 %v1629_v38, %v1628_v15  ;;  %v1531_v18 = vadd.f32 %v1530_v8, %v1529_v6 }
 0x26c   : > { %v1632_v24 = vadd.f32 %v1631_v2, %v1630_v1 }
 0x272   : > { %v3753_v46 = vpop.f32.mrb[20].mxu1 }
 0x273   : > { %3637 = vst.msk [vmem:[%s6295_s5 + $0x170] sm:$0xff] %vm1145_vm4, %v3753_v46  ;;  %v2854_v3 = vpop.f32.mrb[21].mxu1  ;;  %v3025_v47 = vmul.f32 %v3753_v46, %v3753_v46  ;;  %v2977_v30 = vsel %vm1145_vm4, %v3753_v46, 0.0 }
 0x274   : > { %3635 = vst.msk [vmem:[%s6295_s5 + $0x150] sm:$0xff] %vm1145_vm4, %v2854_v3  ;;  %v2973_v28 = vsel %vm1145_vm4, %v2854_v3, 0.0  ;;  %v3023_v27 = vmul.f32 %v2854_v3, %v2854_v3  ;;  %v3754_v35 = vpop.f32.mrb[22].mxu1 }
 0x275   : > { %v2974_v60 = vadd.f32 %v2973_v28, %v2972_v57  ;;  %3638 = vst.msk [vmem:[%s6295_s5 + $0x178] sm:$0xff] %vm1145_vm4, %v3754_v35  ;;  %v2857_v33 = vpop.f32.mrb[23].mxu1  ;;  %v3026_v48 = vmul.f32 %v3754_v35, %v3754_v35  ;;  %v3078_v7 = vsel %vm1145_vm4, %v3025_v47, 0.0  ;;  %v2979_v5 = vsel %vm1145_vm4, %v3754_v35, 0.0 }
 0x276   : > { %v3074_v37 = vsel %vm1145_vm4, %v3023_v27, 0.0  ;;  %3636 = vst.msk [vmem:[%s6295_s5 + $0x158] sm:$0xff] %vm1145_vm4, %v2857_v33  ;;  %v2975_v39 = vsel %vm1145_vm4, %v2857_v33, 0.0  ;;  %v3024_v54 = vmul.f32 %v2857_v33, %v2857_v33 }
 0x277   : > { %v3075_v25 = vadd.f32 %v3074_v37, %v3073_v59  ;;  %v2976_v34 = vadd.f32 %v2975_v39, %v2974_v60  ;;  %v3080_v20 = vsel %vm1145_vm4, %v3026_v48, 0.0 }
 0x278   : > { %v3076_v45 = vsel %vm1145_vm4, %v3024_v54, 0.0 }
 0x279   : > { %v2978_v49 = vadd.f32 %v2977_v30, %v2976_v34  ;;  %v3077_v58 = vadd.f32 %v3076_v45, %v3075_v25 }
 0x27b   : > { %v3079_v50 = vadd.f32 %v3078_v7, %v3077_v58  ;;  %v2980_v21 = vadd.f32 %v2979_v5, %v2978_v49 }
 0x27d   : > { %v3721_v11 = vpop.f32.mrb[24].mxu0  ;;  %v3081_v23 = vadd.f32 %v3080_v20, %v3079_v50 }
 0x27e   : > { %1479 = vst.msk [vmem:[%s6295_s5 + $0x1a0] sm:$0xff] %vm1145_vm4, %v3721_v11  ;;  %v1422_v22 = vpop.f32.mrb[25].mxu0  ;;  %v1580_v10 = vmul.f32 %v3721_v11, %v3721_v11  ;;  %v1536_v57 = vsel %vm1145_vm4, %v3721_v11, 0.0 }
 0x27f   : > { %1477 = vst.msk [vmem:[%s6295_s5 + $0x180] sm:$0xff] %vm1145_vm4, %v1422_v22  ;;  %v1532_v55 = vsel %vm1145_vm4, %v1422_v22, 0.0  ;;  %v1578_v0 = vmul.f32 %v1422_v22, %v1422_v22  ;;  %v3722_v13 = vpop.f32.mrb[26].mxu0 }
 0x280   : > { %v1533_v9 = vadd.f32 %v1532_v55, %v1531_v18  ;;  %1480 = vst.msk [vmem:[%s6295_s5 + $0x1a8] sm:$0xff] %vm1145_vm4, %v3722_v13  ;;  %v1425_v19 = vpop.f32.mrb[27].mxu0  ;;  %v1581_v43 = vmul.f32 %v3722_v13, %v3722_v13  ;;  %v1637_v14 = vsel %vm1145_vm4, %v1580_v10, 0.0  ;;  %v1538_v53 = vsel %vm1145_vm4, %v3722_v13, 0.0 }
 0x281   : > { %v1633_v42 = vsel %vm1145_vm4, %v1578_v0, 0.0  ;;  %1478 = vst.msk [vmem:[%s6295_s5 + $0x188] sm:$0xff] %vm1145_vm4, %v1425_v19  ;;  %v1534_v40 = vsel %vm1145_vm4, %v1425_v19, 0.0  ;;  %v1579_v62 = vmul.f32 %v1425_v19, %v1425_v19 }
 0x282   : > { %v1634_v4 = vadd.f32 %v1633_v42, %v1632_v24  ;;  %v1535_v29 = vadd.f32 %v1534_v40, %v1533_v9  ;;  %v1639_v12 = vsel %vm1145_vm4, %v1581_v43, 0.0 }
 0x283   : > { %v1635_v17 = vsel %vm1145_vm4, %v1579_v62, 0.0 }
 0x284   : > { %v1537_v59 = vadd.f32 %v1536_v57, %v1535_v29  ;;  %v1636_v61 = vadd.f32 %v1635_v17, %v1634_v4 }
 0x286   : > { %v1638_v51 = vadd.f32 %v1637_v14, %v1636_v61  ;;  %v1539_v16 = vadd.f32 %v1538_v53, %v1537_v59 }
 0x288   : > { %v1640_v36 = vadd.f32 %v1639_v12, %v1638_v51 }
 0x28e   : > { %v3757_v44 = vpop.f32.mrb[24].mxu1 }
 0x28f   : > { %3641 = vst.msk [vmem:[%s6295_s5 + $0x1b0] sm:$0xff] %vm1145_vm4, %v3757_v44  ;;  %v2870_v32 = vpop.f32.mrb[25].mxu1  ;;  %v3029_v26 = vmul.f32 %v3757_v44, %v3757_v44  ;;  %v2985_v18 = vsel %vm1145_vm4, %v3757_v44, 0.0 }
 0x290   : > { %3639 = vst.msk [vmem:[%s6295_s5 + $0x190] sm:$0xff] %vm1145_vm4, %v2870_v32  ;;  %v2981_v52 = vsel %vm1145_vm4, %v2870_v32, 0.0  ;;  %v3027_v63 = vmul.f32 %v2870_v32, %v2870_v32  ;;  %v3758_v56 = vpop.f32.mrb[26].mxu1 }
 0x291   : > { %v2982_v31 = vadd.f32 %v2981_v52, %v2980_v21  ;;  %3642 = vst.msk [vmem:[%s6295_s5 + $0x1b8] sm:$0xff] %vm1145_vm4, %v3758_v56  ;;  %v2873_v41 = vpop.f32.mrb[27].mxu1  ;;  %v3030_v2 = vmul.f32 %v3758_v56, %v3758_v56  ;;  %v3086_v28 = vsel %vm1145_vm4, %v3029_v26, 0.0  ;;  %v2987_v27 = vsel %vm1145_vm4, %v3758_v56, 0.0 }
 0x292   : > { %v3082_v6 = vsel %vm1145_vm4, %v3027_v63, 0.0  ;;  %3640 = vst.msk [vmem:[%s6295_s5 + $0x198] sm:$0xff] %vm1145_vm4, %v2873_v41  ;;  %v2983_v15 = vsel %vm1145_vm4, %v2873_v41, 0.0  ;;  %v3028_v38 = vmul.f32 %v2873_v41, %v2873_v41 }
 0x293   : > { %v3083_v8 = vadd.f32 %v3082_v6, %v3081_v23  ;;  %v2984_v1 = vadd.f32 %v2983_v15, %v2982_v31  ;;  %v3088_v33 = vsel %vm1145_vm4, %v3030_v2, 0.0 }
 0x294   : > { %v3084_v24 = vsel %vm1145_vm4, %v3028_v38, 0.0 }
 0x295   : > { %v2986_v46 = vadd.f32 %v2985_v18, %v2984_v1  ;;  %v3085_v3 = vadd.f32 %v3084_v24, %v3083_v8 }
 0x297   : > { %v3087_v35 = vadd.f32 %v3086_v28, %v3085_v3  ;;  %v2988_v60 = vadd.f32 %v2987_v27, %v2986_v46 }
 0x299   : > { %v3725_v47 = vpop.f32.mrb[28].mxu0  ;;  %v3089_v37 = vadd.f32 %v3088_v33, %v3087_v35 }
 0x29a   : > { %1483 = vst.msk [vmem:[%s6295_s5 + $0x1e0] sm:$0xff] %vm1145_vm4, %v3725_v47  ;;  %v1438_v39 = vpop.f32.mrb[29].mxu0  ;;  %v1584_v45 = vmul.f32 %v3725_v47, %v3725_v47  ;;  %v1544_v21 = vsel %vm1145_vm4, %v3725_v47, 0.0 }
 0x29b   : > { %1481 = vst.msk [vmem:[%s6295_s5 + $0x1c0] sm:$0xff] %vm1145_vm4, %v1438_v39  ;;  %v1540_v54 = vsel %vm1145_vm4, %v1438_v39, 0.0  ;;  %v1582_v25 = vmul.f32 %v1438_v39, %v1438_v39  ;;  %v3726_v34 = vpop.f32.mrb[30].mxu0 }
 0x29c   : > { %v1541_v30 = vadd.f32 %v1540_v54, %v1539_v16  ;;  %1484 = vst.msk [vmem:[%s6295_s5 + $0x1e8] sm:$0xff] %vm1145_vm4, %v3726_v34  ;;  %v1441_v48 = vpop.f32.mrb[31].mxu0  ;;  %v1585_v20 = vmul.f32 %v3726_v34, %v3726_v34  ;;  %v1645_v55 = vsel %vm1145_vm4, %v1584_v45, 0.0  ;;  %v1546_v0 = vsel %vm1145_vm4, %v3726_v34, 0.0 }
 0x29d   : > { %v1641_v49 = vsel %vm1145_vm4, %v1582_v25, 0.0  ;;  %1482 = vst.msk [vmem:[%s6295_s5 + $0x1c8] sm:$0xff] %vm1145_vm4, %v1441_v48  ;;  %v1542_v58 = vsel %vm1145_vm4, %v1441_v48, 0.0  ;;  %v1583_v7 = vmul.f32 %v1441_v48, %v1441_v48 }
 0x29e   : > { %v1642_v5 = vadd.f32 %v1641_v49, %v1640_v36  ;;  %v1543_v50 = vadd.f32 %v1542_v58, %v1541_v30  ;;  %v1647_v19 = vsel %vm1145_vm4, %v1585_v20, 0.0 }
 0x29f   : > { %v1643_v11 = vsel %vm1145_vm4, %v1583_v7, 0.0 }
 0x2a0   : > { %v1545_v23 = vadd.f32 %v1544_v21, %v1543_v50  ;;  %v1644_v22 = vadd.f32 %v1643_v11, %v1642_v5 }
 0x2a2   : > { %v1547_v13 = vadd.f32 %v1546_v0, %v1545_v23  ;;  %v1646_v9 = vadd.f32 %v1645_v55, %v1644_v22 }
 0x2a4   : > { %v1548_v10 = vrot.slane %v1547_v13, 4  ;;  %v1648_v42 = vadd.f32 %v1647_v19, %v1646_v9 }
 0x2a6   : > { %v1549_v40 = vadd.f32 %v1548_v10, %v1547_v13  ;;  %v1649_v62 = vrot.slane %v1648_v42, 4 }
 0x2a8   : > { %v1550_v4 = vrot.slane %v1549_v40, 2  ;;  %v1650_v29 = vadd.f32 %v1649_v62, %v1648_v42 }
 0x2aa   : > { %v3761_v57 = vpop.f32.mrb[28].mxu1  ;;  %v1551_v43 = vadd.f32 %v1550_v4, %v1549_v40  ;;  %v1651_v17 = vrot.slane %v1650_v29, 2 }
 0x2ab   : > { %3645 = vst.msk [vmem:[%s6295_s5 + $0x1f0] sm:$0xff] %vm1145_vm4, %v3761_v57  ;;  %v2886_v59 = vpop.f32.mrb[29].mxu1  ;;  %v3033_v12 = vmul.f32 %v3761_v57, %v3761_v57  ;;  %v2993_v6 = vsel %vm1145_vm4, %v3761_v57, 0.0 }
 0x2ac   : > { %3643 = vst.msk [vmem:[%s6295_s5 + $0x1d0] sm:$0xff] %vm1145_vm4, %v2886_v59  ;;  %v2989_v61 = vsel %vm1145_vm4, %v2886_v59, 0.0  ;;  %v3031_v14 = vmul.f32 %v2886_v59, %v2886_v59  ;;  %v3762_v53 = vpop.f32.mrb[30].mxu1  ;;  %v1552_v51 = vrot.slane %v1551_v43, 1  ;;  %v1652_v16 = vadd.f32 %v1651_v17, %v1650_v29 }
 0x2ad   : > { %v2990_v36 = vadd.f32 %v2989_v61, %v2988_v60  ;;  %3646 = vst.msk [vmem:[%s6295_s5 + $0x1f8] sm:$0xff] %vm1145_vm4, %v3762_v53  ;;  %v2889_v44 = vpop.f32.mrb[31].mxu1  ;;  %v3034_v15 = vmul.f32 %v3762_v53, %v3762_v53  ;;  %v3094_v2 = vsel %vm1145_vm4, %v3033_v12, 0.0  ;;  %v2995_v24 = vsel %vm1145_vm4, %v3762_v53, 0.0 }
 0x2ae   : > { %v3090_v32 = vsel %vm1145_vm4, %v3031_v14, 0.0  ;;  %3644 = vst.msk [vmem:[%s6295_s5 + $0x1d8] sm:$0xff] %vm1145_vm4, %v2889_v44  ;;  %v2991_v52 = vsel %vm1145_vm4, %v2889_v44, 0.0  ;;  %v3032_v63 = vmul.f32 %v2889_v44, %v2889_v44  ;;  %v6548_v56 = vadd.f32 %v1552_v51, %v1551_v43 }
 0x2af   : > { %v3091_v31 = vadd.f32 %v3090_v32, %v3089_v37  ;;  %v2992_v41 = vadd.f32 %v2991_v52, %v2990_v36  ;;  %v1653_v26 = vrot.slane %v1652_v16, 1  ;;  %v3096_v28 = vsel %vm1145_vm4, %v3034_v15, 0.0 }
 0x2b0   : > { %v3092_v38 = vsel %vm1145_vm4, %v3032_v63, 0.0  ;;  %1657 = vrot.lane.b32.xlu0 %v6548_v56, %s4783_s6 }
 0x2b1   : > { %v2994_v8 = vadd.f32 %v2993_v6, %v2992_v41  ;;  %v3093_v1 = vadd.f32 %v3092_v38, %v3091_v31  ;;  %v1654_v18 = vadd.f32 %v1653_v26, %v1652_v16 }
 0x2b3   : > { %v2996_v46 = vadd.f32 %v2995_v24, %v2994_v8  ;;  %v3095_v3 = vadd.f32 %v3094_v2, %v3093_v1  ;;  %1663 = vrot.lane.b32.xlu1 %v1654_v18, %s4783_s6 }
 0x2b5   : > { %v2997_v27 = vrot.slane %v2996_v46, 4  ;;  %v3097_v35 = vadd.f32 %v3096_v28, %v3095_v3 }
 0x2b7   : > { %v2998_v60 = vadd.f32 %v2997_v27, %v2996_v46  ;;  %v3098_v33 = vrot.slane %v3097_v35, 4 }
 0x2b9   : > { %v2999_v47 = vrot.slane %v2998_v60, 2  ;;  %v3099_v37 = vadd.f32 %v3098_v33, %v3097_v35 }
 0x2bb   : > { %v3000_v39 = vadd.f32 %v2999_v47, %v2998_v60  ;;  %v3100_v54 = vrot.slane %v3099_v37, 2 }
 0x2bd   : > { %v3001_v25 = vrot.slane %v3000_v39, 1  ;;  %v3101_v34 = vadd.f32 %v3100_v54, %v3099_v37 }
 0x2be   : > { %4667 = shalt.err (!%p4664_p3)
}
 0x2bf   : > { %s4668_s28 = scalar_lea.hbm %s6563_s12, 8192  ;;  %s4672_s8 = scalar_lea.hbm %s6686_s2, 16384 }
 0x2c0   : > { %p4669_p4 = scmp.ne.s32.totalorder %s6563_s12, %s4668_s28  ;;  %p4673_p9 = scmp.lt.u32.totalorder %s6563_s12, %s6686_s2 }
 0x2c1   : > { %p4674_p10 = scmp.lt.u32.totalorder %s4672_s8, %s4668_s28  ;;  %p4676_p12 = scmp.lt.u32.totalorder %s4668_s28, %s6563_s12 }
 0x2c2   : > { %p4670_p7 = pnand %p4669_p4, %p4853_p5 }
 0x2c3   : > { %p4675_p11 = por %p4674_p10, %p4673_p9 }
 0x2c4   : > { %p4671_p8 = pneg %p4670_p7 }
 0x2c5   : > { %p4677_p13 = por %p4676_p12, %p4675_p11 }
 0x2c7   : > { %p4678_p0 = pnand %p4677_p13, %p4671_p8 }
 0x2c9   : > { %4681 = shalt.err (!%p4678_p0)
}
 0x2ca   : > { %s4785_s14 = smov 128   ;;  %v3002_v30 = vadd.f32 %v3001_v25, %v3000_v39  ;;  %v3102_v48 = vrot.slane %v3101_v34, 1  ;;  %s3124_s22 = sand.u32 1, %s4834_s19   ;;  %vm3116_vm7 = vcmask 57344  }
 0x2cb   : > { %3766 = dma.vmem_to_hbm [thread:$0]  (%p4853_p5), %s6565_s9, 8192, %s6563_s12, %s3120_s13, %s4785_s14, %s4785_s14, %s4779_s7  }
 0x2cc   : > { %3106 = vrot.lane.b32.xlu0 %v3002_v30, %s4783_s6  ;;  %v3103_v45 = vadd.f32 %v3102_v48, %v3101_v34  ;;  %s3650_s23 = sshll.u32 %s4834_s19, 4  ;;  %s200_s27 = scalar_lea.vmem [#allocation4], %s6292_s29 }
 0x2cd   : > { %s3157_s28 = sshll.u32 %s200_s27, 4  ;;  %s206_s7 = scalar_lea.vmem [#allocation6], %s6292_s29  ;;  %s6606_s28 = int_to_ptr.vmem [resolvable:$true] %s3157_s28 }
 0x2ce   : > { %3112 = vrot.lane.b32.xlu1 %v3103_v45, %s4783_s6  ;;  %s3170_s9 = sshll.u32 %s206_s7, 4  ;;  %s6604_s13 = scalar_lea.hbm %s6687_s3, %s3650_s23  ;;  %s6614_s9 = int_to_ptr.vmem [resolvable:$true] %s3170_s9 }
 0x2cf   : > { %s6612_s5 = scalar_lea.hbm %s6688_s4, %s3650_s23  ;;  %s6616_s8 = scalar_lea.sflag [#allocation5], %s3124_s22 }
 0x2d0   : > { %s4682_s10 = scalar_lea.vmem %s6606_s28, 16  ;;  %s4786_s11 = smov [#allocation4]  }
 0x2d1   : > { %p4683_p1 = scmp.ne.s32.totalorder %s6606_s28, %s4682_s10  ;;  %s4686_s14 = sshll.u32 %s4786_s11, 4  ;;  %s4687_s14 = int_to_ptr.vmem [resolvable:$false] %s4686_s14 }
 0x2d2   : > { %s4688_s12 = scalar_lea.vmem %s4687_s14, 32  ;;  %p4689_p4 = scmp.lt.s32.totalorder %s6606_s28, %s4687_s14 }
 0x2d3   : > { %p4684_p2 = pnand %p4683_p1, %p4853_p5  ;;  %p4690_p7 = scmp.lt.s32.totalorder %s4688_s12, %s4682_s10 }
 0x2d5   : > { %p4685_p3 = pneg %p4684_p2  ;;  %p4691_p8 = por %p4690_p7, %p4689_p4 }
 0x2d7   : > { %p4692_p9 = pnand %p4691_p8, %p4685_p3 }
 0x322   : > { %v1658_v49 = vpop.permute.xlu0 %1657 }
 0x323   : > { %v1660_v7 = vadd.f32 %v1658_v49, %v6548_v56 }
 0x325   : > { %v1664_v58 = vpop.permute.xlu1 %1663  ;;  %v3104_v50 = vadd.f32 %v3002_v30, %v1660_v7 }
 0x326   : > { %v1666_v5 = vadd.f32 %v1664_v58, %v1654_v18 }
 0x328   : > { %v3110_v11 = vadd.f32 %v3103_v45, %v1666_v5 }
 0x33e   : > { %v3107_v21 = vpop.permute.xlu0 %3106 }
 0x33f   : > { %v3109_v20 = vadd.f32 %v3107_v21, %v3104_v50 }
 0x340   : > { %v3113_v23 = vpop.permute.xlu1 %3112 }
 0x341   : > { %v3115_v22 = vadd.f32 %v3113_v23, %v3110_v11  ;;  %3117 = vst.msk [vmem:[%s200_s27] sm:$0x1] %vm3116_vm7, %v3109_v20 }
 0x342   : > { %4695 = shalt.err (!%p4692_p9)
}
 0x343   : > { %s4696_s22 = scalar_lea.hbm %s6604_s13, 16  ;;  %s4700_s6 = scalar_lea.hbm %s6687_s3, 32 }
 0x344   : > { %p4697_p10 = scmp.ne.s32.totalorder %s6604_s13, %s4696_s22  ;;  %p4701_p13 = scmp.lt.u32.totalorder %s6604_s13, %s6687_s3 }
 0x345   : > { %p4702_p0 = scmp.lt.u32.totalorder %s4700_s6, %s4696_s22  ;;  %p4704_p2 = scmp.lt.u32.totalorder %s4696_s22, %s6604_s13 }
 0x346   : > { %p4698_p11 = pnand %p4697_p10, %p4853_p5 }
 0x347   : > { %p4703_p1 = por %p4702_p0, %p4701_p13 }
 0x348   : > { %p4699_p12 = pneg %p4698_p11 }
 0x349   : > { %p4705_p3 = por %p4704_p2, %p4703_p1 }
 0x34b   : > { %p4706_p4 = pnand %p4705_p3, %p4699_p12 }
 0x34d   : > { %4709 = shalt.err (!%p4706_p4)
}
 0x34e   : > { %3767 = dma.vmem_to_hbm [thread:$0]  (%p4853_p5), %s6606_s28, 16, %s6604_s13, %s6616_s8   ;;  %3118 = vst.msk [vmem:[%s206_s7] sm:$0x1] %vm3116_vm7, %v3115_v22 }
 0x34f   : > { %s4710_s10 = scalar_lea.vmem %s6614_s9, 16  ;;  %s4787_s11 = smov [#allocation6]  }
 0x350   : > { %p4711_p7 = scmp.ne.s32.totalorder %s6614_s9, %s4710_s10  ;;  %s4714_s14 = sshll.u32 %s4787_s11, 4  ;;  %s4715_s14 = int_to_ptr.vmem [resolvable:$false] %s4714_s14 }
 0x351   : > { %s4716_s12 = scalar_lea.vmem %s4715_s14, 32  ;;  %p4717_p10 = scmp.lt.s32.totalorder %s6614_s9, %s4715_s14 }
 0x352   : > { %p4712_p8 = pnand %p4711_p7, %p4853_p5  ;;  %p4718_p11 = scmp.lt.s32.totalorder %s4716_s12, %s4710_s10 }
 0x354   : > { %p4713_p9 = pneg %p4712_p8  ;;  %p4719_p12 = por %p4718_p11, %p4717_p10 }
 0x356   : > { %p4720_p13 = pnand %p4719_p12, %p4713_p9 }
 0x358   : > { %4723 = shalt.err (!%p4720_p13)
}
 0x359   : > { %s4724_s29 = scalar_lea.hbm %s6612_s5, 16  ;;  %s4728_s13 = scalar_lea.hbm %s6688_s4, 32 }
 0x35a   : > { %p4725_p0 = scmp.ne.s32.totalorder %s6612_s5, %s4724_s29  ;;  %p4729_p3 = scmp.lt.u32.totalorder %s6612_s5, %s6688_s4 }
 0x35b   : > { %p4730_p4 = scmp.lt.u32.totalorder %s4728_s13, %s4724_s29  ;;  %p4732_p8 = scmp.lt.u32.totalorder %s4724_s29, %s6612_s5 }
 0x35c   : > { %p4726_p1 = pnand %p4725_p0, %p4853_p5 }
 0x35d   : > { %p4731_p7 = por %p4730_p4, %p4729_p3 }
 0x35e   : > { %p4727_p2 = pneg %p4726_p1 }
 0x35f   : > { %p4733_p9 = por %p4732_p8, %p4731_p7 }
 0x361   : > { %p4734_p10 = pnand %p4733_p9, %p4727_p2 }
 0x363   : > { %4737 = shalt.err (!%p4734_p10)
}
 0x364   : > { %3768 = dma.vmem_to_hbm [thread:$0]  (%p4853_p5), %s6614_s9, 16, %s6612_s5, %s6616_s8  }
 0x365 PF: > { %p3782_p11 = scmp.ge.s32.totalorder %s4776_s18, 2  ;;  %s3182_s27 = sand.u32 1, %s4764_s15  }
 0x366   : > { %s3183_s6 = scalar_lea.sflag [#allocation3], %s3182_s27 }
 0x367   : > { %p3773_p12 = pnand %p3782_p11, %p4857_p6 }
 0x369   : > { %4755 = dma.done.wait (!%p3773_p12), %s3183_s6, 8192  }
 0x36a   : > { %4757 = vsyncadd (!%p3773_p12), %s3183_s6, 4294959104  ;;  %s3191_s19 = sand.u32 1, %s3282_s20  }
 0x36b   : > { %s3192_s30 = scalar_lea.sflag [#allocation5], %s3191_s19 }
 0x36c   : > { %4759 = dma.done.wait (!%p3773_p12), %s3192_s30, 32  }
 0x36d   : > { %4761 = vsyncadd (!%p3773_p12), %s3192_s30, 4294967264  ;;  %p18_p5 = scmp.ge.s32.totalorder %s4838_s21, 4   ;;  %s6788_s15 = smov %s4768_s16 }
 0x36e   : > { %s6789_s16 = smov %s4772_s17  ;;  %s6790_s17 = smov %s4851_s24 }
 0x36f   : > { %s6791_s18 = smov %s4838_s21  ;;  %20 = sbr.rel (!%p18_p5) target bundleno = 5 (0x5), region = 99 }
 0x376   :  { %3204 = vsyncpa [#allocation3], 1 }
 0x377   :  { %3206 = vsyncpa [#allocation3 + $0x1], 1 }
 0x378   :  { %3207 = vsyncpa [#allocation5], 1 }
 0x379   :  { %3209 = vsyncpa [#allocation5 + $0x1], 1 }

</bundles_post_ra>
